<compile_context>
chip_gen: v7x
topology: tpu7x:2x2x1
jax: 0.10.0
libtpu: 0.0.40
codegen_flags: <defaults>
</compile_context>

<pallas_src>
import jax
import jax.numpy as jnp
from jax.experimental import pallas as pl
from jax.experimental.pallas import tpu as pltpu

NUM_CLASSES = 10
B = 2
H = W = 100                 # spatial size forced by fc1 in_features = 32*49*49
C_OUT = 32
KH = KW = 3
P = (H - KH + 1) // 2       # 49  (conv 98 -> maxpool 2x2 -> 49)
PP = P * P                  # 2401
K_FC = C_OUT * PP           # 76832
HID = 128
N_SPLIT = 2                 # split fc1 output columns across 2 halves (v7x megacore)
HID_HALF = HID // N_SPLIT   # 64
TK = 9728                   # fc1 K tile (76 * 128)
K_PAD = 8 * TK              # 77824 zero-padded contraction dim (8 grid steps)
C_CHUNK = 8                 # conv output-channel chunk per grid step


# ---------------------------------------------------------------------------
# Wrapper-side im2col over the 4 pooling phases (tiny, pure layout plumbing).
# patches[b, a*2+c, di*3+dj, p*49+q] = x[b, 0, 2p+a+di, 2q+c+dj]
# ---------------------------------------------------------------------------
def im2col_pooled_phases(x):
    bn = x.shape[0]
    x2 = x[:, 0]                                   # (B, 100, 100)
    cols = []
    for a in range(2):                             # pooling-window row offset
        for c in range(2):                         # pooling-window col offset
            for di in range(KH):
                for dj in range(KW):
                    sl = x2[:, a + di: a + di + 2 * P - 1: 2,
                            c + dj: c + dj + 2 * P - 1: 2]   # (B, 49, 49)
                    cols.append(sl.reshape(bn, PP))
    return jnp.stack(cols, axis=1).reshape(bn, 4, KH * KW, PP)   # (B, 4, 9, 2401)


# ---------------------------------------------------------------------------
# Kernel 1: conv(3x3) via MXU matmul per pooling phase + max + bias + ReLU
# ---------------------------------------------------------------------------
def conv_relu_pool_kernel(p_ref, w_ref, b_ref, out_ref):
    # p_ref  : (1, 4, 9, 2401)  pooling-phase patch stacks for one image
    # w_ref  : (C_CHUNK, 9)     conv weights for this channel chunk
    # b_ref  : (C_CHUNK, 1)     conv bias for this channel chunk
    # out_ref: (1, C_CHUNK, 2401) lane-dense pooled activations
    w = w_ref[...]
    res = None
    for ph in range(4):
        y = jnp.dot(w, p_ref[0, ph], preferred_element_type=jnp.float32)  # (C_CHUNK, 2401)
        res = y if res is None else jnp.maximum(res, y)
    # per-channel bias + ReLU after the max is exactly equivalent to torch's
    # conv+bias -> ReLU -> maxpool order (bias constant per channel, ReLU monotone).
    out_ref[0] = jnp.maximum(res + b_ref[...], 0.0).astype(out_ref.dtype)


def conv_relu_pool(patches, w9, b_col):
    bn = patches.shape[0]
    return pl.pallas_call(
        conv_relu_pool_kernel,
        out_shape=jax.ShapeDtypeStruct((bn, C_OUT, PP), jnp.float32),
        grid_spec=pltpu.PrefetchScalarGridSpec(
            num_scalar_prefetch=0,
            grid=(bn, C_OUT // C_CHUNK),
            in_specs=[
                pl.BlockSpec((1, 4, KH * KW, PP), lambda i, c: (i, 0, 0, 0)),
                pl.BlockSpec((C_CHUNK, KH * KW), lambda i, c: (c, 0)),
                pl.BlockSpec((C_CHUNK, 1), lambda i, c: (c, 0)),
            ],
            out_specs=pl.BlockSpec((1, C_CHUNK, PP), lambda i, c: (i, c, 0)),
        ),
        compiler_params=pltpu.CompilerParams(
            dimension_semantics=("parallel", "parallel")),
    )(patches, w9, b_col)


# ---------------------------------------------------------------------------
# Kernel 2: fc1 (K-tiled, N-split matmul) + bias + ReLU + fc2 + bias
# grid = (N_SPLIT, K_PAD // TK): parallel over the two 64-wide hidden halves
# (both v7x TensorCores stream half the weight), arbitrary (reduction) over K.
# ---------------------------------------------------------------------------
def fc_head_kernel(h_ref, w1_ref, b1_ref, w2_ref, b2_ref, out_ref, acc_ref):
    n = pl.program_id(0)
    k = pl.program_id(1)

    @pl.when(k == 0)
    def _():
        acc_ref[...] = jnp.zeros_like(acc_ref)

    acc_ref[...] += jnp.dot(h_ref[...], w1_ref[0],
                            preferred_element_type=jnp.float32)      # (B, 64)

    @pl.when(k == pl.num_programs(1) - 1)
    def _():
        h1 = jnp.maximum(acc_ref[...] + b1_ref[0], 0.0)               # (B, 64)
        part = jnp.dot(h1, w2_ref[0], preferred_element_type=jnp.float32)  # (B, nc)
        # add fc2 bias only in the n == 0 partial (halves are summed in wrapper)
        scale = (n == 0).astype(jnp.float32)
        out_ref[0] = (part + scale * b2_ref[...]).astype(out_ref.dtype)


def fc_head(h_pad, w1_split, b1_split, w2_split, b2_row):
    bn = h_pad.shape[0]
    nc = w2_split.shape[-1]
    parts = pl.pallas_call(
        fc_head_kernel,
        out_shape=jax.ShapeDtypeStruct((N_SPLIT, bn, nc), jnp.float32),
        grid_spec=pltpu.PrefetchScalarGridSpec(
            num_scalar_prefetch=0,
            grid=(N_SPLIT, K_PAD // TK),
            in_specs=[
                pl.BlockSpec((bn, TK), lambda n, k: (0, k)),
                pl.BlockSpec((1, TK, HID_HALF), lambda n, k: (n, k, 0)),
                pl.BlockSpec((1, 1, HID_HALF), lambda n, k: (n, 0, 0)),
                pl.BlockSpec((1, HID_HALF, nc), lambda n, k: (n, 0, 0)),
                pl.BlockSpec((1, nc), lambda n, k: (0, 0)),
            ],
            out_specs=pl.BlockSpec((1, bn, nc), lambda n, k: (n, 0, 0)),
            scratch_shapes=[pltpu.VMEM((bn, HID_HALF), jnp.float32)],
        ),
        compiler_params=pltpu.CompilerParams(
            dimension_semantics=("parallel", "arbitrary")),
    )(h_pad, w1_split, b1_split, w2_split, b2_row)
    return jnp.sum(parts, axis=0)                                     # (B, nc)


# ---------------------------------------------------------------------------
# Full forward pass (matches SimpleCNN.forward)
# ---------------------------------------------------------------------------
def simple_cnn_forward(x, params):
    bn = x.shape[0]
    patches = im2col_pooled_phases(x)                                 # (B, 4, 9, 2401)
    pooled = conv_relu_pool(patches, params["conv_w9"], params["conv_b"])  # (B,32,2401)
    h = pooled.reshape(bn, K_FC)              # same flatten order as torch view(B,-1)
    h_pad = jnp.pad(h, ((0, 0), (0, K_PAD - K_FC)))   # tiny (~0.6 MB); w1 tail is zero
    return fc_head(h_pad, params["fc1_w"], params["fc1_b"],
                   params["fc2_w"], params["fc2_b"])


# ---------------------------------------------------------------------------
# Parameters: torch-shaped raw params + one-time (outside jit) prep that does
# the fc1 zero-padding / half-splitting and conv weight flattening.
# ---------------------------------------------------------------------------
def init_params(key):
    k1, k2, k3 = jax.random.split(key, 3)
    return {
        # torch shapes: conv1.weight (32,1,3,3), conv1.bias (32,)
        "conv_w": jax.random.normal(k1, (C_OUT, 1, KH, KW), jnp.float32) * 0.1,
        "conv_b": jnp.linspace(-0.05, 0.05, C_OUT, dtype=jnp.float32),
        # torch fc1.weight is (128, 76832); we store its transpose (in, out)
        "fc1_w": jax.random.normal(k2, (K_FC, HID), jnp.float32) * 0.01,
        "fc1_b": jnp.linspace(-0.01, 0.01, HID, dtype=jnp.float32),
        # torch fc2.weight is (nc, 128); we store its transpose (in, out)
        "fc2_w": jax.random.normal(k3, (HID, NUM_CLASSES), jnp.float32) * 0.1,
        "fc2_b": jnp.linspace(-0.1, 0.1, NUM_CLASSES, dtype=jnp.float32),
    }


def prepare_params(raw):
    """One-time weight layout prep (NOT inside the jitted forward)."""
    w1 = jnp.pad(raw["fc1_w"], ((0, K_PAD - K_FC), (0, 0)))            # (K_PAD, 128)
    w1 = w1.reshape(K_PAD, N_SPLIT, HID_HALF).transpose(1, 0, 2)       # (2, K_PAD, 64)
    return {
        "conv_w9": raw["conv_w"].reshape(C_OUT, KH * KW),              # (32, 9)
        "conv_b": raw["conv_b"].reshape(C_OUT, 1),                     # (32, 1)
        "fc1_w": w1,
        "fc1_b": raw["fc1_b"].reshape(N_SPLIT, 1, HID_HALF),           # (2, 1, 64)
        "fc2_w": raw["fc2_w"].reshape(N_SPLIT, HID_HALF, NUM_CLASSES), # (2, 64, nc)
        "fc2_b": raw["fc2_b"].reshape(1, NUM_CLASSES),                 # (1, nc)
    }


# ---------------------------------------------------------------------------
# Pure-JAX reference (torch order of ops, full f32) for a correctness check.
# ---------------------------------------------------------------------------
def reference_forward(x, raw):
    hp = jax.lax.Precision.HIGHEST
    y = jax.lax.conv_general_dilated(
        x, raw["conv_w"], (1, 1), "VALID",
        dimension_numbers=("NCHW", "OIHW", "NCHW"), precision=hp)      # (B,32,98,98)
    y = jnp.maximum(y + raw["conv_b"][None, :, None, None], 0.0)
    y = y.reshape(x.shape[0], C_OUT, P, 2, P, 2).max(axis=(3, 5))      # (B,32,49,49)
    h = y.reshape(x.shape[0], -1)
    h1 = jnp.maximum(jnp.dot(h, raw["fc1_w"], precision=hp) + raw["fc1_b"], 0.0)
    return jnp.dot(h1, raw["fc2_w"], precision=hp) + raw["fc2_b"]


if __name__ == "__main__":
    key = jax.random.PRNGKey(0)
    pkey, xkey = jax.random.split(key)
    raw = init_params(pkey)
    params = prepare_params(raw)        # fc1 pad/split happens ONCE, outside jit
    # fc1 in_features = 32*49*49 forces the 100x100 input; batch kept small.
    x = jax.random.normal(xkey, (B, 1, H, W), jnp.float32)

    out = jax.jit(simple_cnn_forward)(x, params)
    out = jax.block_until_ready(out)
    assert out.shape == (B, NUM_CLASSES)
    assert out.dtype == jnp.float32

    ref = jax.block_until_ready(reference_forward(x, raw))
    assert bool(jnp.allclose(out, ref, rtol=5e-3, atol=5e-3))
    print("KERNEL_OK")
</pallas_src>

<mosaic_0001>
module attributes {stable_mosaic.version = 11 : i64} {
  func.func @conv_relu_pool_kernel(%arg0: i32, %arg1: i32, %arg2: memref<1x4x9x2401xf32, #tpu.memory_space<vmem>>, %arg3: memref<8x9xf32, #tpu.memory_space<vmem>>, %arg4: memref<8x1xf32, #tpu.memory_space<vmem>>, %arg5: memref<1x8x2401xf32, #tpu.memory_space<vmem>>) attributes {dimension_semantics = [#tpu.dimension_semantics<parallel>, #tpu.dimension_semantics<parallel>], iteration_bounds = array<i64: 2, 4>, scalar_prefetch = 0 : i64, scratch_operands = 0 : i64, tpu.core_type = #tpu.core_type<tc>, window_params = [{transform_indices = @transform_0, window_bounds = array<i64: 1, 4, 9, 2401>}, {transform_indices = @transform_1, window_bounds = array<i64: 8, 9>}, {transform_indices = @transform_2, window_bounds = array<i64: 8, 1>}, {transform_indices = @transform_3, window_bounds = array<i64: 1, 8, 2401>}]} {
    %c0 = arith.constant 0 : index
    %c0_0 = arith.constant 0 : index
    %0 = vector.load %arg3[%c0, %c0_0] : memref<8x9xf32, #tpu.memory_space<vmem>>, vector<8x9xf32>
    %c0_1 = arith.constant 0 : index
    %c0_2 = arith.constant 0 : index
    %c0_3 = arith.constant 0 : index
    %c0_4 = arith.constant 0 : index
    %1 = vector.load %arg2[%c0_1, %c0_2, %c0_3, %c0_4] : memref<1x4x9x2401xf32, #tpu.memory_space<vmem>>, vector<1x1x9x2401xf32>
    %2 = vector.shape_cast %1 : vector<1x1x9x2401xf32> to vector<9x2401xf32>
    %cst = arith.constant dense<0.000000e+00> : vector<8x2401xf32>
    %3 = tpu.matmul %0, %2, %cst {dimension_numbers = #tpu.dot_dimension_numbers<[1], [0], [0], [1], [0, 0, 1, 1], [], []>} : vector<8x9xf32>, vector<9x2401xf32>, vector<8x2401xf32> -> vector<8x2401xf32>
    %c0_5 = arith.constant 0 : index
    %c1 = arith.constant 1 : index
    %c0_6 = arith.constant 0 : index
    %c0_7 = arith.constant 0 : index
    %4 = vector.load %arg2[%c0_5, %c1, %c0_6, %c0_7] : memref<1x4x9x2401xf32, #tpu.memory_space<vmem>>, vector<1x1x9x2401xf32>
    %5 = vector.shape_cast %4 : vector<1x1x9x2401xf32> to vector<9x2401xf32>
    %cst_8 = arith.constant dense<0.000000e+00> : vector<8x2401xf32>
    %6 = tpu.matmul %0, %5, %cst_8 {dimension_numbers = #tpu.dot_dimension_numbers<[1], [0], [0], [1], [0, 0, 1, 1], [], []>} : vector<8x9xf32>, vector<9x2401xf32>, vector<8x2401xf32> -> vector<8x2401xf32>
    %7 = arith.maximumf %3, %6 : vector<8x2401xf32>
    %c0_9 = arith.constant 0 : index
    %c2 = arith.constant 2 : index
    %c0_10 = arith.constant 0 : index
    %c0_11 = arith.constant 0 : index
    %8 = vector.load %arg2[%c0_9, %c2, %c0_10, %c0_11] : memref<1x4x9x2401xf32, #tpu.memory_space<vmem>>, vector<1x1x9x2401xf32>
    %9 = vector.shape_cast %8 : vector<1x1x9x2401xf32> to vector<9x2401xf32>
    %cst_12 = arith.constant dense<0.000000e+00> : vector<8x2401xf32>
    %10 = tpu.matmul %0, %9, %cst_12 {dimension_numbers = #tpu.dot_dimension_numbers<[1], [0], [0], [1], [0, 0, 1, 1], [], []>} : vector<8x9xf32>, vector<9x2401xf32>, vector<8x2401xf32> -> vector<8x2401xf32>
    %11 = arith.maximumf %7, %10 : vector<8x2401xf32>
    %c0_13 = arith.constant 0 : index
    %c3 = arith.constant 3 : index
    %c0_14 = arith.constant 0 : index
    %c0_15 = arith.constant 0 : index
    %12 = vector.load %arg2[%c0_13, %c3, %c0_14, %c0_15] : memref<1x4x9x2401xf32, #tpu.memory_space<vmem>>, vector<1x1x9x2401xf32>
    %13 = vector.shape_cast %12 : vector<1x1x9x2401xf32> to vector<9x2401xf32>
    %cst_16 = arith.constant dense<0.000000e+00> : vector<8x2401xf32>
    %14 = tpu.matmul %0, %13, %cst_16 {dimension_numbers = #tpu.dot_dimension_numbers<[1], [0], [0], [1], [0, 0, 1, 1], [], []>} : vector<8x9xf32>, vector<9x2401xf32>, vector<8x2401xf32> -> vector<8x2401xf32>
    %15 = arith.maximumf %11, %14 : vector<8x2401xf32>
    %c0_17 = arith.constant 0 : index
    %c0_18 = arith.constant 0 : index
    %16 = vector.load %arg4[%c0_17, %c0_18] : memref<8x1xf32, #tpu.memory_space<vmem>>, vector<8x1xf32>
    %17 = vector.broadcast %16 : vector<8x1xf32> to vector<8x2401xf32>
    %18 = arith.addf %15, %17 : vector<8x2401xf32>
    %cst_19 = arith.constant 0.000000e+00 : f32
    %19 = vector.broadcast %cst_19 : f32 to vector<8x2401xf32>
    %20 = arith.maximumf %18, %19 : vector<8x2401xf32>
    %c0_20 = arith.constant 0 : index
    %c0_21 = arith.constant 0 : index
    %c0_22 = arith.constant 0 : index
    %21 = vector.load %arg5[%c0_20, %c0_21, %c0_22] : memref<1x8x2401xf32, #tpu.memory_space<vmem>>, vector<1x8x2401xf32>
    %22 = vector.shape_cast %21 : vector<1x8x2401xf32> to vector<8x2401xf32>
    %23 = vector.shape_cast %20 : vector<8x2401xf32> to vector<1x8x2401xf32>
    tpu.vector_store %arg5[%c0_20, %c0_21, %c0_22], %23 {strides = array<i32>} : memref<1x8x2401xf32, #tpu.memory_space<vmem>>, vector<1x8x2401xf32>,
    return
  }
  func.func @transform_0(%arg0: i32, %arg1: i32) -> (i32, i32, i32, i32) {
    %c0_i32 = arith.constant 0 : i32
    %c0_i32_0 = arith.constant 0 : i32
    %c0_i32_1 = arith.constant 0 : i32
    %c0_i32_2 = arith.constant 0 : i32
    return %arg0, %c0_i32, %c0_i32_0, %c0_i32_1 : i32, i32, i32, i32
  }
  func.func @transform_1(%arg0: i32, %arg1: i32) -> (i32, i32) {
    %c0_i32 = arith.constant 0 : i32
    %c0_i32_0 = arith.constant 0 : i32
    return %arg1, %c0_i32 : i32, i32
  }
  func.func @transform_2(%arg0: i32, %arg1: i32) -> (i32, i32) {
    %c0_i32 = arith.constant 0 : i32
    %c0_i32_0 = arith.constant 0 : i32
    return %arg1, %c0_i32 : i32, i32
  }
  func.func @transform_3(%arg0: i32, %arg1: i32) -> (i32, i32, i32) {
    %c0_i32 = arith.constant 0 : i32
    %c0_i32_0 = arith.constant 0 : i32
    return %arg0, %arg1, %c0_i32 : i32, i32, i32
  }
}

module attributes {stable_mosaic.version = 11 : i64} {
  func.func @fc_head_kernel(%arg0: i32, %arg1: i32, %arg2: memref<2x9728xf32, #tpu.memory_space<vmem>>, %arg3: memref<1x9728x64xf32, #tpu.memory_space<vmem>>, %arg4: memref<1x1x64xf32, #tpu.memory_space<vmem>>, %arg5: memref<1x64x10xf32, #tpu.memory_space<vmem>>, %arg6: memref<1x10xf32, #tpu.memory_space<vmem>>, %arg7: memref<1x2x10xf32, #tpu.memory_space<vmem>>, %arg8: memref<2x64xf32, #tpu.memory_space<vmem>>) attributes {dimension_semantics = [#tpu.dimension_semantics<parallel>, #tpu.dimension_semantics<arbitrary>], iteration_bounds = array<i64: 2, 8>, scalar_prefetch = 0 : i64, scratch_operands = 1 : i64, tpu.core_type = #tpu.core_type<tc>, window_params = [{transform_indices = @transform_0, window_bounds = array<i64: 2, 9728>}, {transform_indices = @transform_1, window_bounds = array<i64: 1, 9728, 64>}, {transform_indices = @transform_2, window_bounds = array<i64: 1, 1, 64>}, {transform_indices = @transform_3, window_bounds = array<i64: 1, 64, 10>}, {pipeline_mode = #tpu.pipeline_mode<synchronous>, transform_indices = @transform_4, window_bounds = array<i64: 1, 10>}, {transform_indices = @transform_5, window_bounds = array<i64: 1, 2, 10>}]} {
    %c0_i32 = arith.constant 0 : i32
    %0 = arith.cmpi eq, %arg1, %c0_i32 : i32
    %1 = arith.extui %0 : i1 to i32
    %c0_i32_0 = arith.constant 0 : i32
    %2 = arith.cmpi ne, %1, %c0_i32_0 : i32
    scf.if %2 {
      %cst_10 = arith.constant 0.000000e+00 : f32
      %13 = vector.broadcast %cst_10 : f32 to vector<2x64xf32>
      %c0_11 = arith.constant 0 : index
      %c0_12 = arith.constant 0 : index
      %14 = vector.load %arg8[%c0_11, %c0_12] : memref<2x64xf32, #tpu.memory_space<vmem>>, vector<2x64xf32>
      tpu.vector_store %arg8[%c0_11, %c0_12], %13 {strides = array<i32>} : memref<2x64xf32, #tpu.memory_space<vmem>>, vector<2x64xf32>,
    } else {
    }
    %c0 = arith.constant 0 : index
    %c0_1 = arith.constant 0 : index
    %3 = vector.load %arg8[%c0, %c0_1] : memref<2x64xf32, #tpu.memory_space<vmem>>, vector<2x64xf32>
    %c0_2 = arith.constant 0 : index
    %c0_3 = arith.constant 0 : index
    %4 = vector.load %arg2[%c0_2, %c0_3] : memref<2x9728xf32, #tpu.memory_space<vmem>>, vector<2x9728xf32>
    %c0_4 = arith.constant 0 : index
    %c0_5 = arith.constant 0 : index
    %c0_6 = arith.constant 0 : index
    %5 = vector.load %arg3[%c0_4, %c0_5, %c0_6] : memref<1x9728x64xf32, #tpu.memory_space<vmem>>, vector<1x9728x64xf32>
    %6 = vector.shape_cast %5 : vector<1x9728x64xf32> to vector<9728x64xf32>
    %cst = arith.constant dense<0.000000e+00> : vector<2x64xf32>
    %7 = tpu.matmul %4, %6, %cst {dimension_numbers = #tpu.dot_dimension_numbers<[1], [0], [0], [1], [0, 0, 1, 1], [], []>} : vector<2x9728xf32>, vector<9728x64xf32>, vector<2x64xf32> -> vector<2x64xf32>
    %8 = arith.addf %3, %7 : vector<2x64xf32>
    %c0_7 = arith.constant 0 : index
    %c0_8 = arith.constant 0 : index
    %9 = vector.load %arg8[%c0_7, %c0_8] : memref<2x64xf32, #tpu.memory_space<vmem>>, vector<2x64xf32>
    tpu.vector_store %arg8[%c0_7, %c0_8], %8 {strides = array<i32>} : memref<2x64xf32, #tpu.memory_space<vmem>>, vector<2x64xf32>,
    %c7_i32 = arith.constant 7 : i32
    %10 = arith.cmpi eq, %arg1, %c7_i32 : i32
    %11 = arith.extui %10 : i1 to i32
    %c0_i32_9 = arith.constant 0 : i32
    %12 = arith.cmpi ne, %11, %c0_i32_9 : i32
    scf.if %12 {
      %c0_10 = arith.constant 0 : index
      %c0_11 = arith.constant 0 : index
      %13 = vector.load %arg8[%c0_10, %c0_11] : memref<2x64xf32, #tpu.memory_space<vmem>>, vector<2x64xf32>
      %c0_12 = arith.constant 0 : index
      %c0_13 = arith.constant 0 : index
      %c0_14 = arith.constant 0 : index
      %14 = vector.load %arg4[%c0_12, %c0_13, %c0_14] : memref<1x1x64xf32, #tpu.memory_space<vmem>>, vector<1x1x64xf32>
      %15 = vector.shape_cast %14 : vector<1x1x64xf32> to vector<1x64xf32>
      %16 = vector.broadcast %15 : vector<1x64xf32> to vector<2x64xf32>
      %17 = arith.addf %13, %16 : vector<2x64xf32>
      %cst_15 = arith.constant 0.000000e+00 : f32
      %18 = vector.broadcast %cst_15 : f32 to vector<2x64xf32>
      %19 = arith.maximumf %17, %18 : vector<2x64xf32>
      %c0_16 = arith.constant 0 : index
      %c0_17 = arith.constant 0 : index
      %c0_18 = arith.constant 0 : index
      %20 = vector.load %arg5[%c0_16, %c0_17, %c0_18] : memref<1x64x10xf32, #tpu.memory_space<vmem>>, vector<1x64x10xf32>
      %21 = vector.shape_cast %20 : vector<1x64x10xf32> to vector<64x10xf32>
      %cst_19 = arith.constant dense<0.000000e+00> : vector<2x10xf32>
      %22 = tpu.matmul %19, %21, %cst_19 {dimension_numbers = #tpu.dot_dimension_numbers<[1], [0], [0], [1], [0, 0, 1, 1], [], []>} : vector<2x64xf32>, vector<64x10xf32>, vector<2x10xf32> -> vector<2x10xf32>
      %c0_i32_20 = arith.constant 0 : i32
      %23 = arith.cmpi eq, %arg0, %c0_i32_20 : i32
      %24 = arith.extui %23 : i1 to i32
      %25 = arith.sitofp %24 : i32 to f32
      %c0_21 = arith.constant 0 : index
      %c0_22 = arith.constant 0 : index
      %26 = vector.load %arg6[%c0_21, %c0_22] : memref<1x10xf32, #tpu.memory_space<vmem>>, vector<1x10xf32>
      %27 = vector.broadcast %25 : f32 to vector<1x10xf32>
      %28 = arith.mulf %27, %26 : vector<1x10xf32>
      %29 = vector.broadcast %28 : vector<1x10xf32> to vector<2x10xf32>
      %30 = arith.addf %22, %29 : vector<2x10xf32>
      %c0_23 = arith.constant 0 : index
      %c0_24 = arith.constant 0 : index
      %c0_25 = arith.constant 0 : index
      %31 = vector.load %arg7[%c0_23, %c0_24, %c0_25] : memref<1x2x10xf32, #tpu.memory_space<vmem>>, vector<1x2x10xf32>
      %32 = vector.shape_cast %31 : vector<1x2x10xf32> to vector<2x10xf32>
      %33 = vector.shape_cast %30 : vector<2x10xf32> to vector<1x2x10xf32>
      tpu.vector_store %arg7[%c0_23, %c0_24, %c0_25], %33 {strides = array<i32>} : memref<1x2x10xf32, #tpu.memory_space<vmem>>, vector<1x2x10xf32>,
    } else {
    }
    return
  }
  func.func @transform_0(%arg0: i32, %arg1: i32) -> (i32, i32) {
    %c0_i32 = arith.constant 0 : i32
    %c0_i32_0 = arith.constant 0 : i32
    return %c0_i32, %arg1 : i32, i32
  }
  func.func @transform_1(%arg0: i32, %arg1: i32) -> (i32, i32, i32) {
    %c0_i32 = arith.constant 0 : i32
    %c0_i32_0 = arith.constant 0 : i32
    return %arg0, %arg1, %c0_i32 : i32, i32, i32
  }
  func.func @transform_2(%arg0: i32, %arg1: i32) -> (i32, i32, i32) {
    %c0_i32 = arith.constant 0 : i32
    %c0_i32_0 = arith.constant 0 : i32
    %c0_i32_1 = arith.constant 0 : i32
    return %arg0, %c0_i32, %c0_i32_0 : i32, i32, i32
  }
  func.func @transform_3(%arg0: i32, %arg1: i32) -> (i32, i32, i32) {
    %c0_i32 = arith.constant 0 : i32
    %c0_i32_0 = arith.constant 0 : i32
    %c0_i32_1 = arith.constant 0 : i32
    return %arg0, %c0_i32, %c0_i32_0 : i32, i32, i32
  }
  func.func @transform_4(%arg0: i32, %arg1: i32) -> (i32, i32) {
    %c0_i32 = arith.constant 0 : i32
    %c0_i32_0 = arith.constant 0 : i32
    %c0_i32_1 = arith.constant 0 : i32
    return %c0_i32, %c0_i32_0 : i32, i32
  }
  func.func @transform_5(%arg0: i32, %arg1: i32) -> (i32, i32, i32) {
    %c0_i32 = arith.constant 0 : i32
    %c0_i32_0 = arith.constant 0 : i32
    %c0_i32_1 = arith.constant 0 : i32
    return %arg0, %c0_i32, %c0_i32_0 : i32, i32, i32
  }
}

</mosaic_0001>

<bundles_post_ra>
// kernel: simple_cnn_forward.2
= control target key start
LH: loop header
LB: loop body
LE: loop exit
PB: predicated region body
PF: predicated region fallthrough
CT: control target
= control target key end

     0   :  { %s4310_s12 = smov 0   ;;  %s4312_s13 = smov 0   ;;  %s4948_s0 = inlined_call_operand.vmem [shape: f32[2,4,9,2401], index: 0, kind: input, shape index: {}]   ;;  %s4949_s1 = inlined_call_operand.vmem [shape: f32[32,9], index: 1, kind: input, shape index: {}]   ;;  %s4950_s2 = inlined_call_operand.vmem [shape: f32[32,1], index: 2, kind: input, shape index: {}]   ;;  %s4951_s3 = inlined_call_operand.vmem [shape: f32[2,32,2401], index: 3, kind: output, shape index: {}]  }
   0x1   :  { %s4314_s14 = smov 0   ;;  %s4316_s15 = smov 0  }
   0x2   :  { %s4318_s16 = smov 0  }
   0x3 LB: > { %s22_s17 = sadd.s32 1, %s4275_s14  ;;  %s25_s18 = sadd.s32 1, %s4279_s15  ;;  %s4283_s16 = sphi %s4318_s16, %s13_s16   ;;  %s4279_s15 = sphi %s4316_s15, %s4957_s15   ;;  %s4275_s14 = sphi %s4314_s14, %s4956_s14   ;;  %s4271_s13 = sphi %s4312_s13, %s4955_s13   ;;  %s4267_s12 = sphi %s4310_s12, %s4954_s12  }
   0x4   : > { %p23_p0 = scmp.ge.s32.totalorder %s22_s17, 4  ;;  %p3687_p1 = scmp.ge.s32.totalorder %s4283_s16, 1 }
   0x5   : > { %p169_p2 = scmp.lt.s32.totalorder %s4283_s16, 9 }
   0x6   : > { %s4959_s17 = smov (%p23_p0, %s22_s17), 0  ;;  %s4961_s18 = smov (!%p23_p0, %s25_s18), %s4279_s15 }
   0x7   : > { %p170_p3 = pnand %p3687_p1, %p169_p2  ;;  %p27_p4 = scmp.ge.s32.totalorder %s4961_s18, 2 }
   0x8   : > { %p205_p5 = scmp.lt.s32.totalorder (!%p170_p3), %s4271_s13, 1  ;;  %p210_p6 = scmp.lt.s32.totalorder (!%p170_p3), %s4267_s12, 3  ;;  %v4285_v0 = vmov (!%p170_p3), 0.0   ;;  %v4286_v1 = vmov (!%p170_p3), 0   ;;  %vm270_vm0 = vcmask (!%p170_p3), 1040384   ;;  %vm4287_vm1 = vmmov (!%p170_p3), 1  }
   0x9   : > { %s4963_s18 = smov (%p27_p4, %s4961_s18), 0  ;;  %173 = sbr.rel (%p170_p3) target bundleno = 323 (0x143), region = 32 }
   0xa   : > { %392 = vmatprep.mubr.f32.mxu0 (!%p170_p3), %v4285_v0  ;;  %463 = vmatprep.mubr.f32.mxu1 (!%p170_p3), %v4285_v0  ;;  %vm4353_vm2 = vmpackc.low (!%p170_p3), %vm270_vm0, %vm4287_vm1  ;;  %vm266_vm3 = vcmask (!%p170_p3), 72704   ;;  %vm4289_vm4 = vmmov (!%p170_p3), 0   ;;  %vm3571_vm5 = vcmask (!%p170_p3), 793600  }
   0xb   : > { %4244 = vset.pattern.permute.xlu0 (!%p170_p3), %v4286_v1 }
  0x10   : > { %s4965_s13 = smov (!%p205_p5, %s4271_s13), 1  ;;  %s4967_s12 = smov (!%p210_p6, %s4267_s12), 3 }
  0x11   : > { %s4196_s19 = smul.u32 1216, %s4965_s13  ;;  %s3689_s20 = sshll.u32 %s4967_s12, 3 }
  0x12   : > { %s213_s26 = scalar_lea.vmem %s4949_s1, %s3689_s20  ;;  %s217_s29 = scalar_lea.vmem %s4950_s2, %s3689_s20 }
  0x13   : > { %s4351_s23 = scalar_lea.vmem %s4948_s0, %s4196_s19  ;;  %v4370_v14 = vld [vmem:[%s213_s26] sm:$0xff]  ;;  %s4197_s30 = smul.u32 19, %s4967_s12 }
  0x14   : > { %v229_v3 = vld [vmem:[%s4351_s23 + $0x8] sm:$0xff]  ;;  %v248_v4 = vld [vmem:[%s4351_s23 + $0xa0] sm:$0x1]  ;;  %v231_v5 = vld [vmem:[%s4351_s23 + $0x18] sm:$0xff]  ;;  %s4198_s4 = smul.u32 76, %s4965_s13 }
  0x15   : > { %v3964_v6 = vpack.c.bf16 %v248_v4, %v229_v3  ;;  %v250_v7 = vld [vmem:[%s4351_s23 + $0xb0] sm:$0x1]  ;;  %v228_v8 = vld [vmem:[%s4351_s23] sm:$0xff]  ;;  %v247_v9 = vld [vmem:[%s4351_s23 + $0x98] sm:$0x1] }
  0x16   : > { %v3970_v10 = vpack.c.bf16 %v250_v7, %v231_v5  ;;  %v3967_v11 = vpack.c.bf16 %v247_v9, %v228_v8  ;;  %v230_v12 = vld [vmem:[%s4351_s23 + $0x10] sm:$0xff]  ;;  %v249_v13 = vld [vmem:[%s4351_s23 + $0xa8] sm:$0x1]  ;;  %v252_v17 = vld [vmem:[%s4351_s23 + $0xc0] sm:$0x1]  ;;  %v4288_v8 = vmov 0.0|0.0   ;;  %s224_s5 = sadd.s32 %s4198_s4, %s4197_s30 }
  0x17   : > { %3966 = vmatprep.subr.msk.bf16.mxu0 %vm4353_vm2, %v3964_v6  ;;  %v3973_v15 = vpack.c.bf16 %v249_v13, %v230_v12  ;;  %v233_v16 = vld [vmem:[%s4351_s23 + $0x28] sm:$0xff]  ;;  %v235_v18 = vld [vmem:[%s4351_s23 + $0x38] sm:$0xff]  ;;  %v254_v20 = vld [vmem:[%s4351_s23 + $0xd0] sm:$0x1]  ;;  %s3691_s6 = sshll.u32 %s224_s5, 3 }
  0x18   : > { %3972 = vmatprep.subr.msk.bf16.mxu1 %vm4353_vm2, %v3970_v10  ;;  %3969 = vmatpush1.bf16.msk.msra.mxu0 %vm4353_vm2, %v3967_v11  ;;  %v3976_v19 = vpack.c.bf16 %v252_v17, %v233_v16  ;;  %v232_v21 = vld [vmem:[%s4351_s23 + $0x20] sm:$0xff]  ;;  %v251_v22 = vld [vmem:[%s4351_s23 + $0xb8] sm:$0x1]  ;;  %v3982_v23 = vpack.c.bf16 %v254_v20, %v235_v18  ;;  %v234_v25 = vld [vmem:[%s4351_s23 + $0x30] sm:$0xff]  ;;  %s4882_s9 = scalar_lea.vmem %s4951_s3, %s3691_s6 }
  0x19   : > { %3975 = vmatpush1.bf16.msk.msra.mxu1 %vm4353_vm2, %v3973_v15  ;;  %v3979_v24 = vpack.c.bf16 %v251_v22, %v232_v21  ;;  %v253_v26 = vld [vmem:[%s4351_s23 + $0xc8] sm:$0x1]  ;;  %v256_v29 = vld [vmem:[%s4351_s23 + $0xe0] sm:$0x1]  ;;  %v239_v30 = vld [vmem:[%s4351_s23 + $0x58] sm:$0xff] }
  0x1a   : > { %v237_v27 = vld [vmem:[%s4351_s23 + $0x48] sm:$0xff]  ;;  %3978 = vmatprep.subr.msk.bf16.mxu0 %vm4353_vm2, %v3976_v19  ;;  %v3985_v28 = vpack.c.bf16 %v253_v26, %v234_v25  ;;  %v258_v31 = vld [vmem:[%s4351_s23 + $0xf0] sm:$0x1]  ;;  %3984 = vmatprep.subr.msk.bf16.mxu1 %vm4353_vm2, %v3982_v23  ;;  %v236_v34 = vld [vmem:[%s4351_s23 + $0x40] sm:$0xff] }
  0x1b   : > { %3694 = vmatmul.mubr.msk.f32.vlgmr.msra.gmra.mrb[0].mxu0 %vm266_vm3, %v4370_v14  ;;  %v3988_v32 = vpack.c.bf16 %v256_v29, %v237_v27  ;;  %v3994_v33 = vpack.c.bf16 %v258_v31, %v239_v30  ;;  %v255_v35 = vld [vmem:[%s4351_s23 + $0xd8] sm:$0x1]  ;;  %v238_v36 = vld [vmem:[%s4351_s23 + $0x50] sm:$0xff]  ;;  %v257_v38 = vld [vmem:[%s4351_s23 + $0xe8] sm:$0x1] }
  0x1c   : > { %3697 = vmatmul.mubr.msk.f32.vlgmr.msra.gmra.mrb[0].mxu1 %vm266_vm3, %v4370_v14  ;;  %3981 = vmatpush1.bf16.msk.msra.mxu0 %vm4353_vm2, %v3979_v24  ;;  %v3991_v37 = vpack.c.bf16 %v255_v35, %v236_v34  ;;  %v241_v39 = vld [vmem:[%s4351_s23 + $0x68] sm:$0xff]  ;;  %v260_v40 = vld [vmem:[%s4351_s23 + $0x100] sm:$0x1]  ;;  %v3997_v41 = vpack.c.bf16 %v257_v38, %v238_v36  ;;  %v243_v42 = vld [vmem:[%s4351_s23 + $0x78] sm:$0xff] }
  0x1d   : > { %3987 = vmatpush1.bf16.msk.msra.mxu1 %vm4353_vm2, %v3985_v28  ;;  %534 = vmatprep.mubr.f32.mxu0 %v4285_v0  ;;  %v262_v43 = vld [vmem:[%s4351_s23 + $0x110] sm:$0x1]  ;;  %v240_v44 = vld [vmem:[%s4351_s23 + $0x60] sm:$0xff]  ;;  %v4000_v45 = vpack.c.bf16 %v260_v40, %v241_v39  ;;  %v259_v46 = vld [vmem:[%s4351_s23 + $0xf8] sm:$0x1] }
  0x1e   : > { %605 = vmatprep.mubr.f32.mxu1 %v4285_v0  ;;  %3990 = vmatprep.subr.msk.bf16.mxu0 %vm4353_vm2, %v3988_v32  ;;  %v242_v47 = vld [vmem:[%s4351_s23 + $0x70] sm:$0xff]  ;;  %v261_v48 = vld [vmem:[%s4351_s23 + $0x108] sm:$0x1]  ;;  %v4006_v49 = vpack.c.bf16 %v262_v43, %v243_v42  ;;  %v264_v51 = vld [vmem:[%s4351_s23 + $0x120] sm:$0x1]  ;;  %v4003_v52 = vpack.c.bf16 %v259_v46, %v240_v44 }
  0x1f   : > { %3700 = vmatmul.mubr.msk.f32.vlgmr.msra.gmra.mrb[2].mxu0 %vm266_vm3, %v4370_v14  ;;  %3996 = vmatprep.subr.msk.bf16.mxu1 %vm4353_vm2, %v3994_v33  ;;  %v245_v50 = vld [vmem:[%s4351_s23 + $0x88] sm:$0xff]  ;;  %v4009_v53 = vpack.c.bf16 %v261_v48, %v242_v47  ;;  %v244_v54 = vld [vmem:[%s4351_s23 + $0x80] sm:$0xff]  ;;  %v263_v55 = vld [vmem:[%s4351_s23 + $0x118] sm:$0x1] }
  0x20   : > { %3703 = vmatmul.mubr.msk.f32.vlgmr.msra.gmra.mrb[2].mxu1 %vm266_vm3, %v4370_v14  ;;  %3993 = vmatpush1.bf16.msk.msra.mxu0 %vm4353_vm2, %v3991_v37  ;;  %v4012_v56 = vpack.c.bf16 %v264_v51, %v245_v50  ;;  %v246_v57 = vld [vmem:[%s4351_s23 + $0x90] sm:$0xff]  ;;  %v265_v58 = vld [vmem:[%s4351_s23 + $0x128] sm:$0x1]  ;;  %v3722_v59 = vld [vmem:[%s4351_s23 + $0x138] sm:$0xff]  ;;  %v4015_v61 = vpack.c.bf16 %v263_v55, %v244_v54 }
  0x21   : > { %3999 = vmatpush1.bf16.msk.msra.mxu1 %vm4353_vm2, %v3997_v41  ;;  %676 = vmatprep.mubr.f32.mxu0 %v4285_v0  ;;  %v3741_v60 = vld [vmem:[%s4351_s23 + $0x1d0] sm:$0x1]  ;;  %v3724_v62 = vld [vmem:[%s4351_s23 + $0x148] sm:$0xff]  ;;  %v3743_v63 = vld [vmem:[%s4351_s23 + $0x1e0] sm:$0x1]  ;;  %v4019_v1 = vpack.c.bf16 %v265_v58, %v246_v57 }
  0x22   : > { %747 = vmatprep.mubr.f32.mxu1 %v4285_v0  ;;  %4002 = vmatprep.subr.msk.bf16.mxu0 %vm4353_vm2, %v4000_v45  ;;  %v3721_v3 = vld [vmem:[%s4351_s23 + $0x130] sm:$0xff]  ;;  %v3740_v4 = vld [vmem:[%s4351_s23 + $0x1c8] sm:$0x1]  ;;  %v4022_v5 = vpack.c.bf16 %v3741_v60, %v3722_v59  ;;  %v3723_v6 = vld [vmem:[%s4351_s23 + $0x140] sm:$0xff]  ;;  %v4028_v9 = vpack.c.bf16 %v3743_v63, %v3724_v62 }
  0x23   : > { %3706 = vmatmul.mubr.msk.f32.vlgmr.msra.gmra.mrb[4].mxu0 %vm266_vm3, %v4370_v14  ;;  %4008 = vmatprep.subr.msk.bf16.mxu1 %vm4353_vm2, %v4006_v49  ;;  %v3742_v7 = vld [vmem:[%s4351_s23 + $0x1d8] sm:$0x1]  ;;  %v3745_v11 = vld [vmem:[%s4351_s23 + $0x1f0] sm:$0x1]  ;;  %v4025_v12 = vpack.c.bf16 %v3740_v4, %v3721_v3  ;;  %v3728_v13 = vld [vmem:[%s4351_s23 + $0x168] sm:$0xff] }
  0x24   : > { %3709 = vmatmul.mubr.msk.f32.vlgmr.msra.gmra.mrb[4].mxu1 %vm266_vm3, %v4370_v14  ;;  %4005 = vmatpush1.bf16.msk.msra.mxu0 %vm4353_vm2, %v4003_v52  ;;  %v3726_v10 = vld [vmem:[%s4351_s23 + $0x158] sm:$0xff]  ;;  %v3747_v15 = vld [vmem:[%s4351_s23 + $0x200] sm:$0x1]  ;;  %v4031_v16 = vpack.c.bf16 %v3742_v7, %v3723_v6  ;;  %v3725_v17 = vld [vmem:[%s4351_s23 + $0x150] sm:$0xff] }
  0x25   : > { %4011 = vmatpush1.bf16.msk.msra.mxu1 %vm4353_vm2, %v4009_v53  ;;  %818 = vmatprep.mubr.f32.mxu0 %v4285_v0  ;;  %v3744_v18 = vld [vmem:[%s4351_s23 + $0x1e8] sm:$0x1]  ;;  %v4034_v19 = vpack.c.bf16 %v3745_v11, %v3726_v10  ;;  %v3727_v20 = vld [vmem:[%s4351_s23 + $0x160] sm:$0xff]  ;;  %v3746_v21 = vld [vmem:[%s4351_s23 + $0x1f8] sm:$0x1]  ;;  %v4040_v22 = vpack.c.bf16 %v3747_v15, %v3728_v13 }
  0x26   : > { %889 = vmatprep.mubr.f32.mxu1 %v4285_v0  ;;  %4014 = vmatprep.subr.msk.bf16.mxu0 %vm4353_vm2, %v4012_v56  ;;  %v3730_v23 = vld [vmem:[%s4351_s23 + $0x178] sm:$0xff]  ;;  %v3749_v24 = vld [vmem:[%s4351_s23 + $0x210] sm:$0x1]  ;;  %v4037_v25 = vpack.c.bf16 %v3744_v18, %v3725_v17  ;;  %v3732_v26 = vld [vmem:[%s4351_s23 + $0x188] sm:$0xff]  ;;  %v4043_v28 = vpack.c.bf16 %v3746_v21, %v3727_v20 }
  0x27   : > { %3712 = vmatmul.mubr.msk.f32.vlgmr.msra.gmra.mrb[6].mxu0 %vm266_vm3, %v4370_v14  ;;  %4018 = vmatprep.subr.bf16.mxu1 %v4288_v8  ;;  %v3751_v27 = vld [vmem:[%s4351_s23 + $0x220] sm:$0x1]  ;;  %v3729_v29 = vld [vmem:[%s4351_s23 + $0x170] sm:$0xff]  ;;  %v3748_v30 = vld [vmem:[%s4351_s23 + $0x208] sm:$0x1]  ;;  %v4046_v31 = vpack.c.bf16 %v3749_v24, %v3730_v23 }
  0x28   : > { %3715 = vmatmul.mubr.msk.f32.vlgmr.msra.gmra.mrb[6].mxu1 %vm266_vm3, %v4370_v14  ;;  %4017 = vmatpush1.bf16.msk.msra.mxu0 %vm4353_vm2, %v4015_v61  ;;  %v3731_v32 = vld [vmem:[%s4351_s23 + $0x180] sm:$0xff]  ;;  %v3750_v33 = vld [vmem:[%s4351_s23 + $0x218] sm:$0x1]  ;;  %v4052_v34 = vpack.c.bf16 %v3751_v27, %v3732_v26  ;;  %v3753_v36 = vld [vmem:[%s4351_s23 + $0x230] sm:$0x1]  ;;  %v4049_v37 = vpack.c.bf16 %v3748_v30, %v3729_v29 }
  0x29   : > { %4021 = vmatpush3.bf16.msk.msra.mxu1 %vm4353_vm2, %v4019_v1  ;;  %960 = vmatprep.mubr.f32.mxu0 %v4285_v0  ;;  %v3734_v35 = vld [vmem:[%s4351_s23 + $0x198] sm:$0xff]  ;;  %v3736_v38 = vld [vmem:[%s4351_s23 + $0x1a8] sm:$0xff]  ;;  %v3755_v39 = vld [vmem:[%s4351_s23 + $0x240] sm:$0x1]  ;;  %v4055_v40 = vpack.c.bf16 %v3750_v33, %v3731_v32 }
  0x2a   : > { %3940 = vmatprep.mubr.msk.f32.mxu1 %vm4289_vm4, %v4285_v0  ;;  %4024 = vmatprep.subr.msk.bf16.mxu0 %vm4353_vm2, %v4022_v5  ;;  %v3733_v41 = vld [vmem:[%s4351_s23 + $0x190] sm:$0xff]  ;;  %v3752_v42 = vld [vmem:[%s4351_s23 + $0x228] sm:$0x1]  ;;  %v4058_v43 = vpack.c.bf16 %v3753_v36, %v3734_v35  ;;  %v3735_v44 = vld [vmem:[%s4351_s23 + $0x1a0] sm:$0xff]  ;;  %v4064_v46 = vpack.c.bf16 %v3755_v39, %v3736_v38 }
  0x2b   : > { %3718 = vmatmul.mubr.msk.f32.vlgmr.msra.gmra.mrb[8].mxu0 %vm266_vm3, %v4370_v14  ;;  %4030 = vmatprep.subr.msk.bf16.mxu1 %vm4353_vm2, %v4028_v9  ;;  %v3754_v45 = vld [vmem:[%s4351_s23 + $0x238] sm:$0x1]  ;;  %v3757_v48 = vld [vmem:[%s4351_s23 + $0x250] sm:$0x1]  ;;  %v4061_v49 = vpack.c.bf16 %v3752_v42, %v3733_v41  ;;  %v3756_v52 = vld [vmem:[%s4351_s23 + $0x248] sm:$0x1] }
  0x2c   : > { %3941 = vmatmul.mubr.msk.f32.vlgmr.msra.gmra.mrb[8].mxu1 %vm266_vm3, %v4370_v14  ;;  %4027 = vmatpush1.bf16.msk.msra.mxu0 %vm4353_vm2, %v4025_v12  ;;  %v3738_v47 = vld [vmem:[%s4351_s23 + $0x1b8] sm:$0xff]  ;;  %v4067_v50 = vpack.c.bf16 %v3754_v45, %v3735_v44  ;;  %v3737_v51 = vld [vmem:[%s4351_s23 + $0x1b0] sm:$0xff]  ;;  %v3739_v54 = vld [vmem:[%s4351_s23 + $0x1c0] sm:$0xff] }
  0x2d   : > { %4033 = vmatpush1.bf16.msk.msra.mxu1 %vm4353_vm2, %v4031_v16  ;;  %1197 = vmatprep.mubr.f32.mxu0 %v4285_v0  ;;  %v4070_v53 = vpack.c.bf16 %v3757_v48, %v3738_v47  ;;  %v3758_v55 = vld [vmem:[%s4351_s23 + $0x258] sm:$0x1]  ;;  %v3789_v56 = vld [vmem:[%s4351_s23 + $0x268] sm:$0xff]  ;;  %v3808_v57 = vld [vmem:[%s4351_s23 + $0x300] sm:$0x1]  ;;  %v4073_v58 = vpack.c.bf16 %v3756_v52, %v3737_v51 }
  0x2e   : > { %1268 = vmatprep.mubr.f32.mxu1 %v4285_v0  ;;  %4036 = vmatprep.subr.msk.bf16.mxu0 %vm4353_vm2, %v4034_v19  ;;  %v3791_v59 = vld [vmem:[%s4351_s23 + $0x278] sm:$0xff]  ;;  %v3810_v60 = vld [vmem:[%s4351_s23 + $0x310] sm:$0x1]  ;;  %v4077_v61 = vpack.c.bf16 %v3758_v55, %v3739_v54  ;;  %v3788_v62 = vld [vmem:[%s4351_s23 + $0x260] sm:$0xff]  ;;  %v4080_v1 = vpack.c.bf16 %v3808_v57, %v3789_v56 }
  0x2f   : > { %3761 = vmatmul.mubr.msk.f32.vlgmr.msra.gmra.mrb[10].mxu0 %vm266_vm3, %v4370_v14  ;;  %4042 = vmatprep.subr.msk.bf16.mxu1 %vm4353_vm2, %v4040_v22  ;;  %v3807_v63 = vld [vmem:[%s4351_s23 + $0x2f8] sm:$0x1]  ;;  %v3790_v3 = vld [vmem:[%s4351_s23 + $0x270] sm:$0xff]  ;;  %v3809_v4 = vld [vmem:[%s4351_s23 + $0x308] sm:$0x1]  ;;  %v4086_v5 = vpack.c.bf16 %v3810_v60, %v3791_v59 }
  0x30   : > { %3764 = vmatmul.mubr.msk.f32.vlgmr.msra.gmra.mrb[10].mxu1 %vm266_vm3, %v4370_v14  ;;  %4039 = vmatpush1.bf16.msk.msra.mxu0 %vm4353_vm2, %v4037_v25  ;;  %v3793_v6 = vld [vmem:[%s4351_s23 + $0x288] sm:$0xff]  ;;  %v3812_v7 = vld [vmem:[%s4351_s23 + $0x320] sm:$0x1]  ;;  %v4083_v9 = vpack.c.bf16 %v3807_v63, %v3788_v62  ;;  %v3795_v10 = vld [vmem:[%s4351_s23 + $0x298] sm:$0xff]  ;;  %v4089_v12 = vpack.c.bf16 %v3809_v4, %v3790_v3 }
  0x31   : > { %4045 = vmatpush1.bf16.msk.msra.mxu1 %vm4353_vm2, %v4043_v28  ;;  %1339 = vmatprep.mubr.f32.mxu0 %v4285_v0  ;;  %v3814_v11 = vld [vmem:[%s4351_s23 + $0x330] sm:$0x1]  ;;  %v3792_v13 = vld [vmem:[%s4351_s23 + $0x280] sm:$0xff]  ;;  %v3811_v15 = vld [vmem:[%s4351_s23 + $0x318] sm:$0x1]  ;;  %v4092_v16 = vpack.c.bf16 %v3812_v7, %v3793_v6 }
  0x32   : > { %1410 = vmatprep.mubr.f32.mxu1 %v4285_v0  ;;  %4048 = vmatprep.subr.msk.bf16.mxu0 %vm4353_vm2, %v4046_v31  ;;  %v3794_v17 = vld [vmem:[%s4351_s23 + $0x290] sm:$0xff]  ;;  %v3813_v18 = vld [vmem:[%s4351_s23 + $0x328] sm:$0x1]  ;;  %v4098_v19 = vpack.c.bf16 %v3814_v11, %v3795_v10  ;;  %v3816_v21 = vld [vmem:[%s4351_s23 + $0x340] sm:$0x1]  ;;  %v4095_v22 = vpack.c.bf16 %v3811_v15, %v3792_v13 }
  0x33   : > { %3767 = vmatmul.mubr.msk.f32.vlgmr.msra.gmra.mrb[12].mxu0 %vm266_vm3, %v4370_v14  ;;  %4054 = vmatprep.subr.msk.bf16.mxu1 %vm4353_vm2, %v4052_v34  ;;  %v3797_v20 = vld [vmem:[%s4351_s23 + $0x2a8] sm:$0xff]  ;;  %v3799_v23 = vld [vmem:[%s4351_s23 + $0x2b8] sm:$0xff]  ;;  %v3818_v24 = vld [vmem:[%s4351_s23 + $0x350] sm:$0x1]  ;;  %v4101_v25 = vpack.c.bf16 %v3813_v18, %v3794_v17 }
  0x34   : > { %3770 = vmatmul.mubr.msk.f32.vlgmr.msra.gmra.mrb[12].mxu1 %vm266_vm3, %v4370_v14  ;;  %4051 = vmatpush1.bf16.msk.msra.mxu0 %vm4353_vm2, %v4049_v37  ;;  %v3796_v26 = vld [vmem:[%s4351_s23 + $0x2a0] sm:$0xff]  ;;  %v3815_v27 = vld [vmem:[%s4351_s23 + $0x338] sm:$0x1]  ;;  %v4104_v28 = vpack.c.bf16 %v3816_v21, %v3797_v20  ;;  %v3798_v29 = vld [vmem:[%s4351_s23 + $0x2b0] sm:$0xff]  ;;  %v4110_v31 = vpack.c.bf16 %v3818_v24, %v3799_v23 }
  0x35   : > { %4057 = vmatpush1.bf16.msk.msra.mxu1 %vm4353_vm2, %v4055_v40  ;;  %1481 = vmatprep.mubr.f32.mxu0 %v4285_v0  ;;  %v3817_v30 = vld [vmem:[%s4351_s23 + $0x348] sm:$0x1]  ;;  %v3820_v33 = vld [vmem:[%s4351_s23 + $0x360] sm:$0x1]  ;;  %v4107_v34 = vpack.c.bf16 %v3815_v27, %v3796_v26  ;;  %v3803_v35 = vld [vmem:[%s4351_s23 + $0x2d8] sm:$0xff] }
  0x36   : > { %1552 = vmatprep.mubr.f32.mxu1 %v4285_v0  ;;  %4060 = vmatprep.subr.msk.bf16.mxu0 %vm4353_vm2, %v4058_v43  ;;  %v3801_v32 = vld [vmem:[%s4351_s23 + $0x2c8] sm:$0xff]  ;;  %v3822_v36 = vld [vmem:[%s4351_s23 + $0x370] sm:$0x1]  ;;  %v4113_v37 = vpack.c.bf16 %v3817_v30, %v3798_v29  ;;  %v3800_v38 = vld [vmem:[%s4351_s23 + $0x2c0] sm:$0xff] }
  0x37   : > { %3773 = vmatmul.mubr.msk.f32.vlgmr.msra.gmra.mrb[14].mxu0 %vm266_vm3, %v4370_v14  ;;  %4066 = vmatprep.subr.msk.bf16.mxu1 %vm4353_vm2, %v4064_v46  ;;  %v3819_v39 = vld [vmem:[%s4351_s23 + $0x358] sm:$0x1]  ;;  %v4116_v40 = vpack.c.bf16 %v3820_v33, %v3801_v32  ;;  %v3802_v41 = vld [vmem:[%s4351_s23 + $0x2d0] sm:$0xff]  ;;  %v3821_v42 = vld [vmem:[%s4351_s23 + $0x368] sm:$0x1]  ;;  %v4122_v43 = vpack.c.bf16 %v3822_v36, %v3803_v35 }
  0x38   : > { %3776 = vmatmul.mubr.msk.f32.vlgmr.msra.gmra.mrb[14].mxu1 %vm266_vm3, %v4370_v14  ;;  %4063 = vmatpush1.bf16.msk.msra.mxu0 %vm4353_vm2, %v4061_v49  ;;  %v3805_v44 = vld [vmem:[%s4351_s23 + $0x2e8] sm:$0xff]  ;;  %v3824_v45 = vld [vmem:[%s4351_s23 + $0x380] sm:$0x1]  ;;  %v4119_v46 = vpack.c.bf16 %v3819_v39, %v3800_v38  ;;  %v4125_v47 = vpack.c.bf16 %v3821_v42, %v3802_v41  ;;  %v3823_v49 = vld [vmem:[%s4351_s23 + $0x378] sm:$0x1] }
  0x39   : > { %4069 = vmatpush1.bf16.msk.msra.mxu1 %vm4353_vm2, %v4067_v50  ;;  %1623 = vmatprep.mubr.f32.mxu0 %v4285_v0  ;;  %v3804_v48 = vld [vmem:[%s4351_s23 + $0x2e0] sm:$0xff]  ;;  %v4128_v50 = vpack.c.bf16 %v3824_v45, %v3805_v44  ;;  %v3806_v51 = vld [vmem:[%s4351_s23 + $0x2f0] sm:$0xff]  ;;  %v3825_v52 = vld [vmem:[%s4351_s23 + $0x388] sm:$0x1] }
  0x3a   : > { %1694 = vmatprep.mubr.f32.mxu1 %v4285_v0  ;;  %4072 = vmatprep.subr.msk.bf16.mxu0 %vm4353_vm2, %v4070_v53  ;;  %v3856_v53 = vld [vmem:[%s4351_s23 + $0x398] sm:$0xff]  ;;  %v3875_v54 = vld [vmem:[%s4351_s23 + $0x430] sm:$0x1]  ;;  %v4131_v55 = vpack.c.bf16 %v3823_v49, %v3804_v48  ;;  %v3858_v56 = vld [vmem:[%s4351_s23 + $0x3a8] sm:$0xff] }
  0x3b   : > { %3779 = vmatmul.mubr.msk.f32.vlgmr.msra.gmra.mrb[16].mxu0 %vm266_vm3, %v4370_v14  ;;  %4076 = vmatprep.subr.bf16.mxu1 %v4288_v8  ;;  %v3877_v57 = vld [vmem:[%s4351_s23 + $0x440] sm:$0x1]  ;;  %v3855_v59 = vld [vmem:[%s4351_s23 + $0x390] sm:$0xff]  ;;  %v3874_v60 = vld [vmem:[%s4351_s23 + $0x428] sm:$0x1] }
  0x3c   : > { %3782 = vmatmul.mubr.msk.f32.vlgmr.msra.gmra.mrb[16].mxu1 %vm266_vm3, %v4370_v14  ;;  %4075 = vmatpush1.bf16.msk.msra.mxu0 %vm4353_vm2, %v4073_v58  ;;  %v4135_v58 = vpack.c.bf16 %v3825_v52, %v3806_v51  ;;  %v3857_v62 = vld [vmem:[%s4351_s23 + $0x3a0] sm:$0xff]  ;;  %v3876_v63 = vld [vmem:[%s4351_s23 + $0x438] sm:$0x1]  ;;  %v3879_v4 = vld [vmem:[%s4351_s23 + $0x450] sm:$0x1] }
  0x3d   : > { %4079 = vmatpush3.bf16.msk.msra.mxu1 %vm4353_vm2, %v4077_v61  ;;  %1765 = vmatprep.mubr.f32.mxu0 %v4285_v0  ;;  %v4138_v61 = vpack.c.bf16 %v3875_v54, %v3856_v53  ;;  %v3860_v3 = vld [vmem:[%s4351_s23 + $0x3b8] sm:$0xff]  ;;  %v3862_v6 = vld [vmem:[%s4351_s23 + $0x3c8] sm:$0xff]  ;;  %v3881_v7 = vld [vmem:[%s4351_s23 + $0x460] sm:$0x1] }
  0x3e   : > { %3947 = vmatprep.mubr.msk.f32.mxu1 %vm4289_vm4, %v4285_v0  ;;  %4082 = vmatprep.subr.msk.bf16.mxu0 %vm4353_vm2, %v4080_v1  ;;  %v4144_v1 = vpack.c.bf16 %v3877_v57, %v3858_v56  ;;  %v3859_v10 = vld [vmem:[%s4351_s23 + $0x3b0] sm:$0xff]  ;;  %v3878_v11 = vld [vmem:[%s4351_s23 + $0x448] sm:$0x1]  ;;  %v3861_v13 = vld [vmem:[%s4351_s23 + $0x3c0] sm:$0xff] }
  0x3f   : > { %3785 = vmatmul.mubr.msk.f32.vlgmr.msra.gmra.mrb[18].mxu0 %vm266_vm3, %v4370_v14  ;;  %4088 = vmatprep.subr.msk.bf16.mxu1 %vm4353_vm2, %v4086_v5  ;;  %v4141_v5 = vpack.c.bf16 %v3874_v60, %v3855_v59  ;;  %v3880_v15 = vld [vmem:[%s4351_s23 + $0x458] sm:$0x1]  ;;  %v3883_v18 = vld [vmem:[%s4351_s23 + $0x470] sm:$0x1]  ;;  %v3866_v20 = vld [vmem:[%s4351_s23 + $0x3e8] sm:$0xff] }
  0x40   : > { %3948 = vmatmul.mubr.msk.f32.vlgmr.msra.gmra.mrb[18].mxu1 %vm266_vm3, %v4370_v14  ;;  %4085 = vmatpush1.bf16.msk.msra.mxu0 %vm4353_vm2, %v4083_v9  ;;  %v4147_v9 = vpack.c.bf16 %v3876_v63, %v3857_v62  ;;  %v3864_v17 = vld [vmem:[%s4351_s23 + $0x3d8] sm:$0xff]  ;;  %v3885_v21 = vld [vmem:[%s4351_s23 + $0x480] sm:$0x1]  ;;  %v3863_v23 = vld [vmem:[%s4351_s23 + $0x3d0] sm:$0xff] }
  0x41   : > { %4091 = vmatpush1.bf16.msk.msra.mxu1 %vm4353_vm2, %v4089_v12  ;;  %2021 = vmatprep.mubr.f32.mxu0 %v4285_v0  ;;  %v4150_v12 = vpack.c.bf16 %v3879_v4, %v3860_v3  ;;  %v3882_v24 = vld [vmem:[%s4351_s23 + $0x468] sm:$0x1]  ;;  %v3865_v26 = vld [vmem:[%s4351_s23 + $0x3e0] sm:$0xff]  ;;  %v3884_v27 = vld [vmem:[%s4351_s23 + $0x478] sm:$0x1] }
  0x42   : > { %2092 = vmatprep.mubr.f32.mxu1 %v4285_v0  ;;  %4094 = vmatprep.subr.msk.bf16.mxu0 %vm4353_vm2, %v4092_v16  ;;  %v4156_v16 = vpack.c.bf16 %v3881_v7, %v3862_v6  ;;  %v3868_v29 = vld [vmem:[%s4351_s23 + $0x3f8] sm:$0xff]  ;;  %v3887_v30 = vld [vmem:[%s4351_s23 + $0x490] sm:$0x1]  ;;  %v3870_v32 = vld [vmem:[%s4351_s23 + $0x408] sm:$0xff] }
  0x43   : > { %3828 = vmatmul.mubr.msk.f32.vlgmr.msra.gmra.mrb[20].mxu0 %vm266_vm3, %v4370_v14  ;;  %4100 = vmatprep.subr.msk.bf16.mxu1 %vm4353_vm2, %v4098_v19  ;;  %v4153_v19 = vpack.c.bf16 %v3878_v11, %v3859_v10  ;;  %v3889_v33 = vld [vmem:[%s4351_s23 + $0x4a0] sm:$0x1]  ;;  %v3867_v35 = vld [vmem:[%s4351_s23 + $0x3f0] sm:$0xff]  ;;  %v3886_v36 = vld [vmem:[%s4351_s23 + $0x488] sm:$0x1] }
  0x44   : > { %3831 = vmatmul.mubr.msk.f32.vlgmr.msra.gmra.mrb[20].mxu1 %vm266_vm3, %v4370_v14  ;;  %4097 = vmatpush1.bf16.msk.msra.mxu0 %vm4353_vm2, %v4095_v22  ;;  %v4159_v22 = vpack.c.bf16 %v3880_v15, %v3861_v13  ;;  %v3869_v38 = vld [vmem:[%s4351_s23 + $0x400] sm:$0xff]  ;;  %v3888_v39 = vld [vmem:[%s4351_s23 + $0x498] sm:$0x1]  ;;  %v3891_v42 = vld [vmem:[%s4351_s23 + $0x4b0] sm:$0x1] }
  0x45   : > { %4103 = vmatpush1.bf16.msk.msra.mxu1 %vm4353_vm2, %v4101_v25  ;;  %2163 = vmatprep.mubr.f32.mxu0 %v4285_v0  ;;  %v4162_v25 = vpack.c.bf16 %v3883_v18, %v3864_v17  ;;  %v3872_v41 = vld [vmem:[%s4351_s23 + $0x418] sm:$0xff]  ;;  %v4183_v44 = vpack.c.bf16 %v3888_v39, %v3869_v38  ;;  %v3871_v45 = vld [vmem:[%s4351_s23 + $0x410] sm:$0xff]  ;;  %v3873_v48 = vld [vmem:[%s4351_s23 + $0x420] sm:$0xff] }
  0x46   : > { %2234 = vmatprep.mubr.f32.mxu1 %v4285_v0  ;;  %4106 = vmatprep.subr.msk.bf16.mxu0 %vm4353_vm2, %v4104_v28  ;;  %v4168_v28 = vpack.c.bf16 %v3885_v21, %v3866_v20  ;;  %v3892_v49 = vld [vmem:[%s4351_s23 + $0x4b8] sm:$0x1]  ;;  %v3509_v52 = vld [vmem:[%s217_s29] sm:$0xff] }
  0x47   : > { %3834 = vmatmul.mubr.msk.f32.vlgmr.msra.gmra.mrb[22].mxu0 %vm266_vm3, %v4370_v14  ;;  %4112 = vmatprep.subr.msk.bf16.mxu1 %vm4353_vm2, %v4110_v31  ;;  %v4165_v31 = vpack.c.bf16 %v3882_v24, %v3863_v23  ;;  %v4193_v51 = vpack.c.bf16 %v3892_v49, %v3873_v48 }
  0x48   : > { %3837 = vmatmul.mubr.msk.f32.vlgmr.msra.gmra.mrb[22].mxu1 %vm266_vm3, %v4370_v14  ;;  %4109 = vmatpush1.bf16.msk.msra.mxu0 %vm4353_vm2, %v4107_v34  ;;  %v4171_v34 = vpack.c.bf16 %v3884_v27, %v3865_v26 }
  0x49   : > { %4115 = vmatpush1.bf16.msk.msra.mxu1 %vm4353_vm2, %v4113_v37  ;;  %2305 = vmatprep.mubr.f32.mxu0 %v4285_v0  ;;  %v4174_v37 = vpack.c.bf16 %v3887_v30, %v3868_v29 }
  0x4a   : > { %2376 = vmatprep.mubr.f32.mxu1 %v4285_v0  ;;  %4118 = vmatprep.subr.msk.bf16.mxu0 %vm4353_vm2, %v4116_v40  ;;  %v4180_v40 = vpack.c.bf16 %v3889_v33, %v3870_v32 }
  0x4b   : > { %3840 = vmatmul.mubr.msk.f32.vlgmr.msra.gmra.mrb[24].mxu0 %vm266_vm3, %v4370_v14  ;;  %4124 = vmatprep.subr.msk.bf16.mxu1 %vm4353_vm2, %v4122_v43  ;;  %v4177_v43 = vpack.c.bf16 %v3886_v36, %v3867_v35 }
  0x4c   : > { %3843 = vmatmul.mubr.msk.f32.vlgmr.msra.gmra.mrb[24].mxu1 %vm266_vm3, %v4370_v14  ;;  %4121 = vmatpush1.bf16.msk.msra.mxu0 %vm4353_vm2, %v4119_v46  ;;  %v3890_v46 = vld [vmem:[%s4351_s23 + $0x4a8] sm:$0x1] }
  0x4d   : > { %4127 = vmatpush1.bf16.msk.msra.mxu1 %vm4353_vm2, %v4125_v47  ;;  %2447 = vmatprep.mubr.f32.mxu0 %v4285_v0  ;;  %v4186_v47 = vpack.c.bf16 %v3891_v42, %v3872_v41 }
  0x4e   : > { %2518 = vmatprep.mubr.f32.mxu1 %v4285_v0  ;;  %4130 = vmatprep.subr.msk.bf16.mxu0 %vm4353_vm2, %v4128_v50  ;;  %v4189_v50 = vpack.c.bf16 %v3890_v46, %v3871_v45 }
  0x4f   : > { %3846 = vmatmul.mubr.msk.f32.vlgmr.msra.gmra.mrb[26].mxu0 %vm266_vm3, %v4370_v14  ;;  %4134 = vmatprep.subr.bf16.mxu1 %v4288_v8 }
  0x50   : > { %3849 = vmatmul.mubr.msk.f32.vlgmr.msra.gmra.mrb[26].mxu1 %vm266_vm3, %v4370_v14  ;;  %4133 = vmatpush1.bf16.msk.msra.mxu0 %vm4353_vm2, %v4131_v55 }
  0x51   : > { %4137 = vmatpush3.bf16.msk.msra.mxu1 %vm4353_vm2, %v4135_v58  ;;  %2589 = vmatprep.mubr.f32.mxu0 %v4285_v0 }
  0x52   : > { %3954 = vmatprep.mubr.msk.f32.mxu1 %vm4289_vm4, %v4285_v0  ;;  %4140 = vmatprep.subr.msk.bf16.mxu0 %vm4353_vm2, %v4138_v61 }
  0x53   : > { %3852 = vmatmul.mubr.msk.f32.vlgmr.msra.gmra.mrb[28].mxu0 %vm266_vm3, %v4370_v14  ;;  %4146 = vmatprep.subr.msk.bf16.mxu1 %vm4353_vm2, %v4144_v1 }
  0x54   : > { %3955 = vmatmul.mubr.msk.f32.vlgmr.msra.gmra.mrb[28].mxu1 %vm266_vm3, %v4370_v14  ;;  %4143 = vmatpush1.bf16.msk.msra.mxu0 %vm4353_vm2, %v4141_v5 }
  0x55   : > { %4149 = vmatpush1.bf16.msk.msra.mxu1 %vm4353_vm2, %v4147_v9  ;;  %2845 = vmatprep.mubr.f32.mxu0 %v4285_v0 }
  0x56   : > { %2916 = vmatprep.mubr.f32.mxu1 %v4285_v0  ;;  %4152 = vmatprep.subr.msk.bf16.mxu0 %vm4353_vm2, %v4150_v12 }
  0x57   : > { %3895 = vmatmul.mubr.msk.f32.vlgmr.msra.gmra.mrb[30].mxu0 %vm266_vm3, %v4370_v14  ;;  %4158 = vmatprep.subr.msk.bf16.mxu1 %vm4353_vm2, %v4156_v16 }
  0x58   : > { %3898 = vmatmul.mubr.msk.f32.vlgmr.msra.gmra.mrb[30].mxu1 %vm266_vm3, %v4370_v14  ;;  %4155 = vmatpush1.bf16.msk.msra.mxu0 %vm4353_vm2, %v4153_v19 }
  0x59   : > { %4161 = vmatpush1.bf16.msk.msra.mxu1 %vm4353_vm2, %v4159_v22  ;;  %2987 = vmatprep.mubr.f32.mxu0 %v4285_v0 }
  0x5a   : > { %3058 = vmatprep.mubr.f32.mxu1 %v4285_v0  ;;  %4164 = vmatprep.subr.msk.bf16.mxu0 %vm4353_vm2, %v4162_v25 }
  0x5b   : > { %3901 = vmatmul.mubr.msk.f32.vlgmr.msra.gmra.mrb[32].mxu0 %vm266_vm3, %v4370_v14  ;;  %4170 = vmatprep.subr.msk.bf16.mxu1 %vm4353_vm2, %v4168_v28 }
  0x5c   : > { %3904 = vmatmul.mubr.msk.f32.vlgmr.msra.gmra.mrb[32].mxu1 %vm266_vm3, %v4370_v14  ;;  %4167 = vmatpush1.bf16.msk.msra.mxu0 %vm4353_vm2, %v4165_v31 }
  0x5d   : > { %4173 = vmatpush1.bf16.msk.msra.mxu1 %vm4353_vm2, %v4171_v34  ;;  %3129 = vmatprep.mubr.f32.mxu0 %v4285_v0 }
  0x5e   : > { %3200 = vmatprep.mubr.f32.mxu1 %v4285_v0  ;;  %4176 = vmatprep.subr.msk.bf16.mxu0 %vm4353_vm2, %v4174_v37 }
  0x5f   : > { %3907 = vmatmul.mubr.msk.f32.vlgmr.msra.gmra.mrb[34].mxu0 %vm266_vm3, %v4370_v14  ;;  %4182 = vmatprep.subr.msk.bf16.mxu1 %vm4353_vm2, %v4180_v40 }
  0x60   : > { %3910 = vmatmul.mubr.msk.f32.vlgmr.msra.gmra.mrb[34].mxu1 %vm266_vm3, %v4370_v14  ;;  %4179 = vmatpush1.bf16.msk.msra.mxu0 %vm4353_vm2, %v4177_v43 }
  0x61   : > { %4185 = vmatpush1.bf16.msk.msra.mxu1 %vm4353_vm2, %v4183_v44  ;;  %3271 = vmatprep.mubr.f32.mxu0 %v4285_v0 }
  0x62   : > { %3342 = vmatprep.mubr.f32.mxu1 %v4285_v0  ;;  %4188 = vmatprep.subr.msk.bf16.mxu0 %vm4353_vm2, %v4186_v47 }
  0x63   : > { %3913 = vmatmul.mubr.msk.f32.vlgmr.msra.gmra.mrb[36].mxu0 %vm266_vm3, %v4370_v14  ;;  %4192 = vmatprep.subr.bf16.mxu1 %v4288_v8 }
  0x64   : > { %3916 = vmatmul.mubr.msk.f32.vlgmr.msra.gmra.mrb[36].mxu1 %vm266_vm3, %v4370_v14  ;;  %4191 = vmatpush1.bf16.msk.msra.mxu0 %vm4353_vm2, %v4189_v50 }
  0x65   : > { %4195 = vmatpush3.bf16.msk.msra.mxu1 %vm4353_vm2, %v4193_v51  ;;  %3413 = vmatprep.mubr.f32.mxu0 %v4285_v0 }
  0x66   : > { %3961 = vmatprep.mubr.msk.f32.mxu1 %vm4289_vm4, %v4285_v0  ;;  %3512 = vperm.xlu0 %4244, %v3509_v52  }
  0x67   : > { %3919 = vmatmul.mubr.msk.f32.vlgmr.msra.gmra.mrb[38].mxu0 %vm266_vm3, %v4370_v14 }
  0x68   : > { %3962 = vmatmul.mubr.msk.f32.vlgmr.msra.gmra.mrb[38].mxu1 %vm266_vm3, %v4370_v14 }
  0xee   : > { %v394_v8 = vpop.f32.mrb[0].mxu0 }
  0xef   : > { %v4799_v53 = vpop.f32.mrb[1].mxu0  ;;  %v465_v54 = vpop.f32.mrb[0].mxu1 }
  0xf0   : > { %v4801_v55 = vpop.f32.mrb[1].mxu1 }
  0xf2   : > { %v4803_v2 = vpop.f32.mrb[2].mxu0 }
  0xf3   : > { %v4805_v56 = vpop.f32.mrb[3].mxu0  ;;  %v4807_v57 = vpop.f32.mrb[2].mxu1 }
  0xf4   : > { %v4809_v0 = vpop.f32.mrb[3].mxu1 }
  0xf6   : > { %v4811_v58 = vpop.f32.mrb[4].mxu0 }
  0xf7   : > { %v4813_v59 = vpop.f32.mrb[5].mxu0  ;;  %v4815_v60 = vpop.f32.mrb[4].mxu1 }
  0xf8   : > { %v4817_v14 = vpop.f32.mrb[5].mxu1 }
  0xfa   : > { %v4819_v61 = vpop.f32.mrb[6].mxu0 }
  0xfb   : > { %v4821_v62 = vpop.f32.mrb[7].mxu0  ;;  %v4823_v63 = vpop.f32.mrb[6].mxu1 }
  0xfc   : > { %v4825_v1 = vpop.f32.mrb[7].mxu1 }
  0xfe   : > { %v4827_v3 = vpop.f32.mrb[8].mxu0 }
  0xff   : > { %v4829_v4 = vpop.f32.mrb[9].mxu0  ;;  %v4831_v5 = vpop.f32.mrb[8].mxu1 }
 0x100   : > { %v3942_v6 = vpop.f32.mrb[9].mxu1 }
 0x102   : > { %v1199_v7 = vpop.f32.mrb[10].mxu0 }
 0x103   : > { %v1842_v9 = vmax.f32 %v394_v8, %v1199_v7  ;;  %v1270_v10 = vpop.f32.mrb[10].mxu1  ;;  %v1201_v11 = vpop.f32.mrb[11].mxu0 }
 0x104   : > { %v1844_v12 = vmax.f32 %v465_v54, %v1270_v10  ;;  %v1843_v13 = vmax.f32 %v4799_v53, %v1201_v11  ;;  %v1272_v15 = vpop.f32.mrb[11].mxu1 }
 0x105   : > { %v1845_v16 = vmax.f32 %v4801_v55, %v1272_v15 }
 0x106   : > { %v1341_v17 = vpop.f32.mrb[12].mxu0 }
 0x107   : > { %v1846_v18 = vmax.f32 %v4803_v2, %v1341_v17  ;;  %v1412_v19 = vpop.f32.mrb[12].mxu1  ;;  %v1343_v20 = vpop.f32.mrb[13].mxu0 }
 0x108   : > { %v1848_v21 = vmax.f32 %v4807_v57, %v1412_v19  ;;  %v1847_v22 = vmax.f32 %v4805_v56, %v1343_v20  ;;  %v1414_v23 = vpop.f32.mrb[13].mxu1 }
 0x109   : > { %v1849_v24 = vmax.f32 %v4809_v0, %v1414_v23 }
 0x10a   : > { %v1483_v25 = vpop.f32.mrb[14].mxu0 }
 0x10b   : > { %v1850_v26 = vmax.f32 %v4811_v58, %v1483_v25  ;;  %v1554_v27 = vpop.f32.mrb[14].mxu1  ;;  %v1485_v28 = vpop.f32.mrb[15].mxu0 }
 0x10c   : > { %v1852_v29 = vmax.f32 %v4815_v60, %v1554_v27  ;;  %v1851_v30 = vmax.f32 %v4813_v59, %v1485_v28  ;;  %v1556_v31 = vpop.f32.mrb[15].mxu1 }
 0x10d   : > { %v1853_v32 = vmax.f32 %v4817_v14, %v1556_v31 }
 0x10e   : > { %v1625_v33 = vpop.f32.mrb[16].mxu0 }
 0x10f   : > { %v1854_v34 = vmax.f32 %v4819_v61, %v1625_v33  ;;  %v1696_v35 = vpop.f32.mrb[16].mxu1  ;;  %v1627_v36 = vpop.f32.mrb[17].mxu0 }
 0x110   : > { %v1856_v37 = vmax.f32 %v4823_v63, %v1696_v35  ;;  %v1855_v38 = vmax.f32 %v4821_v62, %v1627_v36  ;;  %v1698_v39 = vpop.f32.mrb[17].mxu1 }
 0x111   : > { %v1857_v40 = vmax.f32 %v4825_v1, %v1698_v39 }
 0x112   : > { %v1767_v41 = vpop.f32.mrb[18].mxu0 }
 0x113   : > { %v1858_v42 = vmax.f32 %v4827_v3, %v1767_v41  ;;  %v1838_v43 = vpop.f32.mrb[18].mxu1  ;;  %v1769_v44 = vpop.f32.mrb[19].mxu0 }
 0x114   : > { %v1860_v45 = vmax.f32 %v4831_v5, %v1838_v43  ;;  %v1859_v46 = vmax.f32 %v4829_v4, %v1769_v44  ;;  %v3949_v47 = vpop.f32.mrb[19].mxu1 }
 0x116   : > { %v2023_v48 = vpop.f32.mrb[20].mxu0 }
 0x117   : > { %v2666_v49 = vmax.f32 %v1842_v9, %v2023_v48  ;;  %v2094_v50 = vpop.f32.mrb[20].mxu1  ;;  %v2025_v51 = vpop.f32.mrb[21].mxu0 }
 0x118   : > { %v2668_v52 = vmax.f32 %v1844_v12, %v2094_v50  ;;  %v2667_v8 = vmax.f32 %v1843_v13, %v2025_v51  ;;  %v2096_v53 = vpop.f32.mrb[21].mxu1 }
 0x119   : > { %v2669_v54 = vmax.f32 %v1845_v16, %v2096_v53 }
 0x11a   : > { %v2165_v55 = vpop.f32.mrb[22].mxu0 }
 0x11b   : > { %v2670_v2 = vmax.f32 %v1846_v18, %v2165_v55  ;;  %v2236_v56 = vpop.f32.mrb[22].mxu1  ;;  %v2167_v57 = vpop.f32.mrb[23].mxu0 }
 0x11c   : > { %v2672_v0 = vmax.f32 %v1848_v21, %v2236_v56  ;;  %v2671_v58 = vmax.f32 %v1847_v22, %v2167_v57  ;;  %v2238_v59 = vpop.f32.mrb[23].mxu1 }
 0x11d   : > { %v4850_v60 = vmax.f32 %v1849_v24, %v2238_v59  ;;  %v4876_v24 = vpop.permute.xlu0 %3512 }
 0x11e   : > { %v2307_v14 = vpop.f32.mrb[24].mxu0 }
 0x11f   : > { %v4852_v61 = vmax.f32 %v1850_v26, %v2307_v14  ;;  %v2378_v62 = vpop.f32.mrb[24].mxu1  ;;  %v2309_v63 = vpop.f32.mrb[25].mxu0 }
 0x120   : > { %v4854_v1 = vmax.f32 %v1852_v29, %v2378_v62  ;;  %v4856_v3 = vmax.f32 %v1851_v30, %v2309_v63  ;;  %v2380_v4 = vpop.f32.mrb[25].mxu1 }
 0x121   : > { %v4858_v5 = vmax.f32 %v1853_v32, %v2380_v4 }
 0x122   : > { %v2449_v6 = vpop.f32.mrb[26].mxu0 }
 0x123   : > { %v4860_v7 = vmax.f32 %v1854_v34, %v2449_v6  ;;  %v2520_v9 = vpop.f32.mrb[26].mxu1  ;;  %v2451_v10 = vpop.f32.mrb[27].mxu0 }
 0x124   : > { %v4863_v11 = vmax.f32 %v1856_v37, %v2520_v9  ;;  %v4865_v12 = vmax.f32 %v1855_v38, %v2451_v10  ;;  %v2522_v13 = vpop.f32.mrb[27].mxu1 }
 0x125   : > { %v4868_v15 = vmax.f32 %v1857_v40, %v2522_v13 }
 0x126   : > { %v2591_v16 = vpop.f32.mrb[28].mxu0 }
 0x127   : > { %v4870_v17 = vmax.f32 %v1858_v42, %v2591_v16  ;;  %v2662_v18 = vpop.f32.mrb[28].mxu1  ;;  %v2593_v19 = vpop.f32.mrb[29].mxu0 }
 0x128   : > { %v4872_v20 = vmax.f32 %v1860_v45, %v2662_v18  ;;  %v4874_v21 = vmax.f32 %v1859_v46, %v2593_v19  ;;  %v3956_v22 = vpop.f32.mrb[29].mxu1 }
 0x12a   : > { %v2847_v23 = vpop.f32.mrb[30].mxu0 }
 0x12b   : > { %v3490_v25 = vmax.f32 %v2666_v49, %v2847_v23  ;;  %v2918_v26 = vpop.f32.mrb[30].mxu1  ;;  %v2849_v27 = vpop.f32.mrb[31].mxu0 }
 0x12c   : > { %v3492_v28 = vmax.f32 %v2668_v52, %v2918_v26  ;;  %v3491_v29 = vmax.f32 %v2667_v8, %v2849_v27  ;;  %v2920_v30 = vpop.f32.mrb[31].mxu1 }
 0x12d   : > { %v3493_v31 = vmax.f32 %v2669_v54, %v2920_v30  ;;  %v3515_v32 = vadd.f32 %v4876_v24, %v3490_v25 }
 0x12e   : > { %v3516_v33 = vadd.f32 %v4876_v24, %v3491_v29  ;;  %v3517_v34 = vadd.f32 %v4876_v24, %v3492_v28  ;;  %v2989_v35 = vpop.f32.mrb[32].mxu0 }
 0x12f   : > { %v3518_v36 = vadd.f32 %v4876_v24, %v3493_v31  ;;  %v3534_v37 = vmax.f32 %v3515_v32, 0.0  ;;  %v3494_v38 = vmax.f32 %v2670_v2, %v2989_v35  ;;  %v3060_v39 = vpop.f32.mrb[32].mxu1  ;;  %v2991_v40 = vpop.f32.mrb[33].mxu0 }
 0x130   : > { %v3535_v41 = vmax.f32 %v3516_v33, 0.0  ;;  %v3536_v42 = vmax.f32 %v3517_v34, 0.0  ;;  %v3496_v43 = vmax.f32 %v2672_v0, %v3060_v39  ;;  %v3495_v44 = vmax.f32 %v2671_v58, %v2991_v40  ;;  %v3062_v45 = vpop.f32.mrb[33].mxu1 }
 0x131   : > { %v3537_v46 = vmax.f32 %v3518_v36, 0.0  ;;  %3553 = vst [vmem:[%s4882_s9] sm:$0xff] %v3534_v37  ;;  %v3519_v47 = vadd.f32 %v4876_v24, %v3494_v38  ;;  %v3497_v48 = vmax.f32 %v4850_v60, %v3062_v45 }
 0x132   : > { %3554 = vst [vmem:[%s4882_s9 + $0x8] sm:$0xff] %v3535_v41  ;;  %3555 = vst [vmem:[%s4882_s9 + $0x10] sm:$0xff] %v3536_v42  ;;  %v3521_v49 = vadd.f32 %v4876_v24, %v3496_v43  ;;  %v3520_v50 = vadd.f32 %v4876_v24, %v3495_v44  ;;  %v3131_v51 = vpop.f32.mrb[34].mxu0 }
 0x133   : > { %3556 = vst [vmem:[%s4882_s9 + $0x18] sm:$0xff] %v3537_v46  ;;  %v3538_v52 = vmax.f32 %v3519_v47, 0.0  ;;  %v3522_v8 = vadd.f32 %v4876_v24, %v3497_v48  ;;  %v3498_v53 = vmax.f32 %v4852_v61, %v3131_v51  ;;  %v3202_v54 = vpop.f32.mrb[34].mxu1  ;;  %v3133_v55 = vpop.f32.mrb[35].mxu0 }
 0x134   : > { %v3540_v2 = vmax.f32 %v3521_v49, 0.0  ;;  %v3539_v56 = vmax.f32 %v3520_v50, 0.0  ;;  %v3500_v57 = vmax.f32 %v4854_v1, %v3202_v54  ;;  %v3499_v0 = vmax.f32 %v4856_v3, %v3133_v55  ;;  %v3204_v58 = vpop.f32.mrb[35].mxu1 }
 0x135   : > { %3557 = vst [vmem:[%s4882_s9 + $0x20] sm:$0xff] %v3538_v52  ;;  %v3541_v59 = vmax.f32 %v3522_v8, 0.0  ;;  %v3523_v60 = vadd.f32 %v4876_v24, %v3498_v53  ;;  %v3501_v14 = vmax.f32 %v4858_v5, %v3204_v58 }
 0x136   : > { %3559 = vst [vmem:[%s4882_s9 + $0x30] sm:$0xff] %v3540_v2  ;;  %3558 = vst [vmem:[%s4882_s9 + $0x28] sm:$0xff] %v3539_v56  ;;  %v3525_v61 = vadd.f32 %v4876_v24, %v3500_v57  ;;  %v3524_v62 = vadd.f32 %v4876_v24, %v3499_v0  ;;  %v3273_v63 = vpop.f32.mrb[36].mxu0 }
 0x137   : > { %3560 = vst [vmem:[%s4882_s9 + $0x38] sm:$0xff] %v3541_v59  ;;  %v3542_v1 = vmax.f32 %v3523_v60, 0.0  ;;  %v3526_v3 = vadd.f32 %v4876_v24, %v3501_v14  ;;  %v3502_v4 = vmax.f32 %v4860_v7, %v3273_v63  ;;  %v3344_v6 = vpop.f32.mrb[36].mxu1  ;;  %v3275_v9 = vpop.f32.mrb[37].mxu0 }
 0x138   : > { %v3544_v5 = vmax.f32 %v3525_v61, 0.0  ;;  %v3543_v10 = vmax.f32 %v3524_v62, 0.0  ;;  %v3504_v13 = vmax.f32 %v4863_v11, %v3344_v6  ;;  %v3503_v16 = vmax.f32 %v4865_v12, %v3275_v9  ;;  %v3346_v18 = vpop.f32.mrb[37].mxu1 }
 0x139   : > { %3561 = vst [vmem:[%s4882_s9 + $0x40] sm:$0xff] %v3542_v1  ;;  %v3545_v19 = vmax.f32 %v3526_v3, 0.0  ;;  %v3527_v22 = vadd.f32 %v4876_v24, %v3502_v4  ;;  %v3505_v23 = vmax.f32 %v4868_v15, %v3346_v18 }
 0x13a   : > { %3563 = vst [vmem:[%s4882_s9 + $0x50] sm:$0xff] %v3544_v5  ;;  %3562 = vst [vmem:[%s4882_s9 + $0x48] sm:$0xff] %v3543_v10  ;;  %v3529_v7 = vadd.f32 %v4876_v24, %v3504_v13  ;;  %v3528_v25 = vadd.f32 %v4876_v24, %v3503_v16  ;;  %v3415_v26 = vpop.f32.mrb[38].mxu0 }
 0x13b   : > { %3564 = vst [vmem:[%s4882_s9 + $0x58] sm:$0xff] %v3545_v19  ;;  %v3546_v11 = vmax.f32 %v3527_v22, 0.0  ;;  %v3530_v12 = vadd.f32 %v4876_v24, %v3505_v23  ;;  %v3506_v27 = vmax.f32 %v4870_v17, %v3415_v26  ;;  %v3486_v28 = vpop.f32.mrb[38].mxu1  ;;  %v3417_v29 = vpop.f32.mrb[39].mxu0 }
 0x13c   : > { %v3548_v15 = vmax.f32 %v3529_v7, 0.0  ;;  %v3547_v30 = vmax.f32 %v3528_v25, 0.0  ;;  %v3508_v31 = vmax.f32 %v4872_v20, %v3486_v28  ;;  %v3507_v32 = vmax.f32 %v4874_v21, %v3417_v29  ;;  %v3963_v33 = vpop.f32.mrb[39].mxu1 }
 0x13d   : > { %3565 = vst [vmem:[%s4882_s9 + $0x60] sm:$0xff] %v3546_v11  ;;  %v3549_v34 = vmax.f32 %v3530_v12, 0.0  ;;  %v3531_v35 = vadd.f32 %v4876_v24, %v3506_v27 }
 0x13e   : > { %3567 = vst [vmem:[%s4882_s9 + $0x70] sm:$0xff] %v3548_v15  ;;  %3566 = vst [vmem:[%s4882_s9 + $0x68] sm:$0xff] %v3547_v30  ;;  %v3533_v17 = vadd.f32 %v4876_v24, %v3508_v31  ;;  %v3532_v36 = vadd.f32 %v4876_v24, %v3507_v32 }
 0x13f   : > { %3568 = vst [vmem:[%s4882_s9 + $0x78] sm:$0xff] %v3549_v34  ;;  %v3550_v37 = vmax.f32 %v3531_v35, 0.0 }
 0x140   : > { %v3552_v38 = vmax.f32 %v3533_v17, 0.0  ;;  %v3551_v20 = vmax.f32 %v3532_v36, 0.0 }
 0x141   : > { %3569 = vst [vmem:[%s4882_s9 + $0x80] sm:$0xff] %v3550_v37 }
 0x142   : > { %3572 = vst.msk [vmem:[%s4882_s9 + $0x90] sm:$0xff] %vm3571_vm5, %v3552_v38  ;;  %3570 = vst [vmem:[%s4882_s9 + $0x88] sm:$0xff] %v3551_v20 }
 0x143 PF: > { %s13_s16 = sadd.s32 1, %s4283_s16   ;;  %s4954_s12 = smov %s4275_s14 }
 0x144   : > { %p10_p7 = scmp.ge.s32.totalorder %s13_s16, 10   ;;  %s4955_s13 = smov %s4279_s15 }
 0x145   : > { %s4956_s14 = smov %s4959_s17  ;;  %s4957_s15 = smov %s4963_s18 }
 0x146   :  { %12 = sbr.rel (!%p10_p7) target bundleno = 3 (0x3), region = 71 }

// kernel: simple_cnn_forward.3
= control target key start
LH: loop header
LB: loop body
LE: loop exit
PB: predicated region body
PF: predicated region fallthrough
CT: control target
= control target key end

     0   :  { %s9378_s0 = inlined_call_operand.vmem [shape: f32[2,77824], index: 0, kind: input, shape index: {}]   ;;  %s9379_s1 = inlined_call_operand.hbm [shape: f32[2,77824,64], index: 1, kind: input, shape index: {}]   ;;  %s9380_s2 = inlined_call_operand.vmem [shape: f32[2,1,64], index: 2, kind: input, shape index: {}]   ;;  %s9381_s3 = inlined_call_operand.vmem [shape: f32[2,64,10], index: 3, kind: input, shape index: {}]   ;;  %s9382_s4 = inlined_call_operand.vmem [shape: f32[1,10], index: 4, kind: input, shape index: {}]   ;;  %s9383_s5 = inlined_call_operand.vmem [shape: f32[2,2,10], index: 5, kind: output, shape index: {}]  }
   0x1   :  { %9386 = sst [smem:[#allocation8_spill]] %s9379_s1 }
   0x2   :  { %10 = vsyncpa [#allocation4], 0 }
   0x3   :  { %12 = vsyncpa [#allocation4 + $0x1], 0  ;;  %s7700_s18 = smov 0   ;;  %s7702_s19 = smov 0  }
   0x4   :  { %s7704_s20 = smov 0   ;;  %s7706_s21 = smov 0  }
   0x5   :  { %s7708_s22 = smov 0   ;;  %s7710_s23 = smov 0  }
   0x6   :  { %s7712_s24 = smov 0   ;;  %s7714_s25 = smov 0  }
   0x7 LB: > { %s4861_s26 = sadd.s32 4294967295, %s7660_s25   ;;  %s27_s27 = sadd.s32 1, %s7652_s23  ;;  %s7660_s25 = sphi %s7714_s25, %s18_s25   ;;  %s7656_s24 = sphi %s7712_s24, %s9401_s24   ;;  %s7652_s23 = sphi %s7710_s23, %s9400_s23   ;;  %s7648_s22 = sphi %s7708_s22, %s9399_s22   ;;  %s7644_s21 = sphi %s7706_s21, %s9398_s21   ;;  %s7640_s20 = sphi %s7704_s20, %s9397_s20   ;;  %s7636_s19 = sphi %s7702_s19, %s9396_s19   ;;  %s7632_s18 = sphi %s7700_s18, %s9395_s18  }
   0x8   : > { %p28_p0 = scmp.ge.s32.totalorder %s27_s27, 8  ;;  %s30_s28 = sadd.s32 1, %s7656_s24 }
   0x9   : > { %s65_s29 = sadd.s32 1, %s7640_s20  ;;  %p72_p1 = scmp.ne.s32.totalorder %s7640_s20, %s7636_s19 }
   0xa   : > { %s9403_s27 = smov (%p28_p0, %s27_s27), 0  ;;  %s9405_s28 = smov (!%p28_p0, %s30_s28), %s7656_s24 }
   0xb   : > { %9387 = sst [smem:[#allocation6_spill]] %s9403_s27  ;;  %s61_s30 = ssub.s32 %s7652_s23, %s9403_s27 }
   0xc   : > { %p73_p2 = scmp.eq.s32.totalorder %s7660_s25, 0  ;;  %p32_p3 = scmp.ge.s32.totalorder %s9405_s28, 2 }
   0xd   : > { %p78_p4 = scmp.ne.s32.totalorder %s7636_s19, %s7632_s18  ;;  %p79_p6 = scmp.eq.s32.totalorder %s4861_s26, 0 }
   0xe   : > { %p74_p5 = por %p73_p2, %p72_p1  ;;  %s9407_s28 = smov (%p32_p3, %s9405_s28), 0 }
   0xf   : > { %9388 = sst [smem:[#allocation7_spill]] %s9407_s28  ;;  %p7753_p7 = por %p79_p6, %p78_p4 }
  0x10   : > { %s60_s7 = ssub.s32 %s7656_s24, %s9407_s28  ;;  %p7473_p8 = scmp.lt.s32.totalorder %s7660_s25, 16 }
  0x11   : > { %s62_s8 = sor.u32 %s61_s30, %s60_s7  ;;  %s213_s9 = sand.u32 1, %s7640_s20  }
  0x12   : > { %p63_p9 = scmp.eq.s32.totalorder %s62_s8, 0  ;;  %s7464_s10 = smul.u32 9728, %s213_s9 }
  0x13   : > { %p7761_p10 = pnand %p7473_p8, %p74_p5  ;;  %s218_s13 = smul.u32 1216, %s7652_s23 }
  0x14   : > { %s7766_s12 = scalar_select %p63_p9, %s7640_s20, %s65_s29  }
  0x15   : > { %s7465_s14 = smul.u32 9728, %s7656_s24  ;;  %s217_s15 = scalar_lea.vmem [#allocation3], %s7464_s10 }
  0x16   : > { %s226_s16 = sshll.u32 %s217_s15, 4  ;;  %s9391_s1 = sld [smem:[#allocation8_spill]]  ;;  %s7770_s16 = int_to_ptr.vmem [resolvable:$true] %s226_s16 }
  0x17   : > { %s223_s17 = sadd.s32 %s7465_s14, %s218_s13  ;;  %s7778_s29 = scalar_lea.sflag [#allocation4], %s213_s9 }
  0x18   : > { %s4865_s18 = sshll.u32 %s223_s17, 7  ;;  %p7566_p13 = pneg %p7761_p10 }
  0x1c   : > { %s7775_s7 = scalar_lea.hbm %s9391_s1, %s4865_s18  ;;  %s7569_s14 = scalar_lea.hbm %s9391_s1, 2490368 }
  0x1d   : > { %s7564_s8 = scalar_lea.hbm %s7775_s7, 155648  ;;  %p7570_p2 = scmp.lt.u32.totalorder %s7775_s7, %s9391_s1 }
  0x1e   : > { %p7565_p12 = scmp.ne.s32.totalorder %s7775_s7, %s7564_s8  ;;  %p7571_p3 = scmp.lt.u32.totalorder %s7569_s14, %s7564_s8 }
  0x1f   : > { %p7573_p5 = scmp.lt.u32.totalorder %s7564_s8, %s7775_s7 }
  0x20   : > { %p7567_p0 = pnand %p7566_p13, %p7565_p12  ;;  %p7572_p4 = por %p7571_p3, %p7570_p2 }
  0x22   : > { %p7568_p1 = pneg %p7567_p0  ;;  %p7574_p6 = por %p7573_p5, %p7572_p4 }
  0x24   : > { %p7575_p8 = pnand %p7574_p6, %p7568_p1 }
  0x26   : > { %7578 = shalt.err (!%p7575_p8)
}
  0x27   : > { %s7579_s9 = scalar_lea.vmem %s7770_s16, 155648  ;;  %s7662_s18 = smov [#allocation3]  }
  0x28   : > { %p7580_p9 = scmp.ne.s32.totalorder %s7770_s16, %s7579_s9  ;;  %s7584_s26 = sshll.u32 %s7662_s18, 4  ;;  %s7585_s26 = int_to_ptr.vmem [resolvable:$false] %s7584_s26 }
  0x29   : > { %s7586_s30 = scalar_lea.vmem %s7585_s26, 311296  ;;  %p7587_p11 = scmp.lt.s32.totalorder %s7770_s16, %s7585_s26 }
  0x2a   : > { %p7582_p12 = pnand %p7580_p9, %p7566_p13  ;;  %p7588_p2 = scmp.lt.s32.totalorder %s7586_s30, %s7579_s9 }
  0x2c   : > { %p7583_p0 = pneg %p7582_p12  ;;  %p7589_p3 = por %p7588_p2, %p7587_p11 }
  0x2e   : > { %p7590_p4 = pnand %p7589_p3, %p7583_p0 }
  0x30   : > { %7593 = shalt.err (!%p7590_p4)
}
  0x31   : > { %s7663_s8 = smov 128   ;;  %s7664_s10 = smov 8  }
  0x32   : > { %7472 = dma.hbm_to_vmem [thread:$0]  (!%p7761_p10), %s7775_s7, 155648, %s7770_s16, %s7778_s29, %s7663_s8, %s7663_s8, %s7664_s10  }
  0x33   : > { %p248_p13 = scmp.lt.s32.totalorder %s7660_s25, 17  ;;  %p9392_p1 = scmp.ge.s32.totalorder %s7660_s25, 1 }
  0x35   : > { %p249_p5 = pnand %p9392_p1, %p248_p13 }
  0x36   : > { %s254_s13 = sand.u32 (!%p249_p5), 1, %s7636_s19  }
  0x37   : > { %252 = sbr.rel (%p249_p5) target bundleno = 1134 (0x46e), region = 40  ;;  %s255_s15 = scalar_lea.sflag (!%p249_p5), [#allocation4], %s254_s13 }
  0x38   : > { %s7466_s14 = smul.u32 (!%p249_p5), 9728, %s254_s13 }
  0x3a   : > { %s7810_s17 = scalar_lea.vmem (!%p249_p5), [#allocation3], %s7466_s14 }
  0x3e   : > { %7627 = dma.done.wait (%p7753_p7), %s255_s15, 155648  }
  0x3f   : > { %7629 = vsyncadd (%p7753_p7), %s255_s15, 4294811648  ;;  %s297_s11 = smul.u32 76, %s7644_s21  ;;  %p304_p10 = scmp.lt.s32.totalorder %s7648_s22, 1 }
  0x40   : > { %p4871_p7 = scmp.ne.s32.totalorder %s7644_s21, 0 }
  0x41   : > { %p298_p11 = scmp.lt.s32.totalorder %s297_s11, 607  ;;  %vm320_vm0 = vcmask (!%p4871_p7), 517120   ;;  %v7665_v0 = vmov (!%p4871_p7), 0.0  }
  0x42   : > { %s7819_s16 = scalar_select %p304_p10, %s7648_s22, 1 }
  0x43   : > { %s9409_s11 = smov (!%p298_p11, %s297_s11), 607  ;;  %319 = sbr.rel (%p4871_p7) target bundleno = 74 (0x4a), region = 48 }
  0x44   : > { %s306_s9 = scalar_lea.vmem %s9380_s2, %s7819_s16  ;;  %s4877_s18 = sshll.u32 %s7819_s16, 6  ;;  %321 = vst.msk [vmem:[#allocation2] sm:$0x3] (!%p4871_p7), %vm320_vm0, %v7665_v0 }
  0x45   : > { %s4867_s26 = sshll.u32 %s9409_s11, 1  ;;  %s7829_s8 = scalar_lea.vmem %s9381_s3, %s4877_s18 }
  0x46   : > { %s7834_s14 = scalar_lea.vmem %s9378_s0, %s4867_s26  ;;  %s4870_s15 = sshll.u32 %s7819_s16, 1 }
  0x47   : > { %s7840_s27 = scalar_lea.vmem %s9383_s5, %s4870_s15 }
  0x4a PF: > { %v358_v1 = vld [vmem:[%s7810_s17 + $0x80] sm:$0xff]  ;;  %v359_v2 = vld [vmem:[%s7810_s17 + $0x88] sm:$0xff]  ;;  %v360_v12 = vld [vmem:[%s7810_s17 + $0x90] sm:$0xff]  ;;  %v7666_v48 = vmov 1983009808   ;;  %v1581_v50 = vlaneseq  ;;  %vm4637_vm1 = vcmask 517120  }
  0x4b   : > { %v390_v3 = vld [vmem:[%s7810_s17 + $0x180] sm:$0xff]  ;;  %v6236_v4 = vpack.c.bf16 %v359_v2, %v358_v1  ;;  %v391_v5 = vld [vmem:[%s7810_s17 + $0x188] sm:$0xff]  ;;  %v361_v14 = vld [vmem:[%s7810_s17 + $0x98] sm:$0xff]  ;;  %v1579_v49 = vunpack.c.l.s4 %v7666_v48  ;;  %p4872_p6 = scmp.ne.s32.totalorder %s7644_s21, 7 }
  0x4c   : > { %v342_v6 = vld [vmem:[%s7810_s17] sm:$0xff]  ;;  %v343_v7 = vld [vmem:[%s7810_s17 + $0x8] sm:$0xff]  ;;  %v6268_v8 = vpack.c.bf16 %v391_v5, %v390_v3  ;;  %v392_v15 = vld [vmem:[%s7810_s17 + $0x190] sm:$0xff]  ;;  %v6240_v17 = vpack.c.bf16 %v361_v14, %v360_v12  ;;  %v7885_v1 = vshrl.u32 %v1581_v50, 7  ;;  %vm7668_vm2 = vmmov (!%p4872_p6), 0   ;;  %p4661_p8 = scmp.eq.s32.totalorder (!%p4872_p6), %s7648_s22, 0 }
  0x4d   : > { %v6238_v9 = vpack.c.bf16 %v343_v7, %v342_v6  ;;  %v374_v10 = vld [vmem:[%s7810_s17 + $0x100] sm:$0xff]  ;;  %v375_v11 = vld [vmem:[%s7810_s17 + $0x108] sm:$0xff]  ;;  %6237 = vmatprep.subr.bf16.mxu0 %v6236_v4  ;;  %v393_v16 = vld [vmem:[%s7810_s17 + $0x198] sm:$0xff]  ;;  %v1580_v0 = vunpack.c.0.s8 %v1579_v49  ;;  %vm4673_vm3 = vcmask (!%p4872_p6), 523264   ;;  %vm4747_vm4 = vcmask (!%p4872_p6), 74752  }
  0x4e   : > { %v6270_v13 = vpack.c.bf16 %v375_v11, %v374_v10  ;;  %6269 = vmatprep.subr.bf16.mxu1 %v6268_v8  ;;  %v6272_v18 = vpack.c.bf16 %v393_v16, %v392_v15  ;;  %v344_v19 = vld [vmem:[%s7810_s17 + $0x10] sm:$0xff]  ;;  %v345_v20 = vld [vmem:[%s7810_s17 + $0x18] sm:$0xff]  ;;  %v362_v24 = vld [vmem:[%s7810_s17 + $0xa0] sm:$0xff] }
  0x4f   : > { %6239 = vmatpush3.bf16.msra.mxu0 %v6238_v9  ;;  %v376_v21 = vld [vmem:[%s7810_s17 + $0x110] sm:$0xff]  ;;  %v6242_v22 = vpack.c.bf16 %v345_v20, %v344_v19  ;;  %v377_v23 = vld [vmem:[%s7810_s17 + $0x118] sm:$0xff]  ;;  %v363_v25 = vld [vmem:[%s7810_s17 + $0xa8] sm:$0xff]  ;;  %v7896_v14 = vsub.s32 %v1580_v0, %v7885_v1 }
  0x50   : > { %6271 = vmatpush3.bf16.msra.mxu1 %v6270_v13  ;;  %6241 = vmatprep.subr.bf16.mxu0 %v6240_v17  ;;  %v6274_v26 = vpack.c.bf16 %v377_v23, %v376_v21  ;;  %v6244_v27 = vpack.c.bf16 %v363_v25, %v362_v24  ;;  %v394_v28 = vld [vmem:[%s7810_s17 + $0x1a0] sm:$0xff]  ;;  %v395_v29 = vld [vmem:[%s7810_s17 + $0x1a8] sm:$0xff]  ;;  %v364_v36 = vld [vmem:[%s7810_s17 + $0xb0] sm:$0xff] }
  0x51   : > { %6273 = vmatprep.subr.bf16.mxu1 %v6272_v18  ;;  %v346_v30 = vld [vmem:[%s7810_s17 + $0x20] sm:$0xff]  ;;  %v6276_v31 = vpack.c.bf16 %v395_v29, %v394_v28  ;;  %v347_v32 = vld [vmem:[%s7810_s17 + $0x28] sm:$0xff]  ;;  %v365_v37 = vld [vmem:[%s7810_s17 + $0xb8] sm:$0xff] }
  0x52   : > { %v378_v33 = vld [vmem:[%s7810_s17 + $0x120] sm:$0xff]  ;;  %v379_v34 = vld [vmem:[%s7810_s17 + $0x128] sm:$0xff]  ;;  %v6246_v35 = vpack.c.bf16 %v347_v32, %v346_v30  ;;  %v396_v38 = vld [vmem:[%s7810_s17 + $0x1b0] sm:$0xff]  ;;  %v6248_v40 = vpack.c.bf16 %v365_v37, %v364_v36 }
  0x53   : > { %6243 = vmatpush3.bf16.msra.mxu0 %v6242_v22  ;;  %v6278_v39 = vpack.c.bf16 %v379_v34, %v378_v33  ;;  %v397_v41 = vld [vmem:[%s7810_s17 + $0x1b8] sm:$0xff]  ;;  %v348_v42 = vld [vmem:[%s7810_s17 + $0x30] sm:$0xff]  ;;  %v366_v47 = vld [vmem:[%s7810_s17 + $0xc0] sm:$0xff] }
  0x54   : > { %6275 = vmatpush3.bf16.msra.mxu1 %v6274_v26  ;;  %6245 = vmatprep.subr.bf16.mxu0 %v6244_v27  ;;  %v349_v43 = vld [vmem:[%s7810_s17 + $0x38] sm:$0xff]  ;;  %v6280_v44 = vpack.c.bf16 %v397_v41, %v396_v38  ;;  %v380_v45 = vld [vmem:[%s7810_s17 + $0x130] sm:$0xff]  ;;  %v367_v51 = vld [vmem:[%s7810_s17 + $0xc8] sm:$0xff] }
  0x55   : > { %6277 = vmatprep.subr.bf16.mxu1 %v6276_v31  ;;  %v381_v46 = vld [vmem:[%s7810_s17 + $0x138] sm:$0xff]  ;;  %v398_v52 = vld [vmem:[%s7810_s17 + $0x1c0] sm:$0xff]  ;;  %v399_v53 = vld [vmem:[%s7810_s17 + $0x1c8] sm:$0xff]  ;;  %v6250_v54 = vpack.c.bf16 %v349_v43, %v348_v42  ;;  %v6252_v56 = vpack.c.bf16 %v367_v51, %v366_v47 }
  0x56   : > { %v6282_v55 = vpack.c.bf16 %v381_v46, %v380_v45  ;;  %v350_v57 = vld [vmem:[%s7810_s17 + $0x40] sm:$0xff]  ;;  %v351_v58 = vld [vmem:[%s7810_s17 + $0x48] sm:$0xff]  ;;  %v6284_v60 = vpack.c.bf16 %v399_v53, %v398_v52  ;;  %v368_v62 = vld [vmem:[%s7810_s17 + $0xd0] sm:$0xff] }
  0x57   : > { %6247 = vmatpush3.bf16.msra.mxu0 %v6246_v35  ;;  %v382_v59 = vld [vmem:[%s7810_s17 + $0x140] sm:$0xff]  ;;  %v383_v61 = vld [vmem:[%s7810_s17 + $0x148] sm:$0xff]  ;;  %v369_v63 = vld [vmem:[%s7810_s17 + $0xd8] sm:$0xff]  ;;  %v6254_v4 = vpack.c.bf16 %v351_v58, %v350_v57 }
  0x58   : > { %6279 = vmatpush3.bf16.msra.mxu1 %v6278_v39  ;;  %6249 = vmatprep.subr.bf16.mxu0 %v6248_v40  ;;  %v400_v2 = vld [vmem:[%s7810_s17 + $0x1d0] sm:$0xff]  ;;  %v401_v3 = vld [vmem:[%s7810_s17 + $0x1d8] sm:$0xff]  ;;  %v6286_v5 = vpack.c.bf16 %v383_v61, %v382_v59  ;;  %v6256_v6 = vpack.c.bf16 %v369_v63, %v368_v62  ;;  %v370_v12 = vld [vmem:[%s7810_s17 + $0xe0] sm:$0xff] }
  0x59   : > { %6281 = vmatprep.subr.bf16.mxu1 %v6280_v44  ;;  %v352_v7 = vld [vmem:[%s7810_s17 + $0x50] sm:$0xff]  ;;  %v353_v8 = vld [vmem:[%s7810_s17 + $0x58] sm:$0xff]  ;;  %v6288_v10 = vpack.c.bf16 %v401_v3, %v400_v2  ;;  %v371_v13 = vld [vmem:[%s7810_s17 + $0xe8] sm:$0xff] }
  0x5a   : > { %v384_v9 = vld [vmem:[%s7810_s17 + $0x150] sm:$0xff]  ;;  %v385_v11 = vld [vmem:[%s7810_s17 + $0x158] sm:$0xff]  ;;  %v402_v15 = vld [vmem:[%s7810_s17 + $0x1e0] sm:$0xff]  ;;  %v6258_v17 = vpack.c.bf16 %v353_v8, %v352_v7  ;;  %v6260_v20 = vpack.c.bf16 %v371_v13, %v370_v12 }
  0x5b   : > { %6251 = vmatpush3.bf16.msra.mxu0 %v6250_v54  ;;  %v403_v16 = vld [vmem:[%s7810_s17 + $0x1e8] sm:$0xff]  ;;  %v354_v18 = vld [vmem:[%s7810_s17 + $0x60] sm:$0xff]  ;;  %v6290_v19 = vpack.c.bf16 %v385_v11, %v384_v9  ;;  %v372_v26 = vld [vmem:[%s7810_s17 + $0xf0] sm:$0xff] }
  0x5c   : > { %6283 = vmatpush3.bf16.msra.mxu1 %v6282_v55  ;;  %6253 = vmatprep.subr.bf16.mxu0 %v6252_v56  ;;  %v355_v21 = vld [vmem:[%s7810_s17 + $0x68] sm:$0xff]  ;;  %v386_v22 = vld [vmem:[%s7810_s17 + $0x160] sm:$0xff]  ;;  %v6292_v24 = vpack.c.bf16 %v403_v16, %v402_v15  ;;  %v373_v27 = vld [vmem:[%s7810_s17 + $0xf8] sm:$0xff] }
  0x5d   : > { %6285 = vmatprep.subr.bf16.mxu1 %v6284_v60  ;;  %v323_v23 = vld [vmem:[%s7834_s14] sm:$0xff]  ;;  %v387_v25 = vld [vmem:[%s7810_s17 + $0x168] sm:$0xff]  ;;  %v404_v30 = vld [vmem:[%s7810_s17 + $0x1f0] sm:$0xff]  ;;  %v6262_v32 = vpack.c.bf16 %v355_v21, %v354_v18  ;;  %v6264_v36 = vpack.c.bf16 %v373_v27, %v372_v26 }
  0x5e   : > { %v1584_v28 = vrot.slane %v323_v23, %v7896_v14  ;;  %v1577_v29 = vcombine.high %v323_v23, %v323_v23  ;;  %v405_v31 = vld [vmem:[%s7810_s17 + $0x1f8] sm:$0xff]  ;;  %v6294_v35 = vpack.c.bf16 %v387_v25, %v386_v22  ;;  %v356_v37 = vld [vmem:[%s7810_s17 + $0x70] sm:$0xff]  ;;  %v422_v43 = vld [vmem:[%s7810_s17 + $0x280] sm:$0xff] }
  0x5f   : > { %6255 = vmatpush3.bf16.msra.mxu0 %v6254_v4  ;;  %v357_v38 = vld [vmem:[%s7810_s17 + $0x78] sm:$0xff]  ;;  %v388_v39 = vld [vmem:[%s7810_s17 + $0x170] sm:$0xff]  ;;  %v6296_v40 = vpack.c.bf16 %v405_v31, %v404_v30  ;;  %v423_v44 = vld [vmem:[%s7810_s17 + $0x288] sm:$0xff] }
  0x60   : > { %6287 = vmatpush3.bf16.msra.mxu1 %v6286_v5  ;;  %6257 = vmatprep.subr.bf16.mxu0 %v6256_v6  ;;  %v1592_v33 = vcombine.high %v1584_v28, %v1584_v28  ;;  %v1591_v34 = vrot.slane %v1577_v29, %v7896_v14  ;;  %v389_v41 = vld [vmem:[%s7810_s17 + $0x178] sm:$0xff]  ;;  %v454_v45 = vld [vmem:[%s7810_s17 + $0x380] sm:$0xff]  ;;  %v455_v46 = vld [vmem:[%s7810_s17 + $0x388] sm:$0xff]  ;;  %v6266_v47 = vpack.c.bf16 %v357_v38, %v356_v37 }
  0x61   : > { %6289 = vmatprep.subr.bf16.mxu1 %v6288_v10  ;;  %v6298_v48 = vpack.c.bf16 %v389_v41, %v388_v39  ;;  %v6300_v49 = vpack.c.bf16 %v423_v44, %v422_v43  ;;  %v406_v50 = vld [vmem:[%s7810_s17 + $0x200] sm:$0xff]  ;;  %v407_v51 = vld [vmem:[%s7810_s17 + $0x208] sm:$0xff]  ;;  %v6332_v53 = vpack.c.bf16 %v455_v46, %v454_v45  ;;  %v424_v55 = vld [vmem:[%s7810_s17 + $0x290] sm:$0xff] }
  0x62   : > { %2040 = vmatprep.mubr.f32.mxu0 %v1592_v33  ;;  %v1593_v42 = vcombine.high %v1591_v34, %v1591_v34  ;;  %v438_v52 = vld [vmem:[%s7810_s17 + $0x300] sm:$0xff]  ;;  %v439_v54 = vld [vmem:[%s7810_s17 + $0x308] sm:$0xff]  ;;  %v425_v56 = vld [vmem:[%s7810_s17 + $0x298] sm:$0xff]  ;;  %v6302_v59 = vpack.c.bf16 %v407_v51, %v406_v50 }
  0x63   : > { %6259 = vmatpush3.bf16.msra.mxu0 %v6258_v17  ;;  %v456_v57 = vld [vmem:[%s7810_s17 + $0x390] sm:$0xff]  ;;  %v457_v58 = vld [vmem:[%s7810_s17 + $0x398] sm:$0xff]  ;;  %v6334_v60 = vpack.c.bf16 %v439_v54, %v438_v52  ;;  %v6304_v61 = vpack.c.bf16 %v425_v56, %v424_v55  ;;  %v426_v4 = vld [vmem:[%s7810_s17 + $0x2a0] sm:$0xff] }
  0x64   : > { %6291 = vmatpush3.bf16.msra.mxu1 %v6290_v19  ;;  %6261 = vmatprep.subr.bf16.mxu0 %v6260_v20  ;;  %v408_v62 = vld [vmem:[%s7810_s17 + $0x210] sm:$0xff]  ;;  %v409_v63 = vld [vmem:[%s7810_s17 + $0x218] sm:$0xff]  ;;  %v6336_v2 = vpack.c.bf16 %v457_v58, %v456_v57  ;;  %v427_v5 = vld [vmem:[%s7810_s17 + $0x2a8] sm:$0xff] }
  0x65   : > { %6293 = vmatprep.subr.bf16.mxu1 %v6292_v24  ;;  %2110 = vmatprep.mubr.f32.mxu1 %v1593_v42  ;;  %v440_v0 = vld [vmem:[%s7810_s17 + $0x310] sm:$0xff]  ;;  %v441_v3 = vld [vmem:[%s7810_s17 + $0x318] sm:$0xff]  ;;  %v458_v6 = vld [vmem:[%s7810_s17 + $0x3a0] sm:$0xff]  ;;  %v6306_v8 = vpack.c.bf16 %v409_v63, %v408_v62  ;;  %v6308_v10 = vpack.c.bf16 %v427_v5, %v426_v4 }
  0x66   : > { %v459_v7 = vld [vmem:[%s7810_s17 + $0x3a8] sm:$0xff]  ;;  %v6338_v9 = vpack.c.bf16 %v441_v3, %v440_v0  ;;  %v410_v11 = vld [vmem:[%s7810_s17 + $0x220] sm:$0xff]  ;;  %v428_v17 = vld [vmem:[%s7810_s17 + $0x2b0] sm:$0xff] }
  0x67   : > { %6263 = vmatpush3.bf16.msra.mxu0 %v6262_v32  ;;  %v411_v12 = vld [vmem:[%s7810_s17 + $0x228] sm:$0xff]  ;;  %v442_v13 = vld [vmem:[%s7810_s17 + $0x320] sm:$0xff]  ;;  %v6340_v15 = vpack.c.bf16 %v459_v7, %v458_v6  ;;  %v429_v18 = vld [vmem:[%s7810_s17 + $0x2b8] sm:$0xff] }
  0x68   : > { %6295 = vmatpush3.bf16.msra.mxu1 %v6294_v35  ;;  %6265 = vmatprep.subr.bf16.mxu0 %v6264_v36  ;;  %v443_v16 = vld [vmem:[%s7810_s17 + $0x328] sm:$0xff]  ;;  %v460_v19 = vld [vmem:[%s7810_s17 + $0x3b0] sm:$0xff]  ;;  %v461_v20 = vld [vmem:[%s7810_s17 + $0x3b8] sm:$0xff]  ;;  %v6310_v21 = vpack.c.bf16 %v411_v12, %v410_v11  ;;  %v6312_v23 = vpack.c.bf16 %v429_v18, %v428_v17 }
  0x69   : > { %6297 = vmatprep.subr.bf16.mxu1 %v6296_v40  ;;  %v6342_v22 = vpack.c.bf16 %v443_v16, %v442_v13  ;;  %v412_v24 = vld [vmem:[%s7810_s17 + $0x230] sm:$0xff]  ;;  %v413_v25 = vld [vmem:[%s7810_s17 + $0x238] sm:$0xff]  ;;  %v6344_v27 = vpack.c.bf16 %v461_v20, %v460_v19  ;;  %v430_v29 = vld [vmem:[%s7810_s17 + $0x2c0] sm:$0xff] }
  0x6a   : > { %v444_v26 = vld [vmem:[%s7810_s17 + $0x330] sm:$0xff]  ;;  %v431_v30 = vld [vmem:[%s7810_s17 + $0x2c8] sm:$0xff]  ;;  %v462_v31 = vld [vmem:[%s7810_s17 + $0x3c0] sm:$0xff] }
  0x6b   : > { %6267 = vmatpush3.bf16.msra.mxu0 %v6266_v47  ;;  %v463_v32 = vld [vmem:[%s7810_s17 + $0x3c8] sm:$0xff]  ;;  %v6316_v38 = vpack.c.bf16 %v431_v30, %v430_v29  ;;  %v414_v39 = vld [vmem:[%s7810_s17 + $0x240] sm:$0xff]  ;;  %v432_v44 = vld [vmem:[%s7810_s17 + $0x2d0] sm:$0xff] }
  0x6c   : > { %6299 = vmatpush3.bf16.msra.mxu1 %v6298_v48  ;;  %6301 = vmatprep.subr.bf16.mxu0 %v6300_v49  ;;  %v324_v33 = vld [vmem:[%s7834_s14 + $0x8] sm:$0xff]  ;;  %v6348_v42 = vpack.c.bf16 %v463_v32, %v462_v31  ;;  %v433_v45 = vld [vmem:[%s7810_s17 + $0x2d8] sm:$0xff]  ;;  %v464_v48 = vld [vmem:[%s7810_s17 + $0x3d0] sm:$0xff] }
  0x6d   : > { %6333 = vmatprep.subr.bf16.mxu1 %v6332_v53  ;;  %v7953_v35 = vrot.slane %v324_v33, %v7896_v14  ;;  %v1594_v36 = vcombine.high %v324_v33, %v324_v33  ;;  %v415_v40 = vld [vmem:[%s7810_s17 + $0x248] sm:$0xff]  ;;  %v446_v41 = vld [vmem:[%s7810_s17 + $0x340] sm:$0xff]  ;;  %v465_v49 = vld [vmem:[%s7810_s17 + $0x3d8] sm:$0xff]  ;;  %v6320_v53 = vpack.c.bf16 %v433_v45, %v432_v44 }
  0x6e   : > { %2041 = vmatmul.mubr.f32.vlgmr.msra.gmra.mrb[0].mxu0 %v1584_v28  ;;  %v445_v28 = vld [vmem:[%s7810_s17 + $0x338] sm:$0xff]  ;;  %v447_v43 = vld [vmem:[%s7810_s17 + $0x348] sm:$0xff]  ;;  %v6318_v50 = vpack.c.bf16 %v415_v40, %v414_v39  ;;  %v416_v54 = vld [vmem:[%s7810_s17 + $0x250] sm:$0xff]  ;;  %v6352_v57 = vpack.c.bf16 %v465_v49, %v464_v48 }
  0x6f   : > { %2111 = vmatmul.mubr.f32.vlgmr.msra.gmra.mrb[0].mxu1 %v1591_v34  ;;  %6303 = vmatpush3.bf16.msra.mxu0 %v6302_v59  ;;  %v6314_v34 = vpack.c.bf16 %v413_v25, %v412_v24  ;;  %v6346_v37 = vpack.c.bf16 %v445_v28, %v444_v26  ;;  %v1609_v46 = vcombine.high %v7953_v35, %v7953_v35  ;;  %v417_v55 = vld [vmem:[%s7810_s17 + $0x258] sm:$0xff]  ;;  %v448_v56 = vld [vmem:[%s7810_s17 + $0x350] sm:$0xff]  ;;  %v434_v59 = vld [vmem:[%s7810_s17 + $0x2e0] sm:$0xff] }
  0x70   : > { %6335 = vmatpush3.bf16.msra.mxu1 %v6334_v60  ;;  %6305 = vmatprep.subr.bf16.mxu0 %v6304_v61  ;;  %v7964_v47 = vrot.slane %v1594_v36, %v7896_v14  ;;  %v6350_v52 = vpack.c.bf16 %v447_v43, %v446_v41  ;;  %v449_v58 = vld [vmem:[%s7810_s17 + $0x358] sm:$0xff]  ;;  %v435_v60 = vld [vmem:[%s7810_s17 + $0x2e8] sm:$0xff]  ;;  %v466_v61 = vld [vmem:[%s7810_s17 + $0x3e0] sm:$0xff]  ;;  %v6322_v63 = vpack.c.bf16 %v417_v55, %v416_v54 }
  0x71   : > { %6337 = vmatprep.subr.bf16.mxu1 %v6336_v2  ;;  %2180 = vmatprep.mubr.f32.mxu0 %v1609_v46  ;;  %v467_v62 = vld [vmem:[%s7810_s17 + $0x3e8] sm:$0xff]  ;;  %v6354_v0 = vpack.c.bf16 %v449_v58, %v448_v56  ;;  %v6324_v2 = vpack.c.bf16 %v435_v60, %v434_v59  ;;  %v418_v3 = vld [vmem:[%s7810_s17 + $0x260] sm:$0xff]  ;;  %v469_v11 = vld [vmem:[%s7810_s17 + $0x3f8] sm:$0xff] }
  0x72   : > { %v1610_v51 = vcombine.high %v7964_v47, %v7964_v47  ;;  %v419_v4 = vld [vmem:[%s7810_s17 + $0x268] sm:$0xff]  ;;  %v450_v5 = vld [vmem:[%s7810_s17 + $0x360] sm:$0xff]  ;;  %v6356_v6 = vpack.c.bf16 %v467_v62, %v466_v61  ;;  %v420_v16 = vld [vmem:[%s7810_s17 + $0x270] sm:$0xff] }
  0x73   : > { %6307 = vmatpush3.bf16.msra.mxu0 %v6306_v8  ;;  %v451_v7 = vld [vmem:[%s7810_s17 + $0x368] sm:$0xff]  ;;  %v436_v8 = vld [vmem:[%s7810_s17 + $0x2f0] sm:$0xff]  ;;  %v6326_v12 = vpack.c.bf16 %v419_v4, %v418_v3  ;;  %v421_v17 = vld [vmem:[%s7810_s17 + $0x278] sm:$0xff] }
  0x74   : > { %6339 = vmatpush3.bf16.msra.mxu1 %v6338_v9  ;;  %6309 = vmatprep.subr.bf16.mxu0 %v6308_v10  ;;  %v437_v9 = vld [vmem:[%s7810_s17 + $0x2f8] sm:$0xff]  ;;  %v468_v10 = vld [vmem:[%s7810_s17 + $0x3f0] sm:$0xff]  ;;  %v6358_v13 = vpack.c.bf16 %v451_v7, %v450_v5  ;;  %v519_v24 = vld [vmem:[%s7810_s17 + $0x588] sm:$0xff]  ;;  %v6330_v25 = vpack.c.bf16 %v421_v17, %v420_v16 }
  0x75   : > { %6341 = vmatprep.subr.bf16.mxu1 %v6340_v15  ;;  %2250 = vmatprep.mubr.f32.mxu1 %v1610_v51  ;;  %v6328_v15 = vpack.c.bf16 %v437_v9, %v436_v8  ;;  %v452_v18 = vld [vmem:[%s7810_s17 + $0x370] sm:$0xff]  ;;  %v6360_v19 = vpack.c.bf16 %v469_v11, %v468_v10  ;;  %v453_v20 = vld [vmem:[%s7810_s17 + $0x378] sm:$0xff]  ;;  %v470_v26 = vld [vmem:[%s7810_s17 + $0x400] sm:$0xff] }
  0x76   : > { %v471_v29 = vld [vmem:[%s7810_s17 + $0x408] sm:$0xff]  ;;  %v502_v30 = vld [vmem:[%s7810_s17 + $0x500] sm:$0xff]  ;;  %v488_v33 = vld [vmem:[%s7810_s17 + $0x490] sm:$0xff] }
  0x77   : > { %6311 = vmatpush3.bf16.msra.mxu0 %v6310_v21  ;;  %v486_v21 = vld [vmem:[%s7810_s17 + $0x480] sm:$0xff]  ;;  %v503_v31 = vld [vmem:[%s7810_s17 + $0x508] sm:$0xff]  ;;  %v520_v36 = vld [vmem:[%s7810_s17 + $0x590] sm:$0xff] }
  0x78   : > { %6343 = vmatpush3.bf16.msra.mxu1 %v6342_v22  ;;  %6313 = vmatprep.subr.bf16.mxu0 %v6312_v23  ;;  %v487_v22 = vld [vmem:[%s7810_s17 + $0x488] sm:$0xff]  ;;  %v518_v23 = vld [vmem:[%s7810_s17 + $0x580] sm:$0xff]  ;;  %v6398_v39 = vpack.c.bf16 %v503_v31, %v502_v30  ;;  %v473_v43 = vld [vmem:[%s7810_s17 + $0x418] sm:$0xff] }
  0x79   : > { %6345 = vmatprep.subr.bf16.mxu1 %v6344_v27  ;;  %v6362_v27 = vpack.c.bf16 %v453_v20, %v452_v18  ;;  %v6364_v28 = vpack.c.bf16 %v487_v22, %v486_v21  ;;  %v6396_v32 = vpack.c.bf16 %v519_v24, %v518_v23  ;;  %v325_v40 = vld [vmem:[%s7834_s14 + $0x10] sm:$0xff]  ;;  %v505_v49 = vld [vmem:[%s7810_s17 + $0x518] sm:$0xff]  ;;  %v474_v58 = vld [vmem:[%s7810_s17 + $0x420] sm:$0xff] }
  0x7a   : > { %v504_v44 = vld [vmem:[%s7810_s17 + $0x510] sm:$0xff]  ;;  %v8007_v45 = vrot.slane %v325_v40, %v7896_v14  ;;  %v1611_v46 = vcombine.high %v325_v40, %v325_v40  ;;  %v491_v51 = vld [vmem:[%s7810_s17 + $0x4a8] sm:$0xff]  ;;  %v506_v60 = vld [vmem:[%s7810_s17 + $0x520] sm:$0xff] }
  0x7b   : > { %6315 = vmatpush3.bf16.msra.mxu0 %v6314_v34  ;;  %v489_v34 = vld [vmem:[%s7810_s17 + $0x498] sm:$0xff]  ;;  %v475_v59 = vld [vmem:[%s7810_s17 + $0x428] sm:$0xff]  ;;  %v476_v7 = vld [vmem:[%s7810_s17 + $0x430] sm:$0xff] }
  0x7c   : > { %6347 = vmatpush3.bf16.msra.mxu1 %v6346_v37  ;;  %6317 = vmatprep.subr.bf16.mxu0 %v6316_v38  ;;  %v521_v37 = vld [vmem:[%s7810_s17 + $0x598] sm:$0xff]  ;;  %v6366_v38 = vpack.c.bf16 %v471_v29, %v470_v26  ;;  %v6368_v41 = vpack.c.bf16 %v489_v34, %v488_v33  ;;  %v1626_v54 = vcombine.high %v8007_v45, %v8007_v45  ;;  %v508_v9 = vld [vmem:[%s7810_s17 + $0x530] sm:$0xff]  ;;  %v527_v16 = vld [vmem:[%s7810_s17 + $0x5c8] sm:$0xff] }
  0x7d   : > { %6349 = vmatprep.subr.bf16.mxu1 %v6348_v42  ;;  %v472_v42 = vld [vmem:[%s7810_s17 + $0x410] sm:$0xff]  ;;  %v6400_v48 = vpack.c.bf16 %v521_v37, %v520_v36  ;;  %v8018_v55 = vrot.slane %v1611_v46, %v7896_v14  ;;  %v525_v3 = vld [vmem:[%s7810_s17 + $0x5b8] sm:$0xff]  ;;  %v6374_v4 = vpack.c.bf16 %v475_v59, %v474_v58  ;;  %v478_v20 = vld [vmem:[%s7810_s17 + $0x440] sm:$0xff] }
  0x7e   : > { %v6370_v56 = vpack.c.bf16 %v473_v43, %v472_v42  ;;  %v477_v8 = vld [vmem:[%s7810_s17 + $0x438] sm:$0xff]  ;;  %v479_v21 = vld [vmem:[%s7810_s17 + $0x448] sm:$0xff]  ;;  %v510_v22 = vld [vmem:[%s7810_s17 + $0x540] sm:$0xff] }
  0x7f   : > { %6319 = vmatpush3.bf16.msra.mxu0 %v6318_v50  ;;  %v490_v50 = vld [vmem:[%s7810_s17 + $0x4a0] sm:$0xff]  ;;  %v1627_v61 = vcombine.high %v8018_v55, %v8018_v55  ;;  %v509_v11 = vld [vmem:[%s7810_s17 + $0x538] sm:$0xff]  ;;  %v6378_v17 = vpack.c.bf16 %v477_v8, %v476_v7  ;;  %v511_v24 = vld [vmem:[%s7810_s17 + $0x548] sm:$0xff]  ;;  %v6382_v29 = vpack.c.bf16 %v479_v21, %v478_v20 }
  0x80   : > { %6351 = vmatpush3.bf16.msra.mxu1 %v6350_v52  ;;  %6321 = vmatprep.subr.bf16.mxu0 %v6320_v53  ;;  %v522_v52 = vld [vmem:[%s7810_s17 + $0x5a0] sm:$0xff]  ;;  %v523_v53 = vld [vmem:[%s7810_s17 + $0x5a8] sm:$0xff]  ;;  %v6410_v18 = vpack.c.bf16 %v509_v11, %v508_v9  ;;  %v497_v26 = vld [vmem:[%s7810_s17 + $0x4d8] sm:$0xff]  ;;  %v6414_v30 = vpack.c.bf16 %v511_v24, %v510_v22 }
  0x81   : > { %6353 = vmatprep.subr.bf16.mxu1 %v6352_v57  ;;  %v6372_v57 = vpack.c.bf16 %v491_v51, %v490_v50  ;;  %v6404_v62 = vpack.c.bf16 %v523_v53, %v522_v52  ;;  %v481_v33 = vld [vmem:[%s7810_s17 + $0x458] sm:$0xff]  ;;  %v512_v34 = vld [vmem:[%s7810_s17 + $0x550] sm:$0xff]  ;;  %v530_v40 = vld [vmem:[%s7810_s17 + $0x5e0] sm:$0xff] }
  0x82   : > { %v513_v37 = vld [vmem:[%s7810_s17 + $0x558] sm:$0xff]  ;;  %v482_v46 = vld [vmem:[%s7810_s17 + $0x460] sm:$0xff]  ;;  %v515_v51 = vld [vmem:[%s7810_s17 + $0x568] sm:$0xff] }
  0x83   : > { %6323 = vmatpush3.bf16.msra.mxu0 %v6322_v63  ;;  %v507_v63 = vld [vmem:[%s7810_s17 + $0x528] sm:$0xff]  ;;  %v6418_v43 = vpack.c.bf16 %v513_v37, %v512_v34  ;;  %v500_v52 = vld [vmem:[%s7810_s17 + $0x4f0] sm:$0xff]  ;;  %v501_v53 = vld [vmem:[%s7810_s17 + $0x4f8] sm:$0xff] }
  0x84   : > { %6355 = vmatpush3.bf16.msra.mxu1 %v6354_v0  ;;  %6325 = vmatprep.subr.bf16.mxu0 %v6324_v2  ;;  %v493_v0 = vld [vmem:[%s7810_s17 + $0x4b8] sm:$0xff]  ;;  %v524_v2 = vld [vmem:[%s7810_s17 + $0x5b0] sm:$0xff]  ;;  %v6406_v5 = vpack.c.bf16 %v507_v63, %v506_v60  ;;  %v6392_v59 = vpack.c.bf16 %v501_v53, %v500_v52  ;;  %v534_v9 = vld [vmem:[%s7810_s17 + $0x600] sm:$0xff] }
  0x85   : > { %6357 = vmatprep.subr.bf16.mxu1 %v6356_v6  ;;  %v6408_v10 = vpack.c.bf16 %v525_v3, %v524_v2  ;;  %v484_v60 = vld [vmem:[%s7810_s17 + $0x470] sm:$0xff]  ;;  %v551_v2 = vld [vmem:[%s7810_s17 + $0x688] sm:$0xff]  ;;  %v582_v3 = vld [vmem:[%s7810_s17 + $0x780] sm:$0xff] }
  0x86   : > { %v566_v11 = vld [vmem:[%s7810_s17 + $0x700] sm:$0xff]  ;;  %v536_v24 = vld [vmem:[%s7810_s17 + $0x610] sm:$0xff]  ;;  %v541_v52 = vld [vmem:[%s7810_s17 + $0x638] sm:$0xff] }
  0x87   : > { %6327 = vmatpush3.bf16.msra.mxu0 %v6326_v12  ;;  %v494_v12 = vld [vmem:[%s7810_s17 + $0x4c0] sm:$0xff]  ;;  %v572_v53 = vld [vmem:[%s7810_s17 + $0x730] sm:$0xff] }
  0x88   : > { %6359 = vmatpush3.bf16.msra.mxu1 %v6358_v13  ;;  %6329 = vmatprep.subr.bf16.mxu0 %v6328_v15  ;;  %v495_v13 = vld [vmem:[%s7810_s17 + $0x4c8] sm:$0xff]  ;;  %v526_v15 = vld [vmem:[%s7810_s17 + $0x5c0] sm:$0xff] }
  0x89   : > { %6361 = vmatprep.subr.bf16.mxu1 %v6360_v19  ;;  %v6380_v19 = vpack.c.bf16 %v495_v13, %v494_v12  ;;  %v6412_v23 = vpack.c.bf16 %v527_v16, %v526_v15  ;;  %v567_v13 = vld [vmem:[%s7810_s17 + $0x708] sm:$0xff]  ;;  %v552_v15 = vld [vmem:[%s7810_s17 + $0x690] sm:$0xff]  ;;  %v553_v16 = vld [vmem:[%s7810_s17 + $0x698] sm:$0xff] }
  0x8a   : > { %v6462_v22 = vpack.c.bf16 %v567_v13, %v566_v11  ;;  %v544_v11 = vld [vmem:[%s7810_s17 + $0x650] sm:$0xff] }
  0x8b   : > { %6331 = vmatpush3.bf16.msra.mxu0 %v6330_v25  ;;  %v496_v25 = vld [vmem:[%s7810_s17 + $0x4d0] sm:$0xff] }
  0x8c   : > { %6363 = vmatpush3.bf16.msra.mxu1 %v6362_v27  ;;  %6365 = vmatprep.subr.bf16.mxu0 %v6364_v28  ;;  %v528_v27 = vld [vmem:[%s7810_s17 + $0x5d0] sm:$0xff]  ;;  %v529_v28 = vld [vmem:[%s7810_s17 + $0x5d8] sm:$0xff]  ;;  %v6384_v31 = vpack.c.bf16 %v497_v26, %v496_v25 }
  0x8d   : > { %6397 = vmatprep.subr.bf16.mxu1 %v6396_v32  ;;  %v480_v32 = vld [vmem:[%s7810_s17 + $0x450] sm:$0xff]  ;;  %v6416_v36 = vpack.c.bf16 %v529_v28, %v528_v27  ;;  %v537_v25 = vld [vmem:[%s7810_s17 + $0x618] sm:$0xff] }
  0x8e   : > { %2181 = vmatmul.mubr.f32.vlgmr.msra.gmra.mrb[2].mxu0 %v7953_v35  ;;  %v6402_v35 = vpack.c.bf16 %v505_v49, %v504_v44  ;;  %v6386_v42 = vpack.c.bf16 %v481_v33, %v480_v32  ;;  %v514_v49 = vld [vmem:[%s7810_s17 + $0x560] sm:$0xff]  ;;  %v568_v26 = vld [vmem:[%s7810_s17 + $0x710] sm:$0xff]  ;;  %v569_v28 = vld [vmem:[%s7810_s17 + $0x718] sm:$0xff] }
  0x8f   : > { %6367 = vmatpush3.bf16.msra.mxu0 %v6366_v38  ;;  %2251 = vmatmul.mubr.f32.vlgmr.msra.gmra.mrb[2].mxu1 %v7964_v47  ;;  %v492_v47 = vld [vmem:[%s7810_s17 + $0x4b0] sm:$0xff]  ;;  %v498_v38 = vld [vmem:[%s7810_s17 + $0x4e0] sm:$0xff]  ;;  %v6422_v58 = vpack.c.bf16 %v515_v51, %v514_v49  ;;  %v587_v33 = vld [vmem:[%s7810_s17 + $0x7a8] sm:$0xff]  ;;  %v6466_v37 = vpack.c.bf16 %v569_v28, %v568_v26 }
  0x90   : > { %6399 = vmatpush3.bf16.msra.mxu1 %v6398_v39  ;;  %6369 = vmatprep.subr.bf16.mxu0 %v6368_v41  ;;  %v6376_v6 = vpack.c.bf16 %v493_v0, %v492_v47  ;;  %v499_v39 = vld [vmem:[%s7810_s17 + $0x4e8] sm:$0xff]  ;;  %v517_v47 = vld [vmem:[%s7810_s17 + $0x578] sm:$0xff]  ;;  %v550_v0 = vld [vmem:[%s7810_s17 + $0x680] sm:$0xff] }
  0x91   : > { %6401 = vmatprep.subr.bf16.mxu1 %v6400_v48  ;;  %2320 = vmatprep.mubr.f32.mxu0 %v1626_v54  ;;  %v531_v41 = vld [vmem:[%s7810_s17 + $0x5e8] sm:$0xff]  ;;  %v6388_v44 = vpack.c.bf16 %v499_v39, %v498_v38  ;;  %v532_v54 = vld [vmem:[%s7810_s17 + $0x5f0] sm:$0xff]  ;;  %v6428_v8 = vpack.c.bf16 %v551_v2, %v550_v0  ;;  %v586_v32 = vld [vmem:[%s7810_s17 + $0x7a0] sm:$0xff] }
  0x92   : > { %2390 = vmatprep.mubr.f32.mxu1 %v1627_v61  ;;  %v483_v48 = vld [vmem:[%s7810_s17 + $0x468] sm:$0xff]  ;;  %v6420_v50 = vpack.c.bf16 %v531_v41, %v530_v40  ;;  %v485_v61 = vld [vmem:[%s7810_s17 + $0x478] sm:$0xff]  ;;  %v538_v39 = vld [vmem:[%s7810_s17 + $0x620] sm:$0xff]  ;;  %v6468_v41 = vpack.c.bf16 %v587_v33, %v586_v32 }
  0x93   : > { %6371 = vmatpush3.bf16.msra.mxu0 %v6370_v56  ;;  %v533_v56 = vld [vmem:[%s7810_s17 + $0x5f8] sm:$0xff]  ;;  %v570_v40 = vld [vmem:[%s7810_s17 + $0x720] sm:$0xff]  ;;  %v540_v51 = vld [vmem:[%s7810_s17 + $0x630] sm:$0xff] }
  0x94   : > { %6403 = vmatpush3.bf16.msra.mxu1 %v6402_v35  ;;  %6373 = vmatprep.subr.bf16.mxu0 %v6372_v57  ;;  %v6390_v35 = vpack.c.bf16 %v483_v48, %v482_v46  ;;  %v326_v57 = vld [vmem:[%s7834_s14 + $0x18] sm:$0xff]  ;;  %v6424_v63 = vpack.c.bf16 %v533_v56, %v532_v54  ;;  %v574_v0 = vld [vmem:[%s7810_s17 + $0x740] sm:$0xff] }
  0x95   : > { %6405 = vmatprep.subr.bf16.mxu1 %v6404_v62  ;;  %v516_v62 = vld [vmem:[%s7810_s17 + $0x570] sm:$0xff]  ;;  %v589_v46 = vld [vmem:[%s7810_s17 + $0x7b8] sm:$0xff]  ;;  %v546_v26 = vld [vmem:[%s7810_s17 + $0x660] sm:$0xff] }
  0x96   : > { %v6426_v7 = vpack.c.bf16 %v517_v47, %v516_v62  ;;  %v573_v56 = vld [vmem:[%s7810_s17 + $0x738] sm:$0xff]  ;;  %v543_v47 = vld [vmem:[%s7810_s17 + $0x648] sm:$0xff]  ;;  %v576_v13 = vld [vmem:[%s7810_s17 + $0x750] sm:$0xff] }
  0x97   : > { %6375 = vmatpush3.bf16.msra.mxu0 %v6374_v4  ;;  %v583_v4 = vld [vmem:[%s7810_s17 + $0x788] sm:$0xff]  ;;  %v578_v28 = vld [vmem:[%s7810_s17 + $0x760] sm:$0xff]  ;;  %v565_v32 = vld [vmem:[%s7810_s17 + $0x6f8] sm:$0xff] }
  0x98   : > { %6407 = vmatpush3.bf16.msra.mxu1 %v6406_v5  ;;  %6377 = vmatprep.subr.bf16.mxu0 %v6376_v6  ;;  %v1628_v5 = vcombine.high %v326_v57, %v326_v57  ;;  %v6394_v6 = vpack.c.bf16 %v485_v61, %v484_v60  ;;  %v6460_v12 = vpack.c.bf16 %v583_v4, %v582_v3  ;;  %v575_v3 = vld [vmem:[%s7810_s17 + $0x748] sm:$0xff]  ;;  %v560_v4 = vld [vmem:[%s7810_s17 + $0x6d0] sm:$0xff] }
  0x99   : > { %6409 = vmatprep.subr.bf16.mxu1 %v6408_v10  ;;  %v535_v10 = vld [vmem:[%s7810_s17 + $0x608] sm:$0xff]  ;;  %v6442_v60 = vpack.c.bf16 %v541_v52, %v540_v51  ;;  %v6474_v61 = vpack.c.bf16 %v573_v56, %v572_v53  ;;  %v596_v33 = vld [vmem:[%s7810_s17 + $0x7f0] sm:$0xff]  ;;  %v598_v53 = vld [vmem:[%s7810_s17 + $0x800] sm:$0xff] }
  0x9a   : > { %v8084_v20 = vrot.slane %v1628_v5, %v7896_v14  ;;  %v6430_v21 = vpack.c.bf16 %v535_v10, %v534_v9  ;;  %v561_v5 = vld [vmem:[%s7810_s17 + $0x6d8] sm:$0xff]  ;;  %v6478_v9 = vpack.c.bf16 %v575_v3, %v574_v0  ;;  %v630_v56 = vld [vmem:[%s7810_s17 + $0x900] sm:$0xff]  ;;  %v600_v3 = vld [vmem:[%s7810_s17 + $0x810] sm:$0xff] }
  0x9b   : > { %6379 = vmatpush3.bf16.msra.mxu0 %v6378_v17  ;;  %v8079_v17 = vrot.slane %v326_v57, %v7896_v14  ;;  %v559_v57 = vld [vmem:[%s7810_s17 + $0x6c8] sm:$0xff]  ;;  %v6448_v10 = vpack.c.bf16 %v561_v5, %v560_v4  ;;  %v601_v4 = vld [vmem:[%s7810_s17 + $0x818] sm:$0xff]  ;;  %v632_v5 = vld [vmem:[%s7810_s17 + $0x910] sm:$0xff] }
  0x9c   : > { %6411 = vmatpush3.bf16.msra.mxu1 %v6410_v18  ;;  %6381 = vmatprep.subr.bf16.mxu0 %v6380_v19  ;;  %v584_v18 = vld [vmem:[%s7810_s17 + $0x790] sm:$0xff]  ;;  %v585_v19 = vld [vmem:[%s7810_s17 + $0x798] sm:$0xff]  ;;  %v1644_v34 = vcombine.high %v8084_v20, %v8084_v20 }
  0x9d   : > { %6413 = vmatprep.subr.bf16.mxu1 %v6412_v23  ;;  %v6432_v23 = vpack.c.bf16 %v553_v16, %v552_v15  ;;  %v6464_v27 = vpack.c.bf16 %v585_v19, %v584_v18  ;;  %v577_v16 = vld [vmem:[%s7810_s17 + $0x758] sm:$0xff]  ;;  %v562_v18 = vld [vmem:[%s7810_s17 + $0x6e0] sm:$0xff]  ;;  %v563_v19 = vld [vmem:[%s7810_s17 + $0x6e8] sm:$0xff] }
  0x9f   : > { %6383 = vmatpush3.bf16.msra.mxu0 %v6382_v29  ;;  %v554_v29 = vld [vmem:[%s7810_s17 + $0x6a0] sm:$0xff] }
  0xa0   : > { %6415 = vmatpush3.bf16.msra.mxu1 %v6414_v30  ;;  %6385 = vmatprep.subr.bf16.mxu0 %v6384_v31  ;;  %v555_v30 = vld [vmem:[%s7810_s17 + $0x6a8] sm:$0xff]  ;;  %v1643_v31 = vcombine.high %v8079_v17, %v8079_v17 }
  0xa1   : > { %6417 = vmatprep.subr.bf16.mxu1 %v6416_v36  ;;  %v6434_v36 = vpack.c.bf16 %v537_v25, %v536_v24  ;;  %v6436_v38 = vpack.c.bf16 %v555_v30, %v554_v29  ;;  %v6482_v24 = vpack.c.bf16 %v577_v16, %v576_v13  ;;  %v6452_v25 = vpack.c.bf16 %v563_v19, %v562_v18  ;;  %v579_v30 = vld [vmem:[%s7810_s17 + $0x768] sm:$0xff]  ;;  %v602_v19 = vld [vmem:[%s7810_s17 + $0x820] sm:$0xff] }
  0xa3   : > { %6387 = vmatpush3.bf16.msra.mxu0 %v6386_v42  ;;  %v571_v42 = vld [vmem:[%s7810_s17 + $0x728] sm:$0xff] }
  0xa4   : > { %6419 = vmatpush3.bf16.msra.mxu1 %v6418_v43  ;;  %6389 = vmatprep.subr.bf16.mxu0 %v6388_v44  ;;  %v556_v43 = vld [vmem:[%s7810_s17 + $0x6b0] sm:$0xff]  ;;  %v557_v44 = vld [vmem:[%s7810_s17 + $0x6b8] sm:$0xff]  ;;  %v6470_v49 = vpack.c.bf16 %v571_v42, %v570_v40 }
  0xa5   : > { %6421 = vmatprep.subr.bf16.mxu1 %v6420_v50  ;;  %v6440_v50 = vpack.c.bf16 %v557_v44, %v556_v43  ;;  %v549_v40 = vld [vmem:[%s7810_s17 + $0x678] sm:$0xff]  ;;  %v614_v44 = vld [vmem:[%s7810_s17 + $0x880] sm:$0xff] }
  0xa6   : > { %v581_v43 = vld [vmem:[%s7810_s17 + $0x778] sm:$0xff] }
  0xa7   : > { %6391 = vmatpush3.bf16.msra.mxu0 %v6390_v35  ;;  %v558_v35 = vld [vmem:[%s7810_s17 + $0x6c0] sm:$0xff] }
  0xa8   : > { %6423 = vmatpush3.bf16.msra.mxu1 %v6422_v58  ;;  %6393 = vmatprep.subr.bf16.mxu0 %v6392_v59  ;;  %v590_v58 = vld [vmem:[%s7810_s17 + $0x7c0] sm:$0xff]  ;;  %v591_v59 = vld [vmem:[%s7810_s17 + $0x7c8] sm:$0xff]  ;;  %v6444_v62 = vpack.c.bf16 %v559_v57, %v558_v35 }
  0xa9   : > { %6425 = vmatprep.subr.bf16.mxu1 %v6424_v63  ;;  %v542_v63 = vld [vmem:[%s7810_s17 + $0x640] sm:$0xff]  ;;  %v6476_v2 = vpack.c.bf16 %v591_v59, %v590_v58  ;;  %v631_v57 = vld [vmem:[%s7810_s17 + $0x908] sm:$0xff]  ;;  %v616_v58 = vld [vmem:[%s7810_s17 + $0x890] sm:$0xff] }
  0xaa   : > { %v617_v59 = vld [vmem:[%s7810_s17 + $0x898] sm:$0xff]  ;;  %v6526_v0 = vpack.c.bf16 %v631_v57, %v630_v56  ;;  %v608_v56 = vld [vmem:[%s7810_s17 + $0x850] sm:$0xff] }
  0xab   : > { %6395 = vmatpush3.bf16.msra.mxu0 %v6394_v6  ;;  %v592_v6 = vld [vmem:[%s7810_s17 + $0x7d0] sm:$0xff] }
  0xac   : > { %6427 = vmatpush3.bf16.msra.mxu1 %v6426_v7  ;;  %6429 = vmatprep.subr.bf16.mxu0 %v6428_v8  ;;  %v593_v7 = vld [vmem:[%s7810_s17 + $0x7d8] sm:$0xff]  ;;  %v6446_v8 = vpack.c.bf16 %v543_v47, %v542_v63  ;;  %v640_v57 = vld [vmem:[%s7810_s17 + $0x950] sm:$0xff] }
  0xad   : > { %6461 = vmatprep.subr.bf16.mxu1 %v6460_v12  ;;  %v545_v12 = vld [vmem:[%s7810_s17 + $0x658] sm:$0xff]  ;;  %v6480_v15 = vpack.c.bf16 %v593_v7, %v592_v6 }
  0xae   : > { %2321 = vmatmul.mubr.f32.vlgmr.msra.gmra.mrb[4].mxu0 %v8007_v45  ;;  %v539_v45 = vld [vmem:[%s7810_s17 + $0x628] sm:$0xff]  ;;  %v633_v7 = vld [vmem:[%s7810_s17 + $0x918] sm:$0xff] }
  0xaf   : > { %6431 = vmatpush3.bf16.msra.mxu0 %v6430_v21  ;;  %2391 = vmatmul.mubr.f32.vlgmr.msra.gmra.mrb[4].mxu1 %v8018_v55  ;;  %v588_v55 = vld [vmem:[%s7810_s17 + $0x7b0] sm:$0xff]  ;;  %v6438_v48 = vpack.c.bf16 %v539_v45, %v538_v39  ;;  %v594_v21 = vld [vmem:[%s7810_s17 + $0x7e0] sm:$0xff]  ;;  %v6530_v16 = vpack.c.bf16 %v633_v7, %v632_v5 }
  0xb0   : > { %6463 = vmatpush3.bf16.msra.mxu1 %v6462_v22  ;;  %6433 = vmatprep.subr.bf16.mxu0 %v6432_v23  ;;  %v6472_v54 = vpack.c.bf16 %v589_v46, %v588_v55  ;;  %v595_v22 = vld [vmem:[%s7810_s17 + $0x7e8] sm:$0xff]  ;;  %v6450_v23 = vpack.c.bf16 %v545_v12, %v544_v11  ;;  %v548_v45 = vld [vmem:[%s7810_s17 + $0x670] sm:$0xff]  ;;  %v646_v46 = vld [vmem:[%s7810_s17 + $0x980] sm:$0xff] }
  0xb1   : > { %6465 = vmatprep.subr.bf16.mxu1 %v6464_v27  ;;  %2460 = vmatprep.mubr.f32.mxu0 %v1643_v31  ;;  %v547_v27 = vld [vmem:[%s7810_s17 + $0x668] sm:$0xff]  ;;  %v6484_v29 = vpack.c.bf16 %v595_v22, %v594_v21  ;;  %v564_v31 = vld [vmem:[%s7810_s17 + $0x6f0] sm:$0xff]  ;;  %v650_v11 = vld [vmem:[%s7810_s17 + $0x9a0] sm:$0xff] }
  0xb2   : > { %2530 = vmatprep.mubr.f32.mxu1 %v1644_v34  ;;  %v597_v34 = vld [vmem:[%s7810_s17 + $0x7f8] sm:$0xff]  ;;  %v6456_v39 = vpack.c.bf16 %v565_v32, %v564_v31  ;;  %v615_v55 = vld [vmem:[%s7810_s17 + $0x888] sm:$0xff]  ;;  %v634_v21 = vld [vmem:[%s7810_s17 + $0x920] sm:$0xff] }
  0xb3   : > { %6435 = vmatpush3.bf16.msra.mxu0 %v6434_v36  ;;  %v6454_v36 = vpack.c.bf16 %v547_v27, %v546_v26  ;;  %v6488_v42 = vpack.c.bf16 %v597_v34, %v596_v33  ;;  %v6492_v52 = vpack.c.bf16 %v615_v55, %v614_v44  ;;  %v651_v12 = vld [vmem:[%s7810_s17 + $0x9a8] sm:$0xff]  ;;  %v653_v26 = vld [vmem:[%s7810_s17 + $0x9b8] sm:$0xff]  ;;  %v636_v32 = vld [vmem:[%s7810_s17 + $0x930] sm:$0xff] }
  0xb4   : > { %6467 = vmatpush3.bf16.msra.mxu1 %v6466_v37  ;;  %6437 = vmatprep.subr.bf16.mxu0 %v6436_v38  ;;  %v327_v37 = vld [vmem:[%s7834_s14 + $0x20] sm:$0xff]  ;;  %v6486_v38 = vpack.c.bf16 %v579_v30, %v578_v28  ;;  %v6532_v22 = vpack.c.bf16 %v651_v12, %v650_v11  ;;  %v604_v30 = vld [vmem:[%s7810_s17 + $0x830] sm:$0xff] }
  0xb5   : > { %6469 = vmatprep.subr.bf16.mxu1 %v6468_v41  ;;  %v580_v41 = vld [vmem:[%s7810_s17 + $0x770] sm:$0xff]  ;;  %v605_v31 = vld [vmem:[%s7810_s17 + $0x838] sm:$0xff]  ;;  %v638_v44 = vld [vmem:[%s7810_s17 + $0x940] sm:$0xff] }
  0xb6   : > { %v6490_v51 = vpack.c.bf16 %v581_v43, %v580_v41  ;;  %v637_v34 = vld [vmem:[%s7810_s17 + $0x938] sm:$0xff]  ;;  %v607_v43 = vld [vmem:[%s7810_s17 + $0x848] sm:$0xff]  ;;  %v610_v5 = vld [vmem:[%s7810_s17 + $0x860] sm:$0xff] }
  0xb7   : > { %6439 = vmatpush3.bf16.msra.mxu0 %v6438_v48  ;;  %v647_v48 = vld [vmem:[%s7810_s17 + $0x988] sm:$0xff]  ;;  %v642_v7 = vld [vmem:[%s7810_s17 + $0x960] sm:$0xff]  ;;  %v629_v11 = vld [vmem:[%s7810_s17 + $0x8f8] sm:$0xff] }
  0xb8   : > { %6471 = vmatpush3.bf16.msra.mxu1 %v6470_v49  ;;  %6441 = vmatprep.subr.bf16.mxu0 %v6440_v50  ;;  %v1645_v49 = vcombine.high %v327_v37, %v327_v37  ;;  %v6458_v50 = vpack.c.bf16 %v549_v40, %v548_v45  ;;  %v6524_v35 = vpack.c.bf16 %v647_v48, %v646_v46  ;;  %v639_v46 = vld [vmem:[%s7810_s17 + $0x948] sm:$0xff]  ;;  %v624_v48 = vld [vmem:[%s7810_s17 + $0x8d0] sm:$0xff] }
  0xb9   : > { %6473 = vmatprep.subr.bf16.mxu1 %v6472_v54  ;;  %v599_v54 = vld [vmem:[%s7810_s17 + $0x808] sm:$0xff]  ;;  %v6506_v45 = vpack.c.bf16 %v605_v31, %v604_v30  ;;  %v6538_v40 = vpack.c.bf16 %v637_v34, %v636_v32  ;;  %v660_v12 = vld [vmem:[%s7810_s17 + $0x9f0] sm:$0xff]  ;;  %v662_v32 = vld [vmem:[%s7810_s17 + $0xa00] sm:$0xff] }
  0xba   : > { %v8161_v63 = vrot.slane %v1645_v49, %v7896_v14  ;;  %v6494_v47 = vpack.c.bf16 %v599_v54, %v598_v53  ;;  %v625_v49 = vld [vmem:[%s7810_s17 + $0x8d8] sm:$0xff]  ;;  %v6542_v53 = vpack.c.bf16 %v639_v46, %v638_v44  ;;  %v694_v34 = vld [vmem:[%s7810_s17 + $0xb00] sm:$0xff]  ;;  %v664_v46 = vld [vmem:[%s7810_s17 + $0xa10] sm:$0xff] }
  0xbb   : > { %6443 = vmatpush3.bf16.msra.mxu0 %v6442_v60  ;;  %v8156_v60 = vrot.slane %v327_v37, %v7896_v14  ;;  %v623_v37 = vld [vmem:[%s7810_s17 + $0x8c8] sm:$0xff]  ;;  %v6512_v54 = vpack.c.bf16 %v625_v49, %v624_v48  ;;  %v665_v48 = vld [vmem:[%s7810_s17 + $0xa18] sm:$0xff]  ;;  %v696_v49 = vld [vmem:[%s7810_s17 + $0xb10] sm:$0xff] }
  0xbc   : > { %6475 = vmatpush3.bf16.msra.mxu1 %v6474_v61  ;;  %6445 = vmatprep.subr.bf16.mxu0 %v6444_v62  ;;  %v648_v61 = vld [vmem:[%s7810_s17 + $0x990] sm:$0xff]  ;;  %v649_v62 = vld [vmem:[%s7810_s17 + $0x998] sm:$0xff]  ;;  %v1661_v13 = vcombine.high %v8161_v63, %v8161_v63 }
  0xbd   : > { %6477 = vmatprep.subr.bf16.mxu1 %v6476_v2  ;;  %v6496_v2 = vpack.c.bf16 %v617_v59, %v616_v58  ;;  %v6528_v6 = vpack.c.bf16 %v649_v62, %v648_v61  ;;  %v641_v59 = vld [vmem:[%s7810_s17 + $0x958] sm:$0xff]  ;;  %v626_v61 = vld [vmem:[%s7810_s17 + $0x8e0] sm:$0xff]  ;;  %v627_v62 = vld [vmem:[%s7810_s17 + $0x8e8] sm:$0xff] }
  0xbf   : > { %6447 = vmatpush3.bf16.msra.mxu0 %v6446_v8  ;;  %v618_v8 = vld [vmem:[%s7810_s17 + $0x8a0] sm:$0xff] }
  0xc0   : > { %6479 = vmatpush3.bf16.msra.mxu1 %v6478_v9  ;;  %6449 = vmatprep.subr.bf16.mxu0 %v6448_v10  ;;  %v619_v9 = vld [vmem:[%s7810_s17 + $0x8a8] sm:$0xff]  ;;  %v1660_v10 = vcombine.high %v8156_v60, %v8156_v60 }
  0xc1   : > { %6481 = vmatprep.subr.bf16.mxu1 %v6480_v15  ;;  %v6498_v15 = vpack.c.bf16 %v601_v4, %v600_v3  ;;  %v6500_v18 = vpack.c.bf16 %v619_v9, %v618_v8  ;;  %v6546_v3 = vpack.c.bf16 %v641_v59, %v640_v57  ;;  %v6516_v4 = vpack.c.bf16 %v627_v62, %v626_v61  ;;  %v643_v9 = vld [vmem:[%s7810_s17 + $0x968] sm:$0xff]  ;;  %v666_v62 = vld [vmem:[%s7810_s17 + $0xa20] sm:$0xff] }
  0xc3   : > { %6451 = vmatpush3.bf16.msra.mxu0 %v6450_v23  ;;  %v635_v23 = vld [vmem:[%s7810_s17 + $0x928] sm:$0xff] }
  0xc4   : > { %6483 = vmatpush3.bf16.msra.mxu1 %v6482_v24  ;;  %6453 = vmatprep.subr.bf16.mxu0 %v6452_v25  ;;  %v620_v24 = vld [vmem:[%s7810_s17 + $0x8b0] sm:$0xff]  ;;  %v621_v25 = vld [vmem:[%s7810_s17 + $0x8b8] sm:$0xff]  ;;  %v6534_v28 = vpack.c.bf16 %v635_v23, %v634_v21 }
  0xc5   : > { %6485 = vmatprep.subr.bf16.mxu1 %v6484_v29  ;;  %v6504_v29 = vpack.c.bf16 %v621_v25, %v620_v24  ;;  %v613_v21 = vld [vmem:[%s7810_s17 + $0x878] sm:$0xff]  ;;  %v678_v25 = vld [vmem:[%s7810_s17 + $0xa80] sm:$0xff] }
  0xc6   : > { %v645_v24 = vld [vmem:[%s7810_s17 + $0x978] sm:$0xff] }
  0xc7   : > { %6455 = vmatpush3.bf16.msra.mxu0 %v6454_v36  ;;  %v622_v36 = vld [vmem:[%s7810_s17 + $0x8c0] sm:$0xff] }
  0xc8   : > { %6487 = vmatpush3.bf16.msra.mxu1 %v6486_v38  ;;  %6457 = vmatprep.subr.bf16.mxu0 %v6456_v39  ;;  %v654_v38 = vld [vmem:[%s7810_s17 + $0x9c0] sm:$0xff]  ;;  %v655_v39 = vld [vmem:[%s7810_s17 + $0x9c8] sm:$0xff]  ;;  %v6508_v41 = vpack.c.bf16 %v623_v37, %v622_v36 }
  0xc9   : > { %6489 = vmatprep.subr.bf16.mxu1 %v6488_v42  ;;  %v606_v42 = vld [vmem:[%s7810_s17 + $0x840] sm:$0xff]  ;;  %v6540_v55 = vpack.c.bf16 %v655_v39, %v654_v38  ;;  %v695_v37 = vld [vmem:[%s7810_s17 + $0xb08] sm:$0xff]  ;;  %v680_v38 = vld [vmem:[%s7810_s17 + $0xa90] sm:$0xff] }
  0xca   : > { %v681_v39 = vld [vmem:[%s7810_s17 + $0xa98] sm:$0xff]  ;;  %v6590_v44 = vpack.c.bf16 %v695_v37, %v694_v34  ;;  %v672_v34 = vld [vmem:[%s7810_s17 + $0xa50] sm:$0xff] }
  0xcb   : > { %6459 = vmatpush3.bf16.msra.mxu0 %v6458_v50  ;;  %v656_v50 = vld [vmem:[%s7810_s17 + $0x9d0] sm:$0xff] }
  0xcc   : > { %6491 = vmatpush3.bf16.msra.mxu1 %v6490_v51  ;;  %6493 = vmatprep.subr.bf16.mxu0 %v6492_v52  ;;  %v657_v51 = vld [vmem:[%s7810_s17 + $0x9d8] sm:$0xff]  ;;  %v6510_v52 = vpack.c.bf16 %v607_v43, %v606_v42  ;;  %v704_v37 = vld [vmem:[%s7810_s17 + $0xb50] sm:$0xff] }
  0xcd   : > { %6525 = vmatprep.subr.bf16.mxu1 %v6524_v35  ;;  %v609_v35 = vld [vmem:[%s7810_s17 + $0x858] sm:$0xff]  ;;  %v6544_v58 = vpack.c.bf16 %v657_v51, %v656_v50 }
  0xce   : > { %2461 = vmatmul.mubr.f32.vlgmr.msra.gmra.mrb[6].mxu0 %v8079_v17  ;;  %v603_v17 = vld [vmem:[%s7810_s17 + $0x828] sm:$0xff]  ;;  %v697_v51 = vld [vmem:[%s7810_s17 + $0xb18] sm:$0xff] }
  0xcf   : > { %6495 = vmatpush3.bf16.msra.mxu0 %v6494_v47  ;;  %2531 = vmatmul.mubr.f32.vlgmr.msra.gmra.mrb[6].mxu1 %v8084_v20  ;;  %v652_v20 = vld [vmem:[%s7810_s17 + $0x9b0] sm:$0xff]  ;;  %v6502_v27 = vpack.c.bf16 %v603_v17, %v602_v19  ;;  %v658_v47 = vld [vmem:[%s7810_s17 + $0x9e0] sm:$0xff]  ;;  %v6594_v59 = vpack.c.bf16 %v697_v51, %v696_v49 }
  0xd0   : > { %6527 = vmatpush3.bf16.msra.mxu1 %v6526_v0  ;;  %6497 = vmatprep.subr.bf16.mxu0 %v6496_v2  ;;  %v6536_v33 = vpack.c.bf16 %v653_v26, %v652_v20  ;;  %v659_v0 = vld [vmem:[%s7810_s17 + $0x9e8] sm:$0xff]  ;;  %v6514_v2 = vpack.c.bf16 %v609_v35, %v608_v56  ;;  %v612_v17 = vld [vmem:[%s7810_s17 + $0x870] sm:$0xff]  ;;  %v710_v26 = vld [vmem:[%s7810_s17 + $0xb80] sm:$0xff] }
  0xd1   : > { %6529 = vmatprep.subr.bf16.mxu1 %v6528_v6  ;;  %2600 = vmatprep.mubr.f32.mxu0 %v1660_v10  ;;  %v611_v6 = vld [vmem:[%s7810_s17 + $0x868] sm:$0xff]  ;;  %v6548_v8 = vpack.c.bf16 %v659_v0, %v658_v47  ;;  %v628_v10 = vld [vmem:[%s7810_s17 + $0x8f0] sm:$0xff]  ;;  %v714_v56 = vld [vmem:[%s7810_s17 + $0xba0] sm:$0xff] }
  0xd2   : > { %2670 = vmatprep.mubr.f32.mxu1 %v1661_v13  ;;  %v661_v13 = vld [vmem:[%s7810_s17 + $0x9f8] sm:$0xff]  ;;  %v6520_v19 = vpack.c.bf16 %v629_v11, %v628_v10  ;;  %v679_v20 = vld [vmem:[%s7810_s17 + $0xa88] sm:$0xff]  ;;  %v698_v47 = vld [vmem:[%s7810_s17 + $0xb20] sm:$0xff] }
  0xd3   : > { %6499 = vmatpush3.bf16.msra.mxu0 %v6498_v15  ;;  %v6518_v15 = vpack.c.bf16 %v611_v6, %v610_v5  ;;  %v6552_v23 = vpack.c.bf16 %v661_v13, %v660_v12  ;;  %v6556_v31 = vpack.c.bf16 %v679_v20, %v678_v25  ;;  %v715_v35 = vld [vmem:[%s7810_s17 + $0xba8] sm:$0xff]  ;;  %v717_v5 = vld [vmem:[%s7810_s17 + $0xbb8] sm:$0xff]  ;;  %v700_v11 = vld [vmem:[%s7810_s17 + $0xb30] sm:$0xff] }
  0xd4   : > { %6531 = vmatpush3.bf16.msra.mxu1 %v6530_v16  ;;  %6501 = vmatprep.subr.bf16.mxu0 %v6500_v18  ;;  %v328_v16 = vld [vmem:[%s7834_s14 + $0x28] sm:$0xff]  ;;  %v6550_v18 = vpack.c.bf16 %v643_v9, %v642_v7  ;;  %v6596_v0 = vpack.c.bf16 %v715_v35, %v714_v56  ;;  %v668_v9 = vld [vmem:[%s7810_s17 + $0xa30] sm:$0xff]  ;;  %v669_v10 = vld [vmem:[%s7810_s17 + $0xa38] sm:$0xff] }
  0xd5   : > { %6533 = vmatprep.subr.bf16.mxu1 %v6532_v22  ;;  %v644_v22 = vld [vmem:[%s7810_s17 + $0x970] sm:$0xff]  ;;  %v701_v13 = vld [vmem:[%s7810_s17 + $0xb38] sm:$0xff]  ;;  %v702_v25 = vld [vmem:[%s7810_s17 + $0xb40] sm:$0xff] }
  0xd6   : > { %v6554_v30 = vpack.c.bf16 %v645_v24, %v644_v22  ;;  %v671_v24 = vld [vmem:[%s7810_s17 + $0xa48] sm:$0xff]  ;;  %v674_v49 = vld [vmem:[%s7810_s17 + $0xa60] sm:$0xff]  ;;  %v693_v56 = vld [vmem:[%s7810_s17 + $0xaf8] sm:$0xff] }
  0xd7   : > { %6503 = vmatpush3.bf16.msra.mxu0 %v6502_v27  ;;  %v711_v27 = vld [vmem:[%s7810_s17 + $0xb88] sm:$0xff]  ;;  %v706_v51 = vld [vmem:[%s7810_s17 + $0xb60] sm:$0xff]  ;;  %v724_v35 = vld [vmem:[%s7810_s17 + $0xbf0] sm:$0xff] }
  0xd8   : > { %6535 = vmatpush3.bf16.msra.mxu1 %v6534_v28  ;;  %6505 = vmatprep.subr.bf16.mxu0 %v6504_v29  ;;  %v1662_v28 = vcombine.high %v328_v16, %v328_v16  ;;  %v6522_v29 = vpack.c.bf16 %v613_v21, %v612_v17  ;;  %v6588_v36 = vpack.c.bf16 %v711_v27, %v710_v26  ;;  %v703_v26 = vld [vmem:[%s7810_s17 + $0xb48] sm:$0xff]  ;;  %v688_v27 = vld [vmem:[%s7810_s17 + $0xad0] sm:$0xff] }
  0xd9   : > { %6537 = vmatprep.subr.bf16.mxu1 %v6536_v33  ;;  %v663_v33 = vld [vmem:[%s7810_s17 + $0xa08] sm:$0xff]  ;;  %v6570_v17 = vpack.c.bf16 %v669_v10, %v668_v9  ;;  %v6602_v21 = vpack.c.bf16 %v701_v13, %v700_v11  ;;  %v726_v11 = vld [vmem:[%s7810_s17 + $0xc00] sm:$0xff] }
  0xda   : > { %v8238_v42 = vrot.slane %v1662_v28, %v7896_v14  ;;  %v6558_v43 = vpack.c.bf16 %v663_v33, %v662_v32  ;;  %v689_v28 = vld [vmem:[%s7810_s17 + $0xad8] sm:$0xff]  ;;  %v6606_v32 = vpack.c.bf16 %v703_v26, %v702_v25  ;;  %v758_v13 = vld [vmem:[%s7810_s17 + $0xd00] sm:$0xff]  ;;  %v728_v26 = vld [vmem:[%s7810_s17 + $0xc10] sm:$0xff] }
  0xdb   : > { %6507 = vmatpush3.bf16.msra.mxu0 %v6506_v45  ;;  %v8233_v45 = vrot.slane %v328_v16, %v7896_v14  ;;  %v687_v16 = vld [vmem:[%s7810_s17 + $0xac8] sm:$0xff]  ;;  %v6576_v33 = vpack.c.bf16 %v689_v28, %v688_v27  ;;  %v729_v27 = vld [vmem:[%s7810_s17 + $0xc18] sm:$0xff]  ;;  %v760_v28 = vld [vmem:[%s7810_s17 + $0xd10] sm:$0xff] }
  0xdc   : > { %6539 = vmatpush3.bf16.msra.mxu1 %v6538_v40  ;;  %6509 = vmatprep.subr.bf16.mxu0 %v6508_v41  ;;  %v712_v40 = vld [vmem:[%s7810_s17 + $0xb90] sm:$0xff]  ;;  %v713_v41 = vld [vmem:[%s7810_s17 + $0xb98] sm:$0xff]  ;;  %v1678_v57 = vcombine.high %v8238_v42, %v8238_v42 }
  0xdd   : > { %6541 = vmatprep.subr.bf16.mxu1 %v6540_v55  ;;  %v6560_v55 = vpack.c.bf16 %v681_v39, %v680_v38  ;;  %v6592_v50 = vpack.c.bf16 %v713_v41, %v712_v40  ;;  %v705_v39 = vld [vmem:[%s7810_s17 + $0xb58] sm:$0xff]  ;;  %v690_v40 = vld [vmem:[%s7810_s17 + $0xae0] sm:$0xff]  ;;  %v691_v41 = vld [vmem:[%s7810_s17 + $0xae8] sm:$0xff] }
  0xdf   : > { %6511 = vmatpush3.bf16.msra.mxu0 %v6510_v52  ;;  %v682_v52 = vld [vmem:[%s7810_s17 + $0xaa0] sm:$0xff] }
  0xe0   : > { %6543 = vmatpush3.bf16.msra.mxu1 %v6542_v53  ;;  %6513 = vmatprep.subr.bf16.mxu0 %v6512_v54  ;;  %v683_v53 = vld [vmem:[%s7810_s17 + $0xaa8] sm:$0xff]  ;;  %v1677_v54 = vcombine.high %v8233_v45, %v8233_v45 }
  0xe1   : > { %6545 = vmatprep.subr.bf16.mxu1 %v6544_v58  ;;  %v6562_v58 = vpack.c.bf16 %v665_v48, %v664_v46  ;;  %v6564_v61 = vpack.c.bf16 %v683_v53, %v682_v52  ;;  %v6610_v46 = vpack.c.bf16 %v705_v39, %v704_v37  ;;  %v6580_v48 = vpack.c.bf16 %v691_v41, %v690_v40  ;;  %v707_v53 = vld [vmem:[%s7810_s17 + $0xb68] sm:$0xff]  ;;  %v730_v41 = vld [vmem:[%s7810_s17 + $0xc20] sm:$0xff] }
  0xe3   : > { %6515 = vmatpush3.bf16.msra.mxu0 %v6514_v2  ;;  %v699_v2 = vld [vmem:[%s7810_s17 + $0xb28] sm:$0xff] }
  0xe4   : > { %6547 = vmatpush3.bf16.msra.mxu1 %v6546_v3  ;;  %6517 = vmatprep.subr.bf16.mxu0 %v6516_v4  ;;  %v684_v3 = vld [vmem:[%s7810_s17 + $0xab0] sm:$0xff]  ;;  %v685_v4 = vld [vmem:[%s7810_s17 + $0xab8] sm:$0xff]  ;;  %v6598_v7 = vpack.c.bf16 %v699_v2, %v698_v47 }
  0xe5   : > { %6549 = vmatprep.subr.bf16.mxu1 %v6548_v8  ;;  %v6568_v8 = vpack.c.bf16 %v685_v4, %v684_v3  ;;  %v677_v47 = vld [vmem:[%s7810_s17 + $0xa78] sm:$0xff]  ;;  %v742_v4 = vld [vmem:[%s7810_s17 + $0xc80] sm:$0xff] }
  0xe6   : > { %v709_v3 = vld [vmem:[%s7810_s17 + $0xb78] sm:$0xff] }
  0xe7   : > { %6519 = vmatpush3.bf16.msra.mxu0 %v6518_v15  ;;  %v686_v15 = vld [vmem:[%s7810_s17 + $0xac0] sm:$0xff] }
  0xe8   : > { %6551 = vmatpush3.bf16.msra.mxu1 %v6550_v18  ;;  %6521 = vmatprep.subr.bf16.mxu0 %v6520_v19  ;;  %v718_v18 = vld [vmem:[%s7810_s17 + $0xbc0] sm:$0xff]  ;;  %v719_v19 = vld [vmem:[%s7810_s17 + $0xbc8] sm:$0xff]  ;;  %v6572_v22 = vpack.c.bf16 %v687_v16, %v686_v15 }
  0xe9   : > { %6553 = vmatprep.subr.bf16.mxu1 %v6552_v23  ;;  %v670_v23 = vld [vmem:[%s7810_s17 + $0xa40] sm:$0xff]  ;;  %v6604_v20 = vpack.c.bf16 %v719_v19, %v718_v18  ;;  %v759_v16 = vld [vmem:[%s7810_s17 + $0xd08] sm:$0xff]  ;;  %v744_v18 = vld [vmem:[%s7810_s17 + $0xc90] sm:$0xff] }
  0xea   : > { %v745_v19 = vld [vmem:[%s7810_s17 + $0xc98] sm:$0xff]  ;;  %v6654_v25 = vpack.c.bf16 %v759_v16, %v758_v13  ;;  %v736_v13 = vld [vmem:[%s7810_s17 + $0xc50] sm:$0xff] }
  0xeb   : > { %6523 = vmatpush3.bf16.msra.mxu0 %v6522_v29  ;;  %v720_v29 = vld [vmem:[%s7810_s17 + $0xbd0] sm:$0xff] }
  0xec   : > { %6555 = vmatpush3.bf16.msra.mxu1 %v6554_v30  ;;  %6557 = vmatprep.subr.bf16.mxu0 %v6556_v31  ;;  %v721_v30 = vld [vmem:[%s7810_s17 + $0xbd8] sm:$0xff]  ;;  %v6574_v31 = vpack.c.bf16 %v671_v24, %v670_v23  ;;  %v768_v16 = vld [vmem:[%s7810_s17 + $0xd50] sm:$0xff] }
  0xed   : > { %6589 = vmatprep.subr.bf16.mxu1 %v6588_v36  ;;  %v673_v36 = vld [vmem:[%s7810_s17 + $0xa58] sm:$0xff]  ;;  %v6608_v38 = vpack.c.bf16 %v721_v30, %v720_v29 }
  0xee   : > { %2601 = vmatmul.mubr.f32.vlgmr.msra.gmra.mrb[8].mxu0 %v8156_v60  ;;  %v667_v60 = vld [vmem:[%s7810_s17 + $0xa28] sm:$0xff]  ;;  %v761_v30 = vld [vmem:[%s7810_s17 + $0xd18] sm:$0xff] }
  0xef   : > { %6559 = vmatpush3.bf16.msra.mxu0 %v6558_v43  ;;  %2671 = vmatmul.mubr.f32.vlgmr.msra.gmra.mrb[8].mxu1 %v8161_v63  ;;  %v716_v63 = vld [vmem:[%s7810_s17 + $0xbb0] sm:$0xff]  ;;  %v6566_v6 = vpack.c.bf16 %v667_v60, %v666_v62  ;;  %v722_v43 = vld [vmem:[%s7810_s17 + $0xbe0] sm:$0xff]  ;;  %v6658_v39 = vpack.c.bf16 %v761_v30, %v760_v28 }
  0xf0   : > { %6591 = vmatpush3.bf16.msra.mxu1 %v6590_v44  ;;  %6561 = vmatprep.subr.bf16.mxu0 %v6560_v55  ;;  %v6600_v12 = vpack.c.bf16 %v717_v5, %v716_v63  ;;  %v723_v44 = vld [vmem:[%s7810_s17 + $0xbe8] sm:$0xff]  ;;  %v6578_v55 = vpack.c.bf16 %v673_v36, %v672_v34  ;;  %v676_v60 = vld [vmem:[%s7810_s17 + $0xa70] sm:$0xff]  ;;  %v774_v5 = vld [vmem:[%s7810_s17 + $0xd80] sm:$0xff] }
  0xf1   : > { %6593 = vmatprep.subr.bf16.mxu1 %v6592_v50  ;;  %2740 = vmatprep.mubr.f32.mxu0 %v1677_v54  ;;  %v675_v50 = vld [vmem:[%s7810_s17 + $0xa68] sm:$0xff]  ;;  %v6612_v52 = vpack.c.bf16 %v723_v44, %v722_v43  ;;  %v692_v54 = vld [vmem:[%s7810_s17 + $0xaf0] sm:$0xff]  ;;  %v778_v34 = vld [vmem:[%s7810_s17 + $0xda0] sm:$0xff] }
  0xf2   : > { %2810 = vmatprep.mubr.f32.mxu1 %v1678_v57  ;;  %v725_v57 = vld [vmem:[%s7810_s17 + $0xbf8] sm:$0xff]  ;;  %v6584_v62 = vpack.c.bf16 %v693_v56, %v692_v54  ;;  %v743_v63 = vld [vmem:[%s7810_s17 + $0xc88] sm:$0xff]  ;;  %v762_v43 = vld [vmem:[%s7810_s17 + $0xd20] sm:$0xff] }
  0xf3   : > { %6563 = vmatpush3.bf16.msra.mxu0 %v6562_v58  ;;  %v6582_v58 = vpack.c.bf16 %v675_v50, %v674_v49  ;;  %v6616_v2 = vpack.c.bf16 %v725_v57, %v724_v35  ;;  %v6620_v10 = vpack.c.bf16 %v743_v63, %v742_v4  ;;  %v779_v36 = vld [vmem:[%s7810_s17 + $0xda8] sm:$0xff]  ;;  %v781_v49 = vld [vmem:[%s7810_s17 + $0xdb8] sm:$0xff]  ;;  %v764_v56 = vld [vmem:[%s7810_s17 + $0xd30] sm:$0xff] }
  0xf4   : > { %6595 = vmatpush3.bf16.msra.mxu1 %v6594_v59  ;;  %6565 = vmatprep.subr.bf16.mxu0 %v6564_v61  ;;  %v329_v59 = vld [vmem:[%s7834_s14 + $0x30] sm:$0xff]  ;;  %v6614_v61 = vpack.c.bf16 %v707_v53, %v706_v51  ;;  %v6660_v44 = vpack.c.bf16 %v779_v36, %v778_v34  ;;  %v733_v54 = vld [vmem:[%s7810_s17 + $0xc38] sm:$0xff]  ;;  %v766_v4 = vld [vmem:[%s7810_s17 + $0xd40] sm:$0xff] }
  0xf5   : > { %6597 = vmatprep.subr.bf16.mxu1 %v6596_v0  ;;  %v708_v0 = vld [vmem:[%s7810_s17 + $0xb70] sm:$0xff]  ;;  %v765_v57 = vld [vmem:[%s7810_s17 + $0xd38] sm:$0xff]  ;;  %v738_v28 = vld [vmem:[%s7810_s17 + $0xc60] sm:$0xff] }
  0xf6   : > { %v6618_v9 = vpack.c.bf16 %v709_v3, %v708_v0  ;;  %v732_v53 = vld [vmem:[%s7810_s17 + $0xc30] sm:$0xff]  ;;  %v735_v3 = vld [vmem:[%s7810_s17 + $0xc48] sm:$0xff]  ;;  %v770_v30 = vld [vmem:[%s7810_s17 + $0xd60] sm:$0xff] }
  0xf7   : > { %6567 = vmatpush3.bf16.msra.mxu0 %v6566_v6  ;;  %v775_v6 = vld [vmem:[%s7810_s17 + $0xd88] sm:$0xff]  ;;  %v757_v34 = vld [vmem:[%s7810_s17 + $0xcf8] sm:$0xff]  ;;  %v788_v36 = vld [vmem:[%s7810_s17 + $0xdf0] sm:$0xff] }
  0xf8   : > { %6599 = vmatpush3.bf16.msra.mxu1 %v6598_v7  ;;  %6569 = vmatprep.subr.bf16.mxu0 %v6568_v8  ;;  %v1679_v7 = vcombine.high %v329_v59, %v329_v59  ;;  %v6586_v8 = vpack.c.bf16 %v677_v47, %v676_v60  ;;  %v6652_v15 = vpack.c.bf16 %v775_v6, %v774_v5  ;;  %v767_v5 = vld [vmem:[%s7810_s17 + $0xd48] sm:$0xff]  ;;  %v752_v6 = vld [vmem:[%s7810_s17 + $0xcd0] sm:$0xff] }
  0xf9   : > { %6601 = vmatprep.subr.bf16.mxu1 %v6600_v12  ;;  %v727_v12 = vld [vmem:[%s7810_s17 + $0xc08] sm:$0xff]  ;;  %v6634_v60 = vpack.c.bf16 %v733_v54, %v732_v53  ;;  %v6666_v47 = vpack.c.bf16 %v765_v57, %v764_v56  ;;  %v790_v56 = vld [vmem:[%s7810_s17 + $0xe00] sm:$0xff] }
  0xfa   : > { %v8315_v23 = vrot.slane %v1679_v7, %v7896_v14  ;;  %v6622_v24 = vpack.c.bf16 %v727_v12, %v726_v11  ;;  %v753_v7 = vld [vmem:[%s7810_s17 + $0xcd8] sm:$0xff]  ;;  %v6670_v11 = vpack.c.bf16 %v767_v5, %v766_v4  ;;  %v822_v57 = vld [vmem:[%s7810_s17 + $0xf00] sm:$0xff]  ;;  %v792_v5 = vld [vmem:[%s7810_s17 + $0xe10] sm:$0xff] }
  0xfb   : > { %6571 = vmatpush3.bf16.msra.mxu0 %v6570_v17  ;;  %v8310_v17 = vrot.slane %v329_v59, %v7896_v14  ;;  %v751_v59 = vld [vmem:[%s7810_s17 + $0xcc8] sm:$0xff]  ;;  %v6640_v12 = vpack.c.bf16 %v753_v7, %v752_v6  ;;  %v793_v6 = vld [vmem:[%s7810_s17 + $0xe18] sm:$0xff]  ;;  %v824_v7 = vld [vmem:[%s7810_s17 + $0xf10] sm:$0xff] }
  0xfc   : > { %6603 = vmatpush3.bf16.msra.mxu1 %v6602_v21  ;;  %6573 = vmatprep.subr.bf16.mxu0 %v6572_v22  ;;  %v776_v21 = vld [vmem:[%s7810_s17 + $0xd90] sm:$0xff]  ;;  %v777_v22 = vld [vmem:[%s7810_s17 + $0xd98] sm:$0xff]  ;;  %v1695_v37 = vcombine.high %v8315_v23, %v8315_v23 }
  0xfd   : > { %6605 = vmatprep.subr.bf16.mxu1 %v6604_v20  ;;  %v6624_v20 = vpack.c.bf16 %v745_v19, %v744_v18  ;;  %v6656_v29 = vpack.c.bf16 %v777_v22, %v776_v21  ;;  %v769_v19 = vld [vmem:[%s7810_s17 + $0xd58] sm:$0xff]  ;;  %v754_v21 = vld [vmem:[%s7810_s17 + $0xce0] sm:$0xff]  ;;  %v755_v22 = vld [vmem:[%s7810_s17 + $0xce8] sm:$0xff] }
  0xff   : > { %6575 = vmatpush3.bf16.msra.mxu0 %v6574_v31  ;;  %v746_v31 = vld [vmem:[%s7810_s17 + $0xca0] sm:$0xff] }
 0x100   : > { %6607 = vmatpush3.bf16.msra.mxu1 %v6606_v32  ;;  %6577 = vmatprep.subr.bf16.mxu0 %v6576_v33  ;;  %v747_v32 = vld [vmem:[%s7810_s17 + $0xca8] sm:$0xff]  ;;  %v1694_v33 = vcombine.high %v8310_v17, %v8310_v17 }
 0x101   : > { %6609 = vmatprep.subr.bf16.mxu1 %v6608_v38  ;;  %v6626_v38 = vpack.c.bf16 %v729_v27, %v728_v26  ;;  %v6628_v40 = vpack.c.bf16 %v747_v32, %v746_v31  ;;  %v6674_v26 = vpack.c.bf16 %v769_v19, %v768_v16  ;;  %v6644_v27 = vpack.c.bf16 %v755_v22, %v754_v21  ;;  %v771_v32 = vld [vmem:[%s7810_s17 + $0xd68] sm:$0xff]  ;;  %v794_v22 = vld [vmem:[%s7810_s17 + $0xe20] sm:$0xff] }
 0x103   : > { %6579 = vmatpush3.bf16.msra.mxu0 %v6578_v55  ;;  %v763_v55 = vld [vmem:[%s7810_s17 + $0xd28] sm:$0xff] }
 0x104   : > { %6611 = vmatpush3.bf16.msra.mxu1 %v6610_v46  ;;  %6581 = vmatprep.subr.bf16.mxu0 %v6580_v48  ;;  %v748_v46 = vld [vmem:[%s7810_s17 + $0xcb0] sm:$0xff]  ;;  %v749_v48 = vld [vmem:[%s7810_s17 + $0xcb8] sm:$0xff]  ;;  %v6662_v51 = vpack.c.bf16 %v763_v55, %v762_v43 }
 0x105   : > { %6613 = vmatprep.subr.bf16.mxu1 %v6612_v52  ;;  %v6632_v52 = vpack.c.bf16 %v749_v48, %v748_v46  ;;  %v741_v43 = vld [vmem:[%s7810_s17 + $0xc78] sm:$0xff]  ;;  %v806_v48 = vld [vmem:[%s7810_s17 + $0xe80] sm:$0xff] }
 0x106   : > { %v773_v46 = vld [vmem:[%s7810_s17 + $0xd78] sm:$0xff] }
 0x107   : > { %6583 = vmatpush3.bf16.msra.mxu0 %v6582_v58  ;;  %v750_v58 = vld [vmem:[%s7810_s17 + $0xcc0] sm:$0xff] }
 0x108   : > { %6615 = vmatpush3.bf16.msra.mxu1 %v6614_v61  ;;  %6585 = vmatprep.subr.bf16.mxu0 %v6584_v62  ;;  %v782_v61 = vld [vmem:[%s7810_s17 + $0xdc0] sm:$0xff]  ;;  %v783_v62 = vld [vmem:[%s7810_s17 + $0xdc8] sm:$0xff]  ;;  %v6636_v0 = vpack.c.bf16 %v751_v59, %v750_v58 }
 0x109   : > { %6617 = vmatprep.subr.bf16.mxu1 %v6616_v2  ;;  %v734_v2 = vld [vmem:[%s7810_s17 + $0xc40] sm:$0xff]  ;;  %v6668_v63 = vpack.c.bf16 %v783_v62, %v782_v61  ;;  %v823_v59 = vld [vmem:[%s7810_s17 + $0xf08] sm:$0xff]  ;;  %v808_v61 = vld [vmem:[%s7810_s17 + $0xe90] sm:$0xff] }
 0x10a   : > { %v809_v62 = vld [vmem:[%s7810_s17 + $0xe98] sm:$0xff]  ;;  %v6718_v4 = vpack.c.bf16 %v823_v59, %v822_v57  ;;  %v800_v57 = vld [vmem:[%s7810_s17 + $0xe50] sm:$0xff] }
 0x10b   : > { %6587 = vmatpush3.bf16.msra.mxu0 %v6586_v8  ;;  %v784_v8 = vld [vmem:[%s7810_s17 + $0xdd0] sm:$0xff] }
 0x10c   : > { %6619 = vmatpush3.bf16.msra.mxu1 %v6618_v9  ;;  %6621 = vmatprep.subr.bf16.mxu0 %v6620_v10  ;;  %v785_v9 = vld [vmem:[%s7810_s17 + $0xdd8] sm:$0xff]  ;;  %v6638_v10 = vpack.c.bf16 %v735_v3, %v734_v2  ;;  %v832_v59 = vld [vmem:[%s7810_s17 + $0xf50] sm:$0xff] }
 0x10d   : > { %6653 = vmatprep.subr.bf16.mxu1 %v6652_v15  ;;  %v737_v15 = vld [vmem:[%s7810_s17 + $0xc58] sm:$0xff]  ;;  %v6672_v18 = vpack.c.bf16 %v785_v9, %v784_v8 }
 0x10e   : > { %2741 = vmatmul.mubr.f32.vlgmr.msra.gmra.mrb[10].mxu0 %v8233_v45  ;;  %v731_v45 = vld [vmem:[%s7810_s17 + $0xc28] sm:$0xff]  ;;  %v825_v9 = vld [vmem:[%s7810_s17 + $0xf18] sm:$0xff] }
 0x10f   : > { %6623 = vmatpush3.bf16.msra.mxu0 %v6622_v24  ;;  %2811 = vmatmul.mubr.f32.vlgmr.msra.gmra.mrb[10].mxu1 %v8238_v42  ;;  %v780_v42 = vld [vmem:[%s7810_s17 + $0xdb0] sm:$0xff]  ;;  %v6630_v50 = vpack.c.bf16 %v731_v45, %v730_v41  ;;  %v786_v24 = vld [vmem:[%s7810_s17 + $0xde0] sm:$0xff]  ;;  %v6722_v19 = vpack.c.bf16 %v825_v9, %v824_v7 }
 0x110   : > { %6655 = vmatpush3.bf16.msra.mxu1 %v6654_v25  ;;  %6625 = vmatprep.subr.bf16.mxu0 %v6624_v20  ;;  %v6664_v35 = vpack.c.bf16 %v781_v49, %v780_v42  ;;  %v787_v25 = vld [vmem:[%s7810_s17 + $0xde8] sm:$0xff]  ;;  %v6642_v20 = vpack.c.bf16 %v737_v15, %v736_v13  ;;  %v740_v45 = vld [vmem:[%s7810_s17 + $0xc70] sm:$0xff]  ;;  %v838_v49 = vld [vmem:[%s7810_s17 + $0xf80] sm:$0xff] }
 0x111   : > { %6657 = vmatprep.subr.bf16.mxu1 %v6656_v29  ;;  %2880 = vmatprep.mubr.f32.mxu0 %v1694_v33  ;;  %v739_v29 = vld [vmem:[%s7810_s17 + $0xc68] sm:$0xff]  ;;  %v6676_v31 = vpack.c.bf16 %v787_v25, %v786_v24  ;;  %v756_v33 = vld [vmem:[%s7810_s17 + $0xcf0] sm:$0xff]  ;;  %v842_v13 = vld [vmem:[%s7810_s17 + $0xfa0] sm:$0xff] }
 0x112   : > { %2950 = vmatprep.mubr.f32.mxu1 %v1695_v37  ;;  %v789_v37 = vld [vmem:[%s7810_s17 + $0xdf8] sm:$0xff]  ;;  %v6648_v41 = vpack.c.bf16 %v757_v34, %v756_v33  ;;  %v807_v42 = vld [vmem:[%s7810_s17 + $0xe88] sm:$0xff]  ;;  %v826_v24 = vld [vmem:[%s7810_s17 + $0xf20] sm:$0xff] }
 0x113   : > { %6627 = vmatpush3.bf16.msra.mxu0 %v6626_v38  ;;  %v6646_v38 = vpack.c.bf16 %v739_v29, %v738_v28  ;;  %v6680_v55 = vpack.c.bf16 %v789_v37, %v788_v36  ;;  %v6684_v54 = vpack.c.bf16 %v807_v42, %v806_v48  ;;  %v843_v15 = vld [vmem:[%s7810_s17 + $0xfa8] sm:$0xff]  ;;  %v845_v28 = vld [vmem:[%s7810_s17 + $0xfb8] sm:$0xff]  ;;  %v828_v34 = vld [vmem:[%s7810_s17 + $0xf30] sm:$0xff] }
 0x114   : > { %6659 = vmatpush3.bf16.msra.mxu1 %v6658_v39  ;;  %6629 = vmatprep.subr.bf16.mxu0 %v6628_v40  ;;  %v330_v39 = vld [vmem:[%s7834_s14 + $0x38] sm:$0xff]  ;;  %v6678_v40 = vpack.c.bf16 %v771_v32, %v770_v30  ;;  %v6724_v25 = vpack.c.bf16 %v843_v15, %v842_v13  ;;  %v830_v48 = vld [vmem:[%s7810_s17 + $0xf40] sm:$0xff] }
 0x115   : > { %6661 = vmatprep.subr.bf16.mxu1 %v6660_v44  ;;  %v772_v44 = vld [vmem:[%s7810_s17 + $0xd70] sm:$0xff]  ;;  %v797_v33 = vld [vmem:[%s7810_s17 + $0xe38] sm:$0xff]  ;;  %v802_v7 = vld [vmem:[%s7810_s17 + $0xe60] sm:$0xff] }
 0x116   : > { %v6682_v53 = vpack.c.bf16 %v773_v46, %v772_v44  ;;  %v796_v32 = vld [vmem:[%s7810_s17 + $0xe30] sm:$0xff]  ;;  %v829_v37 = vld [vmem:[%s7810_s17 + $0xf38] sm:$0xff]  ;;  %v799_v46 = vld [vmem:[%s7810_s17 + $0xe48] sm:$0xff] }
 0x117   : > { %6631 = vmatpush3.bf16.msra.mxu0 %v6630_v50  ;;  %v839_v50 = vld [vmem:[%s7810_s17 + $0xf88] sm:$0xff]  ;;  %v834_v9 = vld [vmem:[%s7810_s17 + $0xf60] sm:$0xff]  ;;  %v820_v13 = vld [vmem:[%s7810_s17 + $0xef0] sm:$0xff] }
 0x118   : > { %6663 = vmatpush3.bf16.msra.mxu1 %v6662_v51  ;;  %6633 = vmatprep.subr.bf16.mxu0 %v6632_v52  ;;  %v1696_v51 = vcombine.high %v330_v39, %v330_v39  ;;  %v6650_v52 = vpack.c.bf16 %v741_v43, %v740_v45  ;;  %v6716_v58 = vpack.c.bf16 %v839_v50, %v838_v49  ;;  %v831_v49 = vld [vmem:[%s7810_s17 + $0xf48] sm:$0xff]  ;;  %v816_v50 = vld [vmem:[%s7810_s17 + $0xed0] sm:$0xff]  ;;  %v821_v15 = vld [vmem:[%s7810_s17 + $0xef8] sm:$0xff] }
 0x119   : > { %6665 = vmatprep.subr.bf16.mxu1 %v6664_v35  ;;  %v791_v35 = vld [vmem:[%s7810_s17 + $0xe08] sm:$0xff]  ;;  %v6698_v45 = vpack.c.bf16 %v797_v33, %v796_v32  ;;  %v6730_v43 = vpack.c.bf16 %v829_v37, %v828_v34  ;;  %v870_v32 = vld [vmem:[%s7810_s17 + $0x1080] sm:$0xff] }
 0x11a   : > { %v8392_v2 = vrot.slane %v1696_v51, %v7896_v14  ;;  %v6686_v3 = vpack.c.bf16 %v791_v35, %v790_v56  ;;  %v817_v51 = vld [vmem:[%s7810_s17 + $0xed8] sm:$0xff]  ;;  %v6734_v56 = vpack.c.bf16 %v831_v49, %v830_v48  ;;  %v871_v33 = vld [vmem:[%s7810_s17 + $0x1088] sm:$0xff]  ;;  %v872_v48 = vld [vmem:[%s7810_s17 + $0x1090] sm:$0xff] }
 0x11b   : > { %6635 = vmatpush3.bf16.msra.mxu0 %v6634_v60  ;;  %v8387_v60 = vrot.slane %v330_v39, %v7896_v14  ;;  %v815_v39 = vld [vmem:[%s7810_s17 + $0xec8] sm:$0xff]  ;;  %v6704_v35 = vpack.c.bf16 %v817_v51, %v816_v50  ;;  %v904_v50 = vld [vmem:[%s7810_s17 + $0x1190] sm:$0xff]  ;;  %v905_v51 = vld [vmem:[%s7810_s17 + $0x1198] sm:$0xff] }
 0x11c   : > { %6667 = vmatpush3.bf16.msra.mxu1 %v6666_v47  ;;  %6637 = vmatprep.subr.bf16.mxu0 %v6636_v0  ;;  %v840_v47 = vld [vmem:[%s7810_s17 + $0xf90] sm:$0xff]  ;;  %v841_v0 = vld [vmem:[%s7810_s17 + $0xf98] sm:$0xff]  ;;  %v1712_v16 = vcombine.high %v8392_v2, %v8392_v2  ;;  %v903_v37 = vld [vmem:[%s7810_s17 + $0x1188] sm:$0xff] }
 0x11d   : > { %6669 = vmatprep.subr.bf16.mxu1 %v6668_v63  ;;  %v6688_v63 = vpack.c.bf16 %v809_v62, %v808_v61  ;;  %v6720_v8 = vpack.c.bf16 %v841_v0, %v840_v47  ;;  %v833_v62 = vld [vmem:[%s7810_s17 + $0xf58] sm:$0xff]  ;;  %v818_v47 = vld [vmem:[%s7810_s17 + $0xee0] sm:$0xff]  ;;  %v819_v0 = vld [vmem:[%s7810_s17 + $0xee8] sm:$0xff] }
 0x11f   : > { %6639 = vmatpush3.bf16.msra.mxu0 %v6638_v10  ;;  %v810_v10 = vld [vmem:[%s7810_s17 + $0xea0] sm:$0xff] }
 0x120   : > { %6671 = vmatpush3.bf16.msra.mxu1 %v6670_v11  ;;  %6641 = vmatprep.subr.bf16.mxu0 %v6640_v12  ;;  %v811_v11 = vld [vmem:[%s7810_s17 + $0xea8] sm:$0xff]  ;;  %v1711_v12 = vcombine.high %v8387_v60, %v8387_v60 }
 0x121   : > { %6673 = vmatprep.subr.bf16.mxu1 %v6672_v18  ;;  %v6690_v18 = vpack.c.bf16 %v793_v6, %v792_v5  ;;  %v6692_v21 = vpack.c.bf16 %v811_v11, %v810_v10  ;;  %v6738_v5 = vpack.c.bf16 %v833_v62, %v832_v59  ;;  %v6708_v6 = vpack.c.bf16 %v819_v0, %v818_v47  ;;  %v874_v62 = vld [vmem:[%s7810_s17 + $0x10a0] sm:$0xff]  ;;  %v875_v47 = vld [vmem:[%s7810_s17 + $0x10a8] sm:$0xff] }
 0x122   : > { %v6784_v59 = vpack.c.bf16 %v905_v51, %v904_v50  ;;  %v897_v50 = vld [vmem:[%s7810_s17 + $0x1158] sm:$0xff]  ;;  %v882_v51 = vld [vmem:[%s7810_s17 + $0x10e0] sm:$0xff] }
 0x123   : > { %6643 = vmatpush3.bf16.msra.mxu0 %v6642_v20  ;;  %v827_v20 = vld [vmem:[%s7810_s17 + $0xf28] sm:$0xff] }
 0x124   : > { %6675 = vmatpush3.bf16.msra.mxu1 %v6674_v26  ;;  %6645 = vmatprep.subr.bf16.mxu0 %v6644_v27  ;;  %v812_v26 = vld [vmem:[%s7810_s17 + $0xeb0] sm:$0xff]  ;;  %v813_v27 = vld [vmem:[%s7810_s17 + $0xeb8] sm:$0xff]  ;;  %v6726_v30 = vpack.c.bf16 %v827_v20, %v826_v24 }
 0x125   : > { %6677 = vmatprep.subr.bf16.mxu1 %v6676_v31  ;;  %v6696_v31 = vpack.c.bf16 %v813_v27, %v812_v26  ;;  %v6712_v27 = vpack.c.bf16 %v821_v15, %v820_v13  ;;  %v877_v13 = vld [vmem:[%s7810_s17 + $0x10b8] sm:$0xff] }
 0x126   : > { %v909_v15 = vld [vmem:[%s7810_s17 + $0x11b8] sm:$0xff] }
 0x127   : > { %6647 = vmatpush3.bf16.msra.mxu0 %v6646_v38  ;;  %v814_v38 = vld [vmem:[%s7810_s17 + $0xec0] sm:$0xff] }
 0x128   : > { %6679 = vmatpush3.bf16.msra.mxu1 %v6678_v40  ;;  %6649 = vmatprep.subr.bf16.mxu0 %v6648_v41  ;;  %v846_v40 = vld [vmem:[%s7810_s17 + $0xfc0] sm:$0xff]  ;;  %v847_v41 = vld [vmem:[%s7810_s17 + $0xfc8] sm:$0xff]  ;;  %v6700_v44 = vpack.c.bf16 %v815_v39, %v814_v38 }
 0x129   : > { %6681 = vmatprep.subr.bf16.mxu1 %v6680_v55  ;;  %v798_v55 = vld [vmem:[%s7810_s17 + $0xe40] sm:$0xff]  ;;  %v6732_v42 = vpack.c.bf16 %v847_v41, %v846_v40  ;;  %v6748_v41 = vpack.c.bf16 %v871_v33, %v870_v32  ;;  %v863_v32 = vld [vmem:[%s7810_s17 + $0x1048] sm:$0xff] }
 0x12a   : > { %v894_v33 = vld [vmem:[%s7810_s17 + $0x1140] sm:$0xff] }
 0x12b   : > { %6651 = vmatpush3.bf16.msra.mxu0 %v6650_v52  ;;  %v848_v52 = vld [vmem:[%s7810_s17 + $0xfd0] sm:$0xff] }
 0x12c   : > { %6683 = vmatpush3.bf16.msra.mxu1 %v6682_v53  ;;  %6685 = vmatprep.subr.bf16.mxu0 %v6684_v54  ;;  %v849_v53 = vld [vmem:[%s7810_s17 + $0xfd8] sm:$0xff]  ;;  %v6702_v54 = vpack.c.bf16 %v799_v46, %v798_v55  ;;  %v887_v46 = vld [vmem:[%s7810_s17 + $0x1108] sm:$0xff] }
 0x12d   : > { %6717 = vmatprep.subr.bf16.mxu1 %v6716_v58  ;;  %v801_v58 = vld [vmem:[%s7810_s17 + $0xe58] sm:$0xff]  ;;  %v6736_v61 = vpack.c.bf16 %v849_v53, %v848_v52 }
 0x12e   : > { %2881 = vmatmul.mubr.f32.vlgmr.msra.gmra.mrb[12].mxu0 %v8310_v17  ;;  %v795_v17 = vld [vmem:[%s7810_s17 + $0xe28] sm:$0xff] }
 0x12f   : > { %6687 = vmatpush3.bf16.msra.mxu0 %v6686_v3  ;;  %2951 = vmatmul.mubr.f32.vlgmr.msra.gmra.mrb[12].mxu1 %v8315_v23  ;;  %v844_v23 = vld [vmem:[%s7810_s17 + $0xfb0] sm:$0xff]  ;;  %v6694_v29 = vpack.c.bf16 %v795_v17, %v794_v22  ;;  %v850_v3 = vld [vmem:[%s7810_s17 + $0xfe0] sm:$0xff] }
 0x130   : > { %6719 = vmatpush3.bf16.msra.mxu1 %v6718_v4  ;;  %6689 = vmatprep.subr.bf16.mxu0 %v6688_v63  ;;  %v6728_v36 = vpack.c.bf16 %v845_v28, %v844_v23  ;;  %v851_v4 = vld [vmem:[%s7810_s17 + $0xfe8] sm:$0xff]  ;;  %v6706_v63 = vpack.c.bf16 %v801_v58, %v800_v57  ;;  %v804_v23 = vld [vmem:[%s7810_s17 + $0xe70] sm:$0xff]  ;;  %v805_v28 = vld [vmem:[%s7810_s17 + $0xe78] sm:$0xff] }
 0x131   : > { %6721 = vmatprep.subr.bf16.mxu1 %v6720_v8  ;;  %3020 = vmatprep.mubr.f32.mxu0 %v1711_v12  ;;  %v803_v8 = vld [vmem:[%s7810_s17 + $0xe68] sm:$0xff]  ;;  %v6740_v11 = vpack.c.bf16 %v851_v4, %v850_v3  ;;  %v6714_v39 = vpack.c.bf16 %v805_v28, %v804_v23  ;;  %v857_v57 = vld [vmem:[%s7810_s17 + $0x1018] sm:$0xff]  ;;  %v888_v58 = vld [vmem:[%s7810_s17 + $0x1110] sm:$0xff] }
 0x132   : > { %3090 = vmatprep.mubr.f32.mxu1 %v1712_v16  ;;  %v835_v12 = vld [vmem:[%s7810_s17 + $0xf68] sm:$0xff]  ;;  %v6710_v24 = vpack.c.bf16 %v803_v8, %v802_v7  ;;  %v906_v3 = vld [vmem:[%s7810_s17 + $0x11a0] sm:$0xff]  ;;  %v6756_v7 = vpack.c.bf16 %v875_v47, %v874_v62 }
 0x133   : > { %6691 = vmatpush3.bf16.msra.mxu0 %v6690_v18  ;;  %v6742_v26 = vpack.c.bf16 %v835_v12, %v834_v9  ;;  %v907_v4 = vld [vmem:[%s7810_s17 + $0x11a8] sm:$0xff]  ;;  %v858_v8 = vld [vmem:[%s7810_s17 + $0x1020] sm:$0xff]  ;;  %v876_v12 = vld [vmem:[%s7810_s17 + $0x10b0] sm:$0xff] }
 0x134   : > { %6723 = vmatpush3.bf16.msra.mxu1 %v6722_v19  ;;  %6693 = vmatprep.subr.bf16.mxu0 %v6692_v21  ;;  %v852_v19 = vld [vmem:[%s7810_s17 + $0xff0] sm:$0xff]  ;;  %v853_v21 = vld [vmem:[%s7810_s17 + $0xff8] sm:$0xff]  ;;  %v890_v9 = vld [vmem:[%s7810_s17 + $0x1120] sm:$0xff] }
 0x135   : > { %6725 = vmatprep.subr.bf16.mxu1 %v6724_v25  ;;  %v331_v25 = vld [vmem:[%s7834_s14 + $0x40] sm:$0xff]  ;;  %v911_v23 = vld [vmem:[%s7810_s17 + $0x11c8] sm:$0xff] }
 0x136   : > { %v1713_v38 = vcombine.high %v331_v25, %v331_v25  ;;  %v8466_v49 = vrot.slane %v331_v25, %v7896_v14  ;;  %v893_v25 = vld [vmem:[%s7810_s17 + $0x1138] sm:$0xff]  ;;  %v898_v62 = vld [vmem:[%s7810_s17 + $0x1160] sm:$0xff] }
 0x137   : > { %6695 = vmatpush3.bf16.msra.mxu0 %v6694_v29  ;;  %v836_v29 = vld [vmem:[%s7810_s17 + $0xf70] sm:$0xff] }
 0x138   : > { %6727 = vmatpush3.bf16.msra.mxu1 %v6726_v30  ;;  %6697 = vmatprep.subr.bf16.mxu0 %v6696_v31  ;;  %v6744_v30 = vpack.c.bf16 %v853_v21, %v852_v19  ;;  %v837_v31 = vld [vmem:[%s7810_s17 + $0xf78] sm:$0xff]  ;;  %v8471_v52 = vrot.slane %v1713_v38, %v7896_v14  ;;  %v1728_v0 = vcombine.high %v8466_v49, %v8466_v49  ;;  %v860_v21 = vld [vmem:[%s7810_s17 + $0x1030] sm:$0xff] }
 0x139   : > { %6729 = vmatprep.subr.bf16.mxu1 %v6728_v36  ;;  %v902_v36 = vld [vmem:[%s7810_s17 + $0x1180] sm:$0xff]  ;;  %v6746_v40 = vpack.c.bf16 %v837_v31, %v836_v29  ;;  %v6760_v19 = vpack.c.bf16 %v877_v13, %v876_v12  ;;  %v880_v38 = vld [vmem:[%s7810_s17 + $0x10d0] sm:$0xff] }
 0x13a   : > { %v6780_v55 = vpack.c.bf16 %v903_v37, %v902_v36  ;;  %v862_v31 = vld [vmem:[%s7810_s17 + $0x1040] sm:$0xff]  ;;  %v895_v37 = vld [vmem:[%s7810_s17 + $0x1148] sm:$0xff] }
 0x13b   : > { %6699 = vmatpush3.bf16.msra.mxu0 %v6698_v45  ;;  %v854_v45 = vld [vmem:[%s7810_s17 + $0x1000] sm:$0xff] }
 0x13c   : > { %6731 = vmatpush3.bf16.msra.mxu1 %v6730_v43  ;;  %6701 = vmatprep.subr.bf16.mxu0 %v6700_v44  ;;  %v855_v43 = vld [vmem:[%s7810_s17 + $0x1008] sm:$0xff]  ;;  %v886_v44 = vld [vmem:[%s7810_s17 + $0x1100] sm:$0xff] }
 0x13d   : > { %6733 = vmatprep.subr.bf16.mxu1 %v6732_v42  ;;  %v873_v42 = vld [vmem:[%s7810_s17 + $0x1098] sm:$0xff]  ;;  %v6750_v53 = vpack.c.bf16 %v855_v43, %v854_v45  ;;  %v6766_v45 = vpack.c.bf16 %v863_v32, %v862_v31  ;;  %v6798_v43 = vpack.c.bf16 %v895_v37, %v894_v33  ;;  %v950_v31 = vld [vmem:[%s7810_s17 + $0x1300] sm:$0xff]  ;;  %v951_v33 = vld [vmem:[%s7810_s17 + $0x1308] sm:$0xff] }
 0x13e   : > { %v937_v37 = vld [vmem:[%s7810_s17 + $0x1298] sm:$0xff] }
 0x13f   : > { %6703 = vmatpush3.bf16.msra.mxu0 %v6702_v54  ;;  %v6782_v54 = vpack.c.bf16 %v887_v46, %v886_v44  ;;  %v865_v46 = vld [vmem:[%s7810_s17 + $0x1058] sm:$0xff] }
 0x140   : > { %6735 = vmatpush3.bf16.msra.mxu1 %v6734_v56  ;;  %6705 = vmatprep.subr.bf16.mxu0 %v6704_v35  ;;  %v6752_v56 = vpack.c.bf16 %v873_v42, %v872_v48  ;;  %v856_v35 = vld [vmem:[%s7810_s17 + $0x1010] sm:$0xff] }
 0x141   : > { %v4910_v10 = vpop.f32.mrb[0].mxu0  ;;  %6737 = vmatprep.subr.bf16.mxu1 %v6736_v61  ;;  %v889_v61 = vld [vmem:[%s7810_s17 + $0x1118] sm:$0xff]  ;;  %v896_v48 = vld [vmem:[%s7810_s17 + $0x1150] sm:$0xff] }
 0x142   : > { %v4945_v16 = vpop.f32.mrb[0].mxu1  ;;  %v4911_v18 = vpop.f32.mrb[1].mxu0 }
 0x143   : > { %v4912_v22 = vadd.f32 %v4911_v18, %v4910_v10  ;;  %v4946_v17 = vpop.f32.mrb[1].mxu1  ;;  %6707 = vmatpush3.bf16.msra.mxu0 %v6706_v63  ;;  %v1729_v63 = vcombine.high %v8471_v52, %v8471_v52  ;;  %v6788_v10 = vpack.c.bf16 %v907_v4, %v906_v3  ;;  %v899_v3 = vld [vmem:[%s7810_s17 + $0x1168] sm:$0xff]  ;;  %v884_v4 = vld [vmem:[%s7810_s17 + $0x10f0] sm:$0xff] }
 0x144   : > { %v4947_v20 = vadd.f32 %v4946_v17, %v4945_v16  ;;  %6739 = vmatpush3.bf16.msra.mxu1 %v6738_v5  ;;  %6709 = vmatprep.subr.bf16.mxu0 %v6708_v6  ;;  %v6754_v5 = vpack.c.bf16 %v857_v57, %v856_v35  ;;  %v6786_v6 = vpack.c.bf16 %v889_v61, %v888_v58  ;;  %v892_v17 = vld [vmem:[%s7810_s17 + $0x1130] sm:$0xff]  ;;  %v867_v61 = vld [vmem:[%s7810_s17 + $0x1068] sm:$0xff] }
 0x145   : > { %6741 = vmatprep.subr.bf16.mxu1 %v6740_v11  ;;  %v891_v11 = vld [vmem:[%s7810_s17 + $0x1128] sm:$0xff]  ;;  %v6794_v29 = vpack.c.bf16 %v893_v25, %v892_v17  ;;  %v6802_v57 = vpack.c.bf16 %v897_v50, %v896_v48  ;;  %v6806_v13 = vpack.c.bf16 %v899_v3, %v898_v62  ;;  %v934_v17 = vld [vmem:[%s7810_s17 + $0x1280] sm:$0xff]  ;;  %v952_v48 = vld [vmem:[%s7810_s17 + $0x1310] sm:$0xff] }
 0x146   : > { %v8455_v34 = vadd.f32 %v4947_v20, %v4912_v22  ;;  %v6790_v18 = vpack.c.bf16 %v891_v11, %v890_v9  ;;  %v861_v22 = vld [vmem:[%s7810_s17 + $0x1038] sm:$0xff]  ;;  %v878_v20 = vld [vmem:[%s7810_s17 + $0x10c0] sm:$0xff]  ;;  %v955_v3 = vld [vmem:[%s7810_s17 + $0x1328] sm:$0xff] }
 0x147   : > { %6711 = vmatpush3.bf16.msra.mxu0 %v6710_v24  ;;  %v6762_v28 = vpack.c.bf16 %v861_v22, %v860_v21  ;;  %v332_v11 = vld [vmem:[%s7834_s14 + $0x48] sm:$0xff]  ;;  %v901_v22 = vld [vmem:[%s7810_s17 + $0x1178] sm:$0xff] }
 0x148   : > { %6743 = vmatpush3.bf16.msra.mxu1 %v6742_v26  ;;  %6713 = vmatprep.subr.bf16.mxu0 %v6712_v27  ;;  %v879_v26 = vld [vmem:[%s7810_s17 + $0x10c8] sm:$0xff]  ;;  %v910_v27 = vld [vmem:[%s7810_s17 + $0x11c0] sm:$0xff]  ;;  %v953_v50 = vld [vmem:[%s7810_s17 + $0x1318] sm:$0xff] }
 0x149   : > { %6745 = vmatprep.subr.bf16.mxu1 %v6744_v30  ;;  %v6764_v30 = vpack.c.bf16 %v879_v26, %v878_v20  ;;  %v6796_v36 = vpack.c.bf16 %v911_v23, %v910_v27  ;;  %v966_v25 = vld [vmem:[%s7810_s17 + $0x1380] sm:$0xff]  ;;  %v967_v20 = vld [vmem:[%s7810_s17 + $0x1388] sm:$0xff]  ;;  %v1730_v26 = vcombine.high %v332_v11, %v332_v11 }
 0x14a   : > { %v6844_v32 = vpack.c.bf16 %v967_v20, %v966_v25  ;;  %v922_v62 = vld [vmem:[%s7810_s17 + $0x1220] sm:$0xff]  ;;  %v959_v20 = vld [vmem:[%s7810_s17 + $0x1348] sm:$0xff] }
 0x14b   : > { %6715 = vmatpush3.bf16.msra.mxu0 %v6714_v39  ;;  %v881_v39 = vld [vmem:[%s7810_s17 + $0x10d8] sm:$0xff] }
 0x14c   : > { %6747 = vmatpush3.bf16.msra.mxu1 %v6746_v40  ;;  %6749 = vmatprep.subr.bf16.mxu0 %v6748_v41  ;;  %v912_v40 = vld [vmem:[%s7810_s17 + $0x11d0] sm:$0xff]  ;;  %v913_v41 = vld [vmem:[%s7810_s17 + $0x11d8] sm:$0xff]  ;;  %v6768_v44 = vpack.c.bf16 %v881_v39, %v880_v38  ;;  %v8546_v38 = vrot.slane %v332_v11, %v7896_v14 }
 0x14d   : > { %6781 = vmatprep.subr.bf16.mxu1 %v6780_v55  ;;  %v864_v55 = vld [vmem:[%s7810_s17 + $0x1050] sm:$0xff]  ;;  %v6800_v42 = vpack.c.bf16 %v913_v41, %v912_v40  ;;  %v969_v40 = vld [vmem:[%s7810_s17 + $0x1398] sm:$0xff]  ;;  %v8551_v41 = vrot.slane %v1730_v26, %v7896_v14 }
 0x14e   : > { %3021 = vmatmul.mubr.f32.vlgmr.msra.gmra.mrb[14].mxu0 %v8387_v60  ;;  %v859_v60 = vld [vmem:[%s7810_s17 + $0x1028] sm:$0xff]  ;;  %v6770_v35 = vpack.c.bf16 %v865_v46, %v864_v55  ;;  %v968_v39 = vld [vmem:[%s7810_s17 + $0x1390] sm:$0xff]  ;;  %v921_v46 = vld [vmem:[%s7810_s17 + $0x1218] sm:$0xff] }
 0x14f   : > { %6751 = vmatpush3.bf16.msra.mxu0 %v6750_v53  ;;  %3091 = vmatmul.mubr.f32.vlgmr.msra.gmra.mrb[14].mxu1 %v8392_v2  ;;  %v908_v2 = vld [vmem:[%s7810_s17 + $0x11b0] sm:$0xff]  ;;  %v6758_v16 = vpack.c.bf16 %v859_v60, %v858_v8  ;;  %v883_v53 = vld [vmem:[%s7810_s17 + $0x10e8] sm:$0xff]  ;;  %v917_v8 = vld [vmem:[%s7810_s17 + $0x11f8] sm:$0xff] }
 0x150   : > { %6783 = vmatpush3.bf16.msra.mxu1 %v6782_v54  ;;  %6753 = vmatprep.subr.bf16.mxu0 %v6752_v56  ;;  %v6792_v24 = vpack.c.bf16 %v909_v15, %v908_v2  ;;  %v914_v54 = vld [vmem:[%s7810_s17 + $0x11e0] sm:$0xff]  ;;  %v915_v56 = vld [vmem:[%s7810_s17 + $0x11e8] sm:$0xff]  ;;  %v6772_v58 = vpack.c.bf16 %v883_v53, %v882_v51  ;;  %v868_v15 = vld [vmem:[%s7810_s17 + $0x1070] sm:$0xff] }
 0x151   : > { %6785 = vmatprep.subr.bf16.mxu1 %v6784_v59  ;;  %3160 = vmatprep.mubr.f32.mxu0 %v1728_v0  ;;  %v866_v59 = vld [vmem:[%s7810_s17 + $0x1060] sm:$0xff]  ;;  %v6804_v0 = vpack.c.bf16 %v915_v56, %v914_v54  ;;  %v920_v55 = vld [vmem:[%s7810_s17 + $0x1210] sm:$0xff]  ;;  %v939_v53 = vld [vmem:[%s7810_s17 + $0x12a8] sm:$0xff]  ;;  %v1745_v54 = vcombine.high %v8546_v38, %v8546_v38 }
 0x152   : > { %3230 = vmatprep.mubr.f32.mxu1 %v1729_v63  ;;  %v885_v63 = vld [vmem:[%s7810_s17 + $0x10f8] sm:$0xff]  ;;  %v938_v51 = vld [vmem:[%s7810_s17 + $0x12a0] sm:$0xff]  ;;  %v944_v26 = vld [vmem:[%s7810_s17 + $0x12d0] sm:$0xff] }
 0x153   : > { %6755 = vmatpush3.bf16.msra.mxu0 %v6754_v5  ;;  %v6776_v2 = vpack.c.bf16 %v885_v63, %v884_v4  ;;  %v970_v56 = vld [vmem:[%s7810_s17 + $0x13a0] sm:$0xff]  ;;  %v940_v4 = vld [vmem:[%s7810_s17 + $0x12b0] sm:$0xff]  ;;  %v941_v63 = vld [vmem:[%s7810_s17 + $0x12b8] sm:$0xff] }
 0x154   : > { %6787 = vmatpush3.bf16.msra.mxu1 %v6786_v6  ;;  %6757 = vmatprep.subr.bf16.mxu0 %v6756_v7  ;;  %v916_v7 = vld [vmem:[%s7810_s17 + $0x11f0] sm:$0xff] }
 0x155   : > { %6789 = vmatprep.subr.bf16.mxu1 %v6788_v10  ;;  %v6774_v10 = vpack.c.bf16 %v867_v61, %v866_v59  ;;  %v6808_v21 = vpack.c.bf16 %v917_v8, %v916_v7  ;;  %v6850_v59 = vpack.c.bf16 %v953_v50, %v952_v48  ;;  %v6820_v61 = vpack.c.bf16 %v939_v53, %v938_v51  ;;  %v931_v50 = vld [vmem:[%s7810_s17 + $0x1268] sm:$0xff]  ;;  %v962_v51 = vld [vmem:[%s7810_s17 + $0x1360] sm:$0xff] }
 0x156   : > { %v6824_v8 = vpack.c.bf16 %v941_v63, %v940_v4 }
 0x157   : > { %6759 = vmatpush3.bf16.msra.mxu0 %v6758_v16  ;;  %v869_v16 = vld [vmem:[%s7810_s17 + $0x1078] sm:$0xff] }
 0x158   : > { %6791 = vmatpush3.bf16.msra.mxu1 %v6790_v18  ;;  %6761 = vmatprep.subr.bf16.mxu0 %v6760_v19  ;;  %v900_v18 = vld [vmem:[%s7810_s17 + $0x1170] sm:$0xff] }
 0x159   : > { %6793 = vmatprep.subr.bf16.mxu1 %v6792_v24  ;;  %v935_v24 = vld [vmem:[%s7810_s17 + $0x1288] sm:$0xff]  ;;  %v6810_v23 = vpack.c.bf16 %v901_v22, %v900_v18  ;;  %v926_v22 = vld [vmem:[%s7810_s17 + $0x1240] sm:$0xff] }
 0x15b   : > { %6763 = vmatpush3.bf16.msra.mxu0 %v6762_v28  ;;  %v6812_v28 = vpack.c.bf16 %v935_v24, %v934_v17  ;;  %v927_v17 = vld [vmem:[%s7810_s17 + $0x1248] sm:$0xff]  ;;  %v958_v24 = vld [vmem:[%s7810_s17 + $0x1340] sm:$0xff] }
 0x15c   : > { %6795 = vmatpush3.bf16.msra.mxu1 %v6794_v29  ;;  %6765 = vmatprep.subr.bf16.mxu0 %v6764_v30  ;;  %v918_v29 = vld [vmem:[%s7810_s17 + $0x1200] sm:$0xff]  ;;  %v919_v30 = vld [vmem:[%s7810_s17 + $0x1208] sm:$0xff] }
 0x15d   : > { %6797 = vmatprep.subr.bf16.mxu1 %v6796_v36  ;;  %v936_v36 = vld [vmem:[%s7810_s17 + $0x1290] sm:$0xff] }
 0x15f   : > { %6767 = vmatpush3.bf16.msra.mxu0 %v6766_v45  ;;  %v6814_v45 = vpack.c.bf16 %v919_v30, %v918_v29  ;;  %v6830_v29 = vpack.c.bf16 %v927_v17, %v926_v22  ;;  %v6862_v30 = vpack.c.bf16 %v959_v20, %v958_v24  ;;  %v1014_v22 = vld [vmem:[%s7810_s17 + $0x1500] sm:$0xff]  ;;  %v1015_v24 = vld [vmem:[%s7810_s17 + $0x1508] sm:$0xff]  ;;  %v1001_v20 = vld [vmem:[%s7810_s17 + $0x1498] sm:$0xff] }
 0x160   : > { %6799 = vmatpush3.bf16.msra.mxu1 %v6798_v43  ;;  %6769 = vmatprep.subr.bf16.mxu0 %v6768_v44  ;;  %v6846_v43 = vpack.c.bf16 %v951_v33, %v950_v31  ;;  %v6816_v44 = vpack.c.bf16 %v937_v37, %v936_v36  ;;  %v929_v33 = vld [vmem:[%s7810_s17 + $0x1258] sm:$0xff]  ;;  %v960_v36 = vld [vmem:[%s7810_s17 + $0x1350] sm:$0xff] }
 0x161   : > { %v4980_v47 = vpop.f32.mrb[2].mxu0  ;;  %6801 = vmatprep.subr.bf16.mxu1 %v6800_v42  ;;  %v6848_v42 = vpack.c.bf16 %v969_v40, %v968_v39  ;;  %v961_v39 = vld [vmem:[%s7810_s17 + $0x1358] sm:$0xff]  ;;  %v946_v40 = vld [vmem:[%s7810_s17 + $0x12e0] sm:$0xff] }
 0x162   : > { %v4981_v5 = vpop.f32.mrb[3].mxu0  ;;  %v5015_v6 = vpop.f32.mrb[2].mxu1 }
 0x163   : > { %v4982_v60 = vadd.f32 %v4981_v5, %v4980_v47  ;;  %6771 = vmatpush3.bf16.msra.mxu0 %v6770_v35  ;;  %v5016_v9 = vpop.f32.mrb[3].mxu1  ;;  %v971_v35 = vld [vmem:[%s7810_s17 + $0x13a8] sm:$0xff]  ;;  %v954_v47 = vld [vmem:[%s7810_s17 + $0x1320] sm:$0xff]  ;;  %v973_v5 = vld [vmem:[%s7810_s17 + $0x13b8] sm:$0xff] }
 0x164   : > { %v5017_v12 = vadd.f32 %v5016_v9, %v5015_v6  ;;  %6803 = vmatpush3.bf16.msra.mxu1 %v6802_v57  ;;  %6773 = vmatprep.subr.bf16.mxu0 %v6772_v58  ;;  %v1746_v57 = vcombine.high %v8551_v41, %v8551_v41  ;;  %v6818_v58 = vpack.c.bf16 %v921_v46, %v920_v55  ;;  %v925_v9 = vld [vmem:[%s7810_s17 + $0x1238] sm:$0xff] }
 0x165   : > { %v2183_v19 = vadd.f32 %v4982_v60, %v8455_v34  ;;  %6805 = vmatprep.subr.bf16.mxu1 %v6804_v0  ;;  %v6778_v34 = vpack.c.bf16 %v869_v16, %v868_v15  ;;  %v6852_v0 = vpack.c.bf16 %v971_v35, %v970_v56  ;;  %v6854_v7 = vpack.c.bf16 %v955_v3, %v954_v47  ;;  %v924_v60 = vld [vmem:[%s7810_s17 + $0x1230] sm:$0xff]  ;;  %v974_v15 = vld [vmem:[%s7810_s17 + $0x13c0] sm:$0xff]  ;;  %v975_v16 = vld [vmem:[%s7810_s17 + $0x13c8] sm:$0xff] }
 0x166   : > { %v6826_v18 = vpack.c.bf16 %v925_v9, %v924_v60  ;;  %v6860_v25 = vpack.c.bf16 %v975_v16, %v974_v15  ;;  %v6866_v46 = vpack.c.bf16 %v961_v39, %v960_v36  ;;  %v963_v56 = vld [vmem:[%s7810_s17 + $0x1368] sm:$0xff]  ;;  %v948_v35 = vld [vmem:[%s7810_s17 + $0x12f0] sm:$0xff]  ;;  %v965_v9 = vld [vmem:[%s7810_s17 + $0x1378] sm:$0xff] }
 0x167   : > { %v8537_v27 = vadd.f32 %v5017_v12, %v2183_v19  ;;  %6775 = vmatpush3.bf16.msra.mxu0 %v6774_v10  ;;  %v956_v10 = vld [vmem:[%s7810_s17 + $0x1330] sm:$0xff]  ;;  %v957_v12 = vld [vmem:[%s7810_s17 + $0x1338] sm:$0xff]  ;;  %v6870_v63 = vpack.c.bf16 %v963_v56, %v962_v51  ;;  %v986_v51 = vld [vmem:[%s7810_s17 + $0x1420] sm:$0xff] }
 0x168   : > { %6807 = vmatpush3.bf16.msra.mxu1 %v6806_v13  ;;  %6777 = vmatprep.subr.bf16.mxu0 %v6776_v2  ;;  %v942_v13 = vld [vmem:[%s7810_s17 + $0x12c0] sm:$0xff]  ;;  %v943_v2 = vld [vmem:[%s7810_s17 + $0x12c8] sm:$0xff]  ;;  %v6858_v19 = vpack.c.bf16 %v957_v12, %v956_v10  ;;  %v1016_v36 = vld [vmem:[%s7810_s17 + $0x1510] sm:$0xff] }
 0x169   : > { %6809 = vmatprep.subr.bf16.mxu1 %v6808_v21  ;;  %v6828_v21 = vpack.c.bf16 %v943_v2, %v942_v13  ;;  %v333_v3 = vld [vmem:[%s7834_s14 + $0x50] sm:$0xff]  ;;  %v998_v10 = vld [vmem:[%s7810_s17 + $0x1480] sm:$0xff]  ;;  %v1017_v39 = vld [vmem:[%s7810_s17 + $0x1518] sm:$0xff] }
 0x16a   : > { %v1030_v12 = vld [vmem:[%s7810_s17 + $0x1580] sm:$0xff]  ;;  %v1031_v13 = vld [vmem:[%s7810_s17 + $0x1588] sm:$0xff]  ;;  %v1747_v2 = vcombine.high %v333_v3, %v333_v3 }
 0x16b   : > { %6779 = vmatpush3.bf16.msra.mxu0 %v6778_v34  ;;  %v945_v34 = vld [vmem:[%s7810_s17 + $0x12d8] sm:$0xff]  ;;  %v6908_v17 = vpack.c.bf16 %v1031_v13, %v1030_v12  ;;  %v1019_v56 = vld [vmem:[%s7810_s17 + $0x1528] sm:$0xff] }
 0x16c   : > { %6811 = vmatpush3.bf16.msra.mxu1 %v6810_v23  ;;  %6813 = vmatprep.subr.bf16.mxu0 %v6812_v28  ;;  %v976_v23 = vld [vmem:[%s7810_s17 + $0x13d0] sm:$0xff]  ;;  %v977_v28 = vld [vmem:[%s7810_s17 + $0x13d8] sm:$0xff]  ;;  %v6832_v31 = vpack.c.bf16 %v945_v34, %v944_v26  ;;  %v8626_v26 = vrot.slane %v333_v3, %v7896_v14  ;;  %v1023_v13 = vld [vmem:[%s7810_s17 + $0x1548] sm:$0xff] }
 0x16d   : > { %6845 = vmatprep.subr.bf16.mxu1 %v6844_v32  ;;  %v928_v32 = vld [vmem:[%s7810_s17 + $0x1250] sm:$0xff]  ;;  %v6864_v37 = vpack.c.bf16 %v977_v28, %v976_v23  ;;  %v1033_v23 = vld [vmem:[%s7810_s17 + $0x1598] sm:$0xff]  ;;  %v8631_v28 = vrot.slane %v1747_v2, %v7896_v14 }
 0x16e   : > { %3161 = vmatmul.mubr.f32.vlgmr.msra.gmra.mrb[16].mxu0 %v8466_v49  ;;  %v923_v49 = vld [vmem:[%s7810_s17 + $0x1228] sm:$0xff]  ;;  %v6834_v55 = vpack.c.bf16 %v929_v33, %v928_v32  ;;  %v1032_v34 = vld [vmem:[%s7810_s17 + $0x1590] sm:$0xff]  ;;  %v985_v33 = vld [vmem:[%s7810_s17 + $0x1418] sm:$0xff] }
 0x16f   : > { %6815 = vmatpush3.bf16.msra.mxu0 %v6814_v45  ;;  %3231 = vmatmul.mubr.f32.vlgmr.msra.gmra.mrb[16].mxu1 %v8471_v52  ;;  %v972_v52 = vld [vmem:[%s7810_s17 + $0x13b0] sm:$0xff]  ;;  %v6822_v6 = vpack.c.bf16 %v923_v49, %v922_v62  ;;  %v947_v45 = vld [vmem:[%s7810_s17 + $0x12e8] sm:$0xff]  ;;  %v981_v62 = vld [vmem:[%s7810_s17 + $0x13f8] sm:$0xff] }
 0x170   : > { %6847 = vmatpush3.bf16.msra.mxu1 %v6846_v43  ;;  %6817 = vmatprep.subr.bf16.mxu0 %v6816_v44  ;;  %v6856_v11 = vpack.c.bf16 %v973_v5, %v972_v52  ;;  %v978_v43 = vld [vmem:[%s7810_s17 + $0x13e0] sm:$0xff]  ;;  %v979_v44 = vld [vmem:[%s7810_s17 + $0x13e8] sm:$0xff]  ;;  %v6836_v48 = vpack.c.bf16 %v947_v45, %v946_v40  ;;  %v932_v5 = vld [vmem:[%s7810_s17 + $0x1270] sm:$0xff] }
 0x171   : > { %6849 = vmatprep.subr.bf16.mxu1 %v6848_v42  ;;  %3300 = vmatprep.mubr.f32.mxu0 %v1745_v54  ;;  %v930_v42 = vld [vmem:[%s7810_s17 + $0x1260] sm:$0xff]  ;;  %v6868_v54 = vpack.c.bf16 %v979_v44, %v978_v43  ;;  %v984_v32 = vld [vmem:[%s7810_s17 + $0x1410] sm:$0xff]  ;;  %v1003_v45 = vld [vmem:[%s7810_s17 + $0x14a8] sm:$0xff]  ;;  %v1762_v43 = vcombine.high %v8626_v26, %v8626_v26 }
 0x172   : > { %3370 = vmatprep.mubr.f32.mxu1 %v1746_v57  ;;  %v949_v57 = vld [vmem:[%s7810_s17 + $0x12f8] sm:$0xff]  ;;  %v1002_v40 = vld [vmem:[%s7810_s17 + $0x14a0] sm:$0xff]  ;;  %v1008_v2 = vld [vmem:[%s7810_s17 + $0x14d0] sm:$0xff] }
 0x173   : > { %6819 = vmatpush3.bf16.msra.mxu0 %v6818_v58  ;;  %v6840_v52 = vpack.c.bf16 %v949_v57, %v948_v35  ;;  %v1034_v44 = vld [vmem:[%s7810_s17 + $0x15a0] sm:$0xff]  ;;  %v1004_v35 = vld [vmem:[%s7810_s17 + $0x14b0] sm:$0xff]  ;;  %v1005_v57 = vld [vmem:[%s7810_s17 + $0x14b8] sm:$0xff] }
 0x174   : > { %6851 = vmatpush3.bf16.msra.mxu1 %v6850_v59  ;;  %6821 = vmatprep.subr.bf16.mxu0 %v6820_v61  ;;  %v980_v61 = vld [vmem:[%s7810_s17 + $0x13f0] sm:$0xff] }
 0x175   : > { %6853 = vmatprep.subr.bf16.mxu1 %v6852_v0  ;;  %v6838_v0 = vpack.c.bf16 %v931_v50, %v930_v42  ;;  %v6872_v60 = vpack.c.bf16 %v981_v62, %v980_v61  ;;  %v6914_v42 = vpack.c.bf16 %v1017_v39, %v1016_v36  ;;  %v6884_v50 = vpack.c.bf16 %v1003_v45, %v1002_v40  ;;  %v995_v39 = vld [vmem:[%s7810_s17 + $0x1468] sm:$0xff]  ;;  %v1026_v40 = vld [vmem:[%s7810_s17 + $0x1560] sm:$0xff] }
 0x176   : > { %v6888_v62 = vpack.c.bf16 %v1005_v57, %v1004_v35 }
 0x177   : > { %6823 = vmatpush3.bf16.msra.mxu0 %v6822_v6  ;;  %v933_v6 = vld [vmem:[%s7810_s17 + $0x1278] sm:$0xff] }
 0x178   : > { %6855 = vmatpush3.bf16.msra.mxu1 %v6854_v7  ;;  %6825 = vmatprep.subr.bf16.mxu0 %v6824_v8  ;;  %v964_v7 = vld [vmem:[%s7810_s17 + $0x1370] sm:$0xff] }
 0x179   : > { %6857 = vmatprep.subr.bf16.mxu1 %v6856_v11  ;;  %v999_v11 = vld [vmem:[%s7810_s17 + $0x1488] sm:$0xff]  ;;  %v6874_v16 = vpack.c.bf16 %v965_v9, %v964_v7  ;;  %v990_v9 = vld [vmem:[%s7810_s17 + $0x1440] sm:$0xff] }
 0x17b   : > { %6827 = vmatpush3.bf16.msra.mxu0 %v6826_v18  ;;  %v6876_v18 = vpack.c.bf16 %v999_v11, %v998_v10  ;;  %v991_v10 = vld [vmem:[%s7810_s17 + $0x1448] sm:$0xff]  ;;  %v1022_v11 = vld [vmem:[%s7810_s17 + $0x1540] sm:$0xff] }
 0x17c   : > { %6859 = vmatpush3.bf16.msra.mxu1 %v6858_v19  ;;  %6829 = vmatprep.subr.bf16.mxu0 %v6828_v21  ;;  %v982_v19 = vld [vmem:[%s7810_s17 + $0x1400] sm:$0xff]  ;;  %v983_v21 = vld [vmem:[%s7810_s17 + $0x1408] sm:$0xff] }
 0x17d   : > { %6861 = vmatprep.subr.bf16.mxu1 %v6860_v25  ;;  %v1000_v25 = vld [vmem:[%s7810_s17 + $0x1490] sm:$0xff] }
 0x17f   : > { %6831 = vmatpush3.bf16.msra.mxu0 %v6830_v29  ;;  %v6878_v29 = vpack.c.bf16 %v983_v21, %v982_v19  ;;  %v6894_v19 = vpack.c.bf16 %v991_v10, %v990_v9  ;;  %v6926_v21 = vpack.c.bf16 %v1023_v13, %v1022_v11  ;;  %v1078_v9 = vld [vmem:[%s7810_s17 + $0x1700] sm:$0xff]  ;;  %v1079_v11 = vld [vmem:[%s7810_s17 + $0x1708] sm:$0xff]  ;;  %v1065_v13 = vld [vmem:[%s7810_s17 + $0x1698] sm:$0xff] }
 0x180   : > { %6863 = vmatpush3.bf16.msra.mxu1 %v6862_v30  ;;  %6833 = vmatprep.subr.bf16.mxu0 %v6832_v31  ;;  %v6910_v30 = vpack.c.bf16 %v1015_v24, %v1014_v22  ;;  %v6880_v31 = vpack.c.bf16 %v1001_v20, %v1000_v25  ;;  %v993_v24 = vld [vmem:[%s7810_s17 + $0x1458] sm:$0xff]  ;;  %v1024_v25 = vld [vmem:[%s7810_s17 + $0x1550] sm:$0xff] }
 0x181   : > { %v5050_v53 = vpop.f32.mrb[4].mxu0  ;;  %6865 = vmatprep.subr.bf16.mxu1 %v6864_v37  ;;  %v6912_v37 = vpack.c.bf16 %v1033_v23, %v1032_v34  ;;  %v1025_v34 = vld [vmem:[%s7810_s17 + $0x1558] sm:$0xff]  ;;  %v1010_v23 = vld [vmem:[%s7810_s17 + $0x14e0] sm:$0xff] }
 0x182   : > { %v5051_v58 = vpop.f32.mrb[5].mxu0  ;;  %v5085_v59 = vpop.f32.mrb[4].mxu1 }
 0x183   : > { %v5052_v49 = vadd.f32 %v5051_v58, %v5050_v53  ;;  %6835 = vmatpush3.bf16.msra.mxu0 %v6834_v55  ;;  %v5086_v47 = vpop.f32.mrb[5].mxu1  ;;  %v1035_v55 = vld [vmem:[%s7810_s17 + $0x15a8] sm:$0xff]  ;;  %v1018_v53 = vld [vmem:[%s7810_s17 + $0x1520] sm:$0xff]  ;;  %v1037_v58 = vld [vmem:[%s7810_s17 + $0x15b8] sm:$0xff] }
 0x184   : > { %v5087_v4 = vadd.f32 %v5086_v47, %v5085_v59  ;;  %6867 = vmatpush3.bf16.msra.mxu1 %v6866_v46  ;;  %6837 = vmatprep.subr.bf16.mxu0 %v6836_v48  ;;  %v1763_v46 = vcombine.high %v8631_v28, %v8631_v28  ;;  %v6882_v48 = vpack.c.bf16 %v985_v33, %v984_v32  ;;  %v989_v47 = vld [vmem:[%s7810_s17 + $0x1438] sm:$0xff] }
 0x185   : > { %v2323_v8 = vadd.f32 %v5052_v49, %v8537_v27  ;;  %6869 = vmatprep.subr.bf16.mxu1 %v6868_v54  ;;  %v6842_v27 = vpack.c.bf16 %v933_v6, %v932_v5  ;;  %v6916_v54 = vpack.c.bf16 %v1035_v55, %v1034_v44  ;;  %v6918_v61 = vpack.c.bf16 %v1019_v56, %v1018_v53  ;;  %v988_v49 = vld [vmem:[%s7810_s17 + $0x1430] sm:$0xff]  ;;  %v1038_v5 = vld [vmem:[%s7810_s17 + $0x15c0] sm:$0xff]  ;;  %v1039_v6 = vld [vmem:[%s7810_s17 + $0x15c8] sm:$0xff] }
 0x186   : > { %v6890_v7 = vpack.c.bf16 %v989_v47, %v988_v49  ;;  %v6924_v12 = vpack.c.bf16 %v1039_v6, %v1038_v5  ;;  %v6930_v33 = vpack.c.bf16 %v1025_v34, %v1024_v25  ;;  %v1027_v44 = vld [vmem:[%s7810_s17 + $0x1568] sm:$0xff]  ;;  %v1012_v55 = vld [vmem:[%s7810_s17 + $0x14f0] sm:$0xff]  ;;  %v1029_v47 = vld [vmem:[%s7810_s17 + $0x1578] sm:$0xff] }
 0x187   : > { %v8617_v15 = vadd.f32 %v5087_v4, %v2323_v8  ;;  %6839 = vmatpush3.bf16.msra.mxu0 %v6838_v0  ;;  %v1020_v0 = vld [vmem:[%s7810_s17 + $0x1530] sm:$0xff]  ;;  %v1021_v4 = vld [vmem:[%s7810_s17 + $0x1538] sm:$0xff]  ;;  %v6934_v57 = vpack.c.bf16 %v1027_v44, %v1026_v40  ;;  %v1050_v40 = vld [vmem:[%s7810_s17 + $0x1620] sm:$0xff] }
 0x188   : > { %6871 = vmatpush3.bf16.msra.mxu1 %v6870_v63  ;;  %6841 = vmatprep.subr.bf16.mxu0 %v6840_v52  ;;  %v1006_v63 = vld [vmem:[%s7810_s17 + $0x14c0] sm:$0xff]  ;;  %v1007_v52 = vld [vmem:[%s7810_s17 + $0x14c8] sm:$0xff]  ;;  %v6922_v8 = vpack.c.bf16 %v1021_v4, %v1020_v0  ;;  %v334_v56 = vld [vmem:[%s7834_s14 + $0x58] sm:$0xff] }
 0x189   : > { %6873 = vmatprep.subr.bf16.mxu1 %v6872_v60  ;;  %v6892_v60 = vpack.c.bf16 %v1007_v52, %v1006_v63  ;;  %v1062_v0 = vld [vmem:[%s7810_s17 + $0x1680] sm:$0xff]  ;;  %v1095_v63 = vld [vmem:[%s7810_s17 + $0x1788] sm:$0xff]  ;;  %v1764_v52 = vcombine.high %v334_v56, %v334_v56  ;;  %v1080_v25 = vld [vmem:[%s7810_s17 + $0x1710] sm:$0xff] }
 0x18a   : > { %v1094_v4 = vld [vmem:[%s7810_s17 + $0x1780] sm:$0xff]  ;;  %v1081_v34 = vld [vmem:[%s7810_s17 + $0x1718] sm:$0xff]  ;;  %v1083_v44 = vld [vmem:[%s7810_s17 + $0x1728] sm:$0xff] }
 0x18b   : > { %6843 = vmatpush3.bf16.msra.mxu0 %v6842_v27  ;;  %v1009_v27 = vld [vmem:[%s7810_s17 + $0x14d8] sm:$0xff]  ;;  %v6972_v10 = vpack.c.bf16 %v1095_v63, %v1094_v4  ;;  %v1087_v63 = vld [vmem:[%s7810_s17 + $0x1748] sm:$0xff] }
 0x18c   : > { %6875 = vmatpush3.bf16.msra.mxu1 %v6874_v16  ;;  %6877 = vmatprep.subr.bf16.mxu0 %v6876_v18  ;;  %v1040_v16 = vld [vmem:[%s7810_s17 + $0x15d0] sm:$0xff]  ;;  %v1041_v18 = vld [vmem:[%s7810_s17 + $0x15d8] sm:$0xff]  ;;  %v6896_v22 = vpack.c.bf16 %v1009_v27, %v1008_v2  ;;  %v8706_v2 = vrot.slane %v334_v56, %v7896_v14 }
 0x18d   : > { %6909 = vmatprep.subr.bf16.mxu1 %v6908_v17  ;;  %v992_v17 = vld [vmem:[%s7810_s17 + $0x1450] sm:$0xff]  ;;  %v6928_v20 = vpack.c.bf16 %v1041_v18, %v1040_v16  ;;  %v1097_v16 = vld [vmem:[%s7810_s17 + $0x1798] sm:$0xff]  ;;  %v8711_v18 = vrot.slane %v1764_v52, %v7896_v14 }
 0x18e   : > { %3301 = vmatmul.mubr.f32.vlgmr.msra.gmra.mrb[18].mxu0 %v8546_v38  ;;  %v987_v38 = vld [vmem:[%s7810_s17 + $0x1428] sm:$0xff]  ;;  %v6898_v32 = vpack.c.bf16 %v993_v24, %v992_v17  ;;  %v1096_v27 = vld [vmem:[%s7810_s17 + $0x1790] sm:$0xff]  ;;  %v1049_v24 = vld [vmem:[%s7810_s17 + $0x1618] sm:$0xff] }
 0x18f   : > { %6879 = vmatpush3.bf16.msra.mxu0 %v6878_v29  ;;  %3371 = vmatmul.mubr.f32.vlgmr.msra.gmra.mrb[18].mxu1 %v8551_v41  ;;  %v1036_v41 = vld [vmem:[%s7810_s17 + $0x15b0] sm:$0xff]  ;;  %v6886_v59 = vpack.c.bf16 %v987_v38, %v986_v51  ;;  %v1011_v29 = vld [vmem:[%s7810_s17 + $0x14e8] sm:$0xff]  ;;  %v1045_v51 = vld [vmem:[%s7810_s17 + $0x15f8] sm:$0xff] }
 0x190   : > { %6911 = vmatpush3.bf16.msra.mxu1 %v6910_v30  ;;  %6881 = vmatprep.subr.bf16.mxu0 %v6880_v31  ;;  %v6920_v3 = vpack.c.bf16 %v1037_v58, %v1036_v41  ;;  %v1042_v30 = vld [vmem:[%s7810_s17 + $0x15e0] sm:$0xff]  ;;  %v1043_v31 = vld [vmem:[%s7810_s17 + $0x15e8] sm:$0xff]  ;;  %v6900_v36 = vpack.c.bf16 %v1011_v29, %v1010_v23  ;;  %v996_v58 = vld [vmem:[%s7810_s17 + $0x1470] sm:$0xff] }
 0x191   : > { %6913 = vmatprep.subr.bf16.mxu1 %v6912_v37  ;;  %3440 = vmatprep.mubr.f32.mxu0 %v1762_v43  ;;  %v994_v37 = vld [vmem:[%s7810_s17 + $0x1460] sm:$0xff]  ;;  %v6932_v43 = vpack.c.bf16 %v1043_v31, %v1042_v30  ;;  %v1048_v17 = vld [vmem:[%s7810_s17 + $0x1610] sm:$0xff]  ;;  %v1067_v29 = vld [vmem:[%s7810_s17 + $0x16a8] sm:$0xff]  ;;  %v1779_v30 = vcombine.high %v8706_v2, %v8706_v2 }
 0x192   : > { %3510 = vmatprep.mubr.f32.mxu1 %v1763_v46  ;;  %v1013_v46 = vld [vmem:[%s7810_s17 + $0x14f8] sm:$0xff]  ;;  %v1066_v23 = vld [vmem:[%s7810_s17 + $0x16a0] sm:$0xff]  ;;  %v1072_v52 = vld [vmem:[%s7810_s17 + $0x16d0] sm:$0xff] }
 0x193   : > { %6883 = vmatpush3.bf16.msra.mxu0 %v6882_v48  ;;  %v6904_v41 = vpack.c.bf16 %v1013_v46, %v1012_v55  ;;  %v1098_v31 = vld [vmem:[%s7810_s17 + $0x17a0] sm:$0xff]  ;;  %v1068_v55 = vld [vmem:[%s7810_s17 + $0x16b0] sm:$0xff]  ;;  %v1069_v46 = vld [vmem:[%s7810_s17 + $0x16b8] sm:$0xff] }
 0x194   : > { %6915 = vmatpush3.bf16.msra.mxu1 %v6914_v42  ;;  %6885 = vmatprep.subr.bf16.mxu0 %v6884_v50  ;;  %v1044_v50 = vld [vmem:[%s7810_s17 + $0x15f0] sm:$0xff] }
 0x195   : > { %6917 = vmatprep.subr.bf16.mxu1 %v6916_v54  ;;  %v6902_v54 = vpack.c.bf16 %v995_v39, %v994_v37  ;;  %v6936_v49 = vpack.c.bf16 %v1045_v51, %v1044_v50  ;;  %v6978_v37 = vpack.c.bf16 %v1081_v34, %v1080_v25  ;;  %v6948_v39 = vpack.c.bf16 %v1067_v29, %v1066_v23  ;;  %v1059_v34 = vld [vmem:[%s7810_s17 + $0x1668] sm:$0xff]  ;;  %v1090_v23 = vld [vmem:[%s7810_s17 + $0x1760] sm:$0xff] }
 0x196   : > { %v6952_v51 = vpack.c.bf16 %v1069_v46, %v1068_v55 }
 0x197   : > { %6887 = vmatpush3.bf16.msra.mxu0 %v6886_v59  ;;  %v997_v59 = vld [vmem:[%s7810_s17 + $0x1478] sm:$0xff] }
 0x198   : > { %6919 = vmatpush3.bf16.msra.mxu1 %v6918_v61  ;;  %6889 = vmatprep.subr.bf16.mxu0 %v6888_v62  ;;  %v1028_v61 = vld [vmem:[%s7810_s17 + $0x1570] sm:$0xff] }
 0x199   : > { %6921 = vmatprep.subr.bf16.mxu1 %v6920_v3  ;;  %v1063_v3 = vld [vmem:[%s7810_s17 + $0x1688] sm:$0xff]  ;;  %v6938_v6 = vpack.c.bf16 %v1029_v47, %v1028_v61  ;;  %v1054_v47 = vld [vmem:[%s7810_s17 + $0x1640] sm:$0xff] }
 0x19b   : > { %6891 = vmatpush3.bf16.msra.mxu0 %v6890_v7  ;;  %v6940_v7 = vpack.c.bf16 %v1063_v3, %v1062_v0  ;;  %v1055_v0 = vld [vmem:[%s7810_s17 + $0x1648] sm:$0xff]  ;;  %v1086_v3 = vld [vmem:[%s7810_s17 + $0x1740] sm:$0xff] }
 0x19c   : > { %6923 = vmatpush3.bf16.msra.mxu1 %v6922_v8  ;;  %6893 = vmatprep.subr.bf16.mxu0 %v6892_v60  ;;  %v1046_v8 = vld [vmem:[%s7810_s17 + $0x1600] sm:$0xff]  ;;  %v1047_v60 = vld [vmem:[%s7810_s17 + $0x1608] sm:$0xff] }
 0x19d   : > { %6925 = vmatprep.subr.bf16.mxu1 %v6924_v12  ;;  %v1064_v12 = vld [vmem:[%s7810_s17 + $0x1690] sm:$0xff] }
 0x19f   : > { %6895 = vmatpush3.bf16.msra.mxu0 %v6894_v19  ;;  %v6942_v19 = vpack.c.bf16 %v1047_v60, %v1046_v8  ;;  %v6958_v8 = vpack.c.bf16 %v1055_v0, %v1054_v47  ;;  %v6990_v60 = vpack.c.bf16 %v1087_v63, %v1086_v3  ;;  %v1142_v47 = vld [vmem:[%s7810_s17 + $0x1900] sm:$0xff]  ;;  %v1143_v3 = vld [vmem:[%s7810_s17 + $0x1908] sm:$0xff]  ;;  %v1129_v63 = vld [vmem:[%s7810_s17 + $0x1898] sm:$0xff] }
 0x1a0   : > { %6927 = vmatpush3.bf16.msra.mxu1 %v6926_v21  ;;  %6897 = vmatprep.subr.bf16.mxu0 %v6896_v22  ;;  %v6974_v21 = vpack.c.bf16 %v1079_v11, %v1078_v9  ;;  %v6944_v22 = vpack.c.bf16 %v1065_v13, %v1064_v12  ;;  %v1057_v11 = vld [vmem:[%s7810_s17 + $0x1658] sm:$0xff]  ;;  %v1088_v12 = vld [vmem:[%s7810_s17 + $0x1750] sm:$0xff] }
 0x1a1   : > { %v5120_v45 = vpop.f32.mrb[6].mxu0  ;;  %6929 = vmatprep.subr.bf16.mxu1 %v6928_v20  ;;  %v6976_v20 = vpack.c.bf16 %v1097_v16, %v1096_v27  ;;  %v1089_v27 = vld [vmem:[%s7810_s17 + $0x1758] sm:$0xff]  ;;  %v1074_v16 = vld [vmem:[%s7810_s17 + $0x16e0] sm:$0xff] }
 0x1a2   : > { %v5121_v48 = vpop.f32.mrb[7].mxu0  ;;  %v5155_v42 = vpop.f32.mrb[6].mxu1 }
 0x1a3   : > { %v5122_v38 = vadd.f32 %v5121_v48, %v5120_v45  ;;  %6899 = vmatpush3.bf16.msra.mxu0 %v6898_v32  ;;  %v5156_v53 = vpop.f32.mrb[7].mxu1  ;;  %v1099_v32 = vld [vmem:[%s7810_s17 + $0x17a8] sm:$0xff]  ;;  %v1082_v45 = vld [vmem:[%s7810_s17 + $0x1720] sm:$0xff]  ;;  %v1101_v48 = vld [vmem:[%s7810_s17 + $0x17b8] sm:$0xff] }
 0x1a4   : > { %v5157_v35 = vadd.f32 %v5156_v53, %v5155_v42  ;;  %6931 = vmatpush3.bf16.msra.mxu1 %v6930_v33  ;;  %6901 = vmatprep.subr.bf16.mxu0 %v6900_v36  ;;  %v1780_v33 = vcombine.high %v8711_v18, %v8711_v18  ;;  %v6946_v36 = vpack.c.bf16 %v1049_v24, %v1048_v17  ;;  %v1053_v53 = vld [vmem:[%s7810_s17 + $0x1638] sm:$0xff] }
 0x1a5   : > { %v2463_v62 = vadd.f32 %v5122_v38, %v8617_v15  ;;  %6933 = vmatprep.subr.bf16.mxu1 %v6932_v43  ;;  %v6906_v15 = vpack.c.bf16 %v997_v59, %v996_v58  ;;  %v6980_v43 = vpack.c.bf16 %v1099_v32, %v1098_v31  ;;  %v6982_v50 = vpack.c.bf16 %v1083_v44, %v1082_v45  ;;  %v1052_v38 = vld [vmem:[%s7810_s17 + $0x1630] sm:$0xff]  ;;  %v1102_v58 = vld [vmem:[%s7810_s17 + $0x17c0] sm:$0xff]  ;;  %v1103_v59 = vld [vmem:[%s7810_s17 + $0x17c8] sm:$0xff] }
 0x1a6   : > { %v6954_v61 = vpack.c.bf16 %v1053_v53, %v1052_v38  ;;  %v6988_v4 = vpack.c.bf16 %v1103_v59, %v1102_v58  ;;  %v6994_v24 = vpack.c.bf16 %v1089_v27, %v1088_v12  ;;  %v1091_v31 = vld [vmem:[%s7810_s17 + $0x1768] sm:$0xff]  ;;  %v1076_v32 = vld [vmem:[%s7810_s17 + $0x16f0] sm:$0xff]  ;;  %v335_v44 = vld [vmem:[%s7834_s14 + $0x60] sm:$0xff] }
 0x1a7   : > { %v8697_v5 = vadd.f32 %v5157_v35, %v2463_v62  ;;  %6903 = vmatpush3.bf16.msra.mxu0 %v6902_v54  ;;  %v1084_v54 = vld [vmem:[%s7810_s17 + $0x1730] sm:$0xff]  ;;  %v1085_v35 = vld [vmem:[%s7810_s17 + $0x1738] sm:$0xff]  ;;  %v6998_v46 = vpack.c.bf16 %v1091_v31, %v1090_v23  ;;  %v1114_v23 = vld [vmem:[%s7810_s17 + $0x1820] sm:$0xff] }
 0x1a8   : > { %6935 = vmatpush3.bf16.msra.mxu1 %v6934_v57  ;;  %6905 = vmatprep.subr.bf16.mxu0 %v6904_v41  ;;  %v1070_v57 = vld [vmem:[%s7810_s17 + $0x16c0] sm:$0xff]  ;;  %v1071_v41 = vld [vmem:[%s7810_s17 + $0x16c8] sm:$0xff]  ;;  %v6986_v62 = vpack.c.bf16 %v1085_v35, %v1084_v54  ;;  %v1093_v53 = vld [vmem:[%s7810_s17 + $0x1778] sm:$0xff] }
 0x1a9   : > { %6937 = vmatprep.subr.bf16.mxu1 %v6936_v49  ;;  %v6956_v49 = vpack.c.bf16 %v1071_v41, %v1070_v57  ;;  %v1126_v54 = vld [vmem:[%s7810_s17 + $0x1880] sm:$0xff]  ;;  %v1159_v57 = vld [vmem:[%s7810_s17 + $0x1988] sm:$0xff]  ;;  %v1781_v41 = vcombine.high %v335_v44, %v335_v44  ;;  %v1144_v12 = vld [vmem:[%s7810_s17 + $0x1910] sm:$0xff] }
 0x1aa   : > { %v1158_v35 = vld [vmem:[%s7810_s17 + $0x1980] sm:$0xff]  ;;  %v1145_v27 = vld [vmem:[%s7810_s17 + $0x1918] sm:$0xff]  ;;  %v1147_v31 = vld [vmem:[%s7810_s17 + $0x1928] sm:$0xff] }
 0x1ab   : > { %6907 = vmatpush3.bf16.msra.mxu0 %v6906_v15  ;;  %v1073_v15 = vld [vmem:[%s7810_s17 + $0x16d8] sm:$0xff]  ;;  %v7036_v0 = vpack.c.bf16 %v1159_v57, %v1158_v35  ;;  %v1151_v57 = vld [vmem:[%s7810_s17 + $0x1948] sm:$0xff] }
 0x1ac   : > { %6939 = vmatpush3.bf16.msra.mxu1 %v6938_v6  ;;  %6941 = vmatprep.subr.bf16.mxu0 %v6940_v7  ;;  %v1104_v6 = vld [vmem:[%s7810_s17 + $0x17d0] sm:$0xff]  ;;  %v1105_v7 = vld [vmem:[%s7810_s17 + $0x17d8] sm:$0xff]  ;;  %v6960_v9 = vpack.c.bf16 %v1073_v15, %v1072_v52  ;;  %v8786_v52 = vrot.slane %v335_v44, %v7896_v14 }
 0x1ad   : > { %6973 = vmatprep.subr.bf16.mxu1 %v6972_v10  ;;  %v1056_v10 = vld [vmem:[%s7810_s17 + $0x1650] sm:$0xff]  ;;  %v6992_v13 = vpack.c.bf16 %v1105_v7, %v1104_v6  ;;  %v1161_v6 = vld [vmem:[%s7810_s17 + $0x1998] sm:$0xff]  ;;  %v8791_v7 = vrot.slane %v1781_v41, %v7896_v14 }
 0x1ae   : > { %3441 = vmatmul.mubr.f32.vlgmr.msra.gmra.mrb[20].mxu0 %v8626_v26  ;;  %v1051_v26 = vld [vmem:[%s7810_s17 + $0x1628] sm:$0xff]  ;;  %v6962_v17 = vpack.c.bf16 %v1057_v11, %v1056_v10  ;;  %v1160_v15 = vld [vmem:[%s7810_s17 + $0x1990] sm:$0xff]  ;;  %v1113_v11 = vld [vmem:[%s7810_s17 + $0x1818] sm:$0xff] }
 0x1af   : > { %6943 = vmatpush3.bf16.msra.mxu0 %v6942_v19  ;;  %3511 = vmatmul.mubr.f32.vlgmr.msra.gmra.mrb[20].mxu1 %v8631_v28  ;;  %v1100_v28 = vld [vmem:[%s7810_s17 + $0x17b0] sm:$0xff]  ;;  %v6950_v42 = vpack.c.bf16 %v1051_v26, %v1050_v40  ;;  %v1075_v19 = vld [vmem:[%s7810_s17 + $0x16e8] sm:$0xff]  ;;  %v1109_v40 = vld [vmem:[%s7810_s17 + $0x17f8] sm:$0xff] }
 0x1b0   : > { %6975 = vmatpush3.bf16.msra.mxu1 %v6974_v21  ;;  %6945 = vmatprep.subr.bf16.mxu0 %v6944_v22  ;;  %v6984_v56 = vpack.c.bf16 %v1101_v48, %v1100_v28  ;;  %v1106_v21 = vld [vmem:[%s7810_s17 + $0x17e0] sm:$0xff]  ;;  %v1107_v22 = vld [vmem:[%s7810_s17 + $0x17e8] sm:$0xff]  ;;  %v6964_v25 = vpack.c.bf16 %v1075_v19, %v1074_v16  ;;  %v1060_v48 = vld [vmem:[%s7810_s17 + $0x1670] sm:$0xff] }
 0x1b1   : > { %6977 = vmatprep.subr.bf16.mxu1 %v6976_v20  ;;  %3580 = vmatprep.mubr.f32.mxu0 %v1779_v30  ;;  %v1058_v20 = vld [vmem:[%s7810_s17 + $0x1660] sm:$0xff]  ;;  %v6996_v30 = vpack.c.bf16 %v1107_v22, %v1106_v21  ;;  %v1112_v10 = vld [vmem:[%s7810_s17 + $0x1810] sm:$0xff]  ;;  %v1131_v19 = vld [vmem:[%s7810_s17 + $0x18a8] sm:$0xff]  ;;  %v1796_v21 = vcombine.high %v8786_v52, %v8786_v52 }
 0x1b2   : > { %3650 = vmatprep.mubr.f32.mxu1 %v1780_v33  ;;  %v1077_v33 = vld [vmem:[%s7810_s17 + $0x16f8] sm:$0xff]  ;;  %v1130_v16 = vld [vmem:[%s7810_s17 + $0x18a0] sm:$0xff]  ;;  %v1136_v41 = vld [vmem:[%s7810_s17 + $0x18d0] sm:$0xff] }
 0x1b3   : > { %6947 = vmatpush3.bf16.msra.mxu0 %v6946_v36  ;;  %v6968_v28 = vpack.c.bf16 %v1077_v33, %v1076_v32  ;;  %v1162_v22 = vld [vmem:[%s7810_s17 + $0x19a0] sm:$0xff]  ;;  %v1132_v32 = vld [vmem:[%s7810_s17 + $0x18b0] sm:$0xff]  ;;  %v1133_v33 = vld [vmem:[%s7810_s17 + $0x18b8] sm:$0xff] }
 0x1b4   : > { %6979 = vmatpush3.bf16.msra.mxu1 %v6978_v37  ;;  %6949 = vmatprep.subr.bf16.mxu0 %v6948_v39  ;;  %v1108_v39 = vld [vmem:[%s7810_s17 + $0x17f0] sm:$0xff] }
 0x1b5   : > { %6981 = vmatprep.subr.bf16.mxu1 %v6980_v43  ;;  %v6966_v43 = vpack.c.bf16 %v1059_v34, %v1058_v20  ;;  %v7000_v38 = vpack.c.bf16 %v1109_v40, %v1108_v39  ;;  %v7042_v20 = vpack.c.bf16 %v1145_v27, %v1144_v12  ;;  %v7012_v34 = vpack.c.bf16 %v1131_v19, %v1130_v16  ;;  %v1123_v27 = vld [vmem:[%s7810_s17 + $0x1868] sm:$0xff]  ;;  %v1154_v16 = vld [vmem:[%s7810_s17 + $0x1960] sm:$0xff] }
 0x1b6   : > { %v7016_v40 = vpack.c.bf16 %v1133_v33, %v1132_v32 }
 0x1b7   : > { %6951 = vmatpush3.bf16.msra.mxu0 %v6950_v42  ;;  %v1061_v42 = vld [vmem:[%s7810_s17 + $0x1678] sm:$0xff] }
 0x1b8   : > { %6983 = vmatpush3.bf16.msra.mxu1 %v6982_v50  ;;  %6953 = vmatprep.subr.bf16.mxu0 %v6952_v51  ;;  %v1092_v50 = vld [vmem:[%s7810_s17 + $0x1770] sm:$0xff] }
 0x1b9   : > { %6985 = vmatprep.subr.bf16.mxu1 %v6984_v56  ;;  %v1127_v56 = vld [vmem:[%s7810_s17 + $0x1888] sm:$0xff]  ;;  %v7002_v59 = vpack.c.bf16 %v1093_v53, %v1092_v50  ;;  %v1118_v53 = vld [vmem:[%s7810_s17 + $0x1840] sm:$0xff] }
 0x1bb   : > { %6955 = vmatpush3.bf16.msra.mxu0 %v6954_v61  ;;  %v7004_v61 = vpack.c.bf16 %v1127_v56, %v1126_v54  ;;  %v1119_v54 = vld [vmem:[%s7810_s17 + $0x1848] sm:$0xff]  ;;  %v1150_v56 = vld [vmem:[%s7810_s17 + $0x1940] sm:$0xff] }
 0x1bc   : > { %6987 = vmatpush3.bf16.msra.mxu1 %v6986_v62  ;;  %6957 = vmatprep.subr.bf16.mxu0 %v6956_v49  ;;  %v1110_v62 = vld [vmem:[%s7810_s17 + $0x1800] sm:$0xff]  ;;  %v1111_v49 = vld [vmem:[%s7810_s17 + $0x1808] sm:$0xff] }
 0x1bd   : > { %6989 = vmatprep.subr.bf16.mxu1 %v6988_v4  ;;  %v1128_v4 = vld [vmem:[%s7810_s17 + $0x1890] sm:$0xff] }
 0x1bf   : > { %6959 = vmatpush3.bf16.msra.mxu0 %v6958_v8  ;;  %v7006_v8 = vpack.c.bf16 %v1111_v49, %v1110_v62  ;;  %v7022_v62 = vpack.c.bf16 %v1119_v54, %v1118_v53  ;;  %v7054_v49 = vpack.c.bf16 %v1151_v57, %v1150_v56  ;;  %v1206_v53 = vld [vmem:[%s7810_s17 + $0x1b00] sm:$0xff]  ;;  %v1207_v56 = vld [vmem:[%s7810_s17 + $0x1b08] sm:$0xff]  ;;  %v1193_v57 = vld [vmem:[%s7810_s17 + $0x1a98] sm:$0xff] }
 0x1c0   : > { %6991 = vmatpush3.bf16.msra.mxu1 %v6990_v60  ;;  %6961 = vmatprep.subr.bf16.mxu0 %v6960_v9  ;;  %v7038_v60 = vpack.c.bf16 %v1143_v3, %v1142_v47  ;;  %v7008_v9 = vpack.c.bf16 %v1129_v63, %v1128_v4  ;;  %v1121_v3 = vld [vmem:[%s7810_s17 + $0x1858] sm:$0xff]  ;;  %v1152_v4 = vld [vmem:[%s7810_s17 + $0x1950] sm:$0xff] }
 0x1c1   : > { %v5190_v29 = vpop.f32.mrb[8].mxu0  ;;  %6993 = vmatprep.subr.bf16.mxu1 %v6992_v13  ;;  %v7040_v13 = vpack.c.bf16 %v1161_v6, %v1160_v15  ;;  %v1153_v15 = vld [vmem:[%s7810_s17 + $0x1958] sm:$0xff]  ;;  %v1138_v6 = vld [vmem:[%s7810_s17 + $0x18e0] sm:$0xff] }
 0x1c2   : > { %v5191_v36 = vpop.f32.mrb[9].mxu0  ;;  %v5225_v37 = vpop.f32.mrb[8].mxu1 }
 0x1c3   : > { %v5192_v26 = vadd.f32 %v5191_v36, %v5190_v29  ;;  %6963 = vmatpush3.bf16.msra.mxu0 %v6962_v17  ;;  %v5226_v45 = vpop.f32.mrb[9].mxu1  ;;  %v1163_v17 = vld [vmem:[%s7810_s17 + $0x19a8] sm:$0xff]  ;;  %v1146_v29 = vld [vmem:[%s7810_s17 + $0x1920] sm:$0xff]  ;;  %v1165_v36 = vld [vmem:[%s7810_s17 + $0x19b8] sm:$0xff] }
 0x1c4   : > { %v5227_v55 = vadd.f32 %v5226_v45, %v5225_v37  ;;  %6995 = vmatpush3.bf16.msra.mxu1 %v6994_v24  ;;  %6965 = vmatprep.subr.bf16.mxu0 %v6964_v25  ;;  %v1797_v24 = vcombine.high %v8791_v7, %v8791_v7  ;;  %v7010_v25 = vpack.c.bf16 %v1113_v11, %v1112_v10  ;;  %v1117_v45 = vld [vmem:[%s7810_s17 + $0x1838] sm:$0xff] }
 0x1c5   : > { %v2603_v51 = vadd.f32 %v5192_v26, %v8697_v5  ;;  %6997 = vmatprep.subr.bf16.mxu1 %v6996_v30  ;;  %v6970_v5 = vpack.c.bf16 %v1061_v42, %v1060_v48  ;;  %v7044_v30 = vpack.c.bf16 %v1163_v17, %v1162_v22  ;;  %v7046_v39 = vpack.c.bf16 %v1147_v31, %v1146_v29  ;;  %v1116_v26 = vld [vmem:[%s7810_s17 + $0x1830] sm:$0xff]  ;;  %v1166_v48 = vld [vmem:[%s7810_s17 + $0x19c0] sm:$0xff]  ;;  %v1167_v42 = vld [vmem:[%s7810_s17 + $0x19c8] sm:$0xff] }
 0x1c6   : > { %v7018_v50 = vpack.c.bf16 %v1117_v45, %v1116_v26  ;;  %v7052_v35 = vpack.c.bf16 %v1167_v42, %v1166_v48  ;;  %v7058_v11 = vpack.c.bf16 %v1153_v15, %v1152_v4  ;;  %v1155_v22 = vld [vmem:[%s7810_s17 + $0x1968] sm:$0xff]  ;;  %v1140_v17 = vld [vmem:[%s7810_s17 + $0x18f0] sm:$0xff]  ;;  %v1157_v45 = vld [vmem:[%s7810_s17 + $0x1978] sm:$0xff] }
 0x1c7   : > { %v8777_v58 = vadd.f32 %v5227_v55, %v2603_v51  ;;  %6967 = vmatpush3.bf16.msra.mxu0 %v6966_v43  ;;  %v1148_v43 = vld [vmem:[%s7810_s17 + $0x1930] sm:$0xff]  ;;  %v1149_v55 = vld [vmem:[%s7810_s17 + $0x1938] sm:$0xff]  ;;  %v336_v31 = vld [vmem:[%s7834_s14 + $0x68] sm:$0xff]  ;;  %v7062_v33 = vpack.c.bf16 %v1155_v22, %v1154_v16 }
 0x1c8   : > { %6999 = vmatpush3.bf16.msra.mxu1 %v6998_v46  ;;  %6969 = vmatprep.subr.bf16.mxu0 %v6968_v28  ;;  %v1134_v46 = vld [vmem:[%s7810_s17 + $0x18c0] sm:$0xff]  ;;  %v1135_v28 = vld [vmem:[%s7810_s17 + $0x18c8] sm:$0xff]  ;;  %v7050_v51 = vpack.c.bf16 %v1149_v55, %v1148_v43  ;;  %v1208_v4 = vld [vmem:[%s7810_s17 + $0x1b10] sm:$0xff] }
 0x1c9   : > { %7001 = vmatprep.subr.bf16.mxu1 %v7000_v38  ;;  %v7020_v38 = vpack.c.bf16 %v1135_v28, %v1134_v46  ;;  %v1190_v43 = vld [vmem:[%s7810_s17 + $0x1a80] sm:$0xff]  ;;  %v1223_v46 = vld [vmem:[%s7810_s17 + $0x1b88] sm:$0xff]  ;;  %v1798_v28 = vcombine.high %v336_v31, %v336_v31  ;;  %v1209_v15 = vld [vmem:[%s7810_s17 + $0x1b18] sm:$0xff] }
 0x1ca   : > { %v1222_v55 = vld [vmem:[%s7810_s17 + $0x1b80] sm:$0xff]  ;;  %v1211_v22 = vld [vmem:[%s7810_s17 + $0x1b28] sm:$0xff] }
 0x1cb   : > { %6971 = vmatpush3.bf16.msra.mxu0 %v6970_v5  ;;  %v1137_v5 = vld [vmem:[%s7810_s17 + $0x18d8] sm:$0xff]  ;;  %v7100_v54 = vpack.c.bf16 %v1223_v46, %v1222_v55  ;;  %v1178_v16 = vld [vmem:[%s7810_s17 + $0x1a20] sm:$0xff]  ;;  %v1215_v46 = vld [vmem:[%s7810_s17 + $0x1b48] sm:$0xff] }
 0x1cc   : > { %7003 = vmatpush3.bf16.msra.mxu1 %v7002_v59  ;;  %7005 = vmatprep.subr.bf16.mxu0 %v7004_v61  ;;  %v1168_v59 = vld [vmem:[%s7810_s17 + $0x19d0] sm:$0xff]  ;;  %v1169_v61 = vld [vmem:[%s7810_s17 + $0x19d8] sm:$0xff]  ;;  %v7024_v47 = vpack.c.bf16 %v1137_v5, %v1136_v41  ;;  %v8866_v41 = vrot.slane %v336_v31, %v7896_v14 }
 0x1cd   : > { %7037 = vmatprep.subr.bf16.mxu1 %v7036_v0  ;;  %v1120_v0 = vld [vmem:[%s7810_s17 + $0x1850] sm:$0xff]  ;;  %v7056_v63 = vpack.c.bf16 %v1169_v61, %v1168_v59  ;;  %v1225_v59 = vld [vmem:[%s7810_s17 + $0x1b98] sm:$0xff]  ;;  %v8871_v61 = vrot.slane %v1798_v28, %v7896_v14 }
 0x1ce   : > { %3581 = vmatmul.mubr.f32.vlgmr.msra.gmra.mrb[22].mxu0 %v8706_v2  ;;  %v1115_v2 = vld [vmem:[%s7810_s17 + $0x1828] sm:$0xff]  ;;  %v7026_v10 = vpack.c.bf16 %v1121_v3, %v1120_v0  ;;  %v1224_v5 = vld [vmem:[%s7810_s17 + $0x1b90] sm:$0xff]  ;;  %v1177_v3 = vld [vmem:[%s7810_s17 + $0x1a18] sm:$0xff] }
 0x1cf   : > { %7007 = vmatpush3.bf16.msra.mxu0 %v7006_v8  ;;  %3651 = vmatmul.mubr.f32.vlgmr.msra.gmra.mrb[22].mxu1 %v8711_v18  ;;  %v1164_v18 = vld [vmem:[%s7810_s17 + $0x19b0] sm:$0xff]  ;;  %v7014_v37 = vpack.c.bf16 %v1115_v2, %v1114_v23  ;;  %v1139_v8 = vld [vmem:[%s7810_s17 + $0x18e8] sm:$0xff]  ;;  %v1173_v23 = vld [vmem:[%s7810_s17 + $0x19f8] sm:$0xff] }
 0x1d0   : > { %7039 = vmatpush3.bf16.msra.mxu1 %v7038_v60  ;;  %7009 = vmatprep.subr.bf16.mxu0 %v7008_v9  ;;  %v7048_v44 = vpack.c.bf16 %v1165_v36, %v1164_v18  ;;  %v1170_v60 = vld [vmem:[%s7810_s17 + $0x19e0] sm:$0xff]  ;;  %v1171_v9 = vld [vmem:[%s7810_s17 + $0x19e8] sm:$0xff]  ;;  %v7028_v12 = vpack.c.bf16 %v1139_v8, %v1138_v6  ;;  %v1124_v36 = vld [vmem:[%s7810_s17 + $0x1870] sm:$0xff] }
 0x1d1   : > { %7041 = vmatprep.subr.bf16.mxu1 %v7040_v13  ;;  %3720 = vmatprep.mubr.f32.mxu0 %v1796_v21  ;;  %v1122_v13 = vld [vmem:[%s7810_s17 + $0x1860] sm:$0xff]  ;;  %v7060_v21 = vpack.c.bf16 %v1171_v9, %v1170_v60  ;;  %v1176_v0 = vld [vmem:[%s7810_s17 + $0x1a10] sm:$0xff]  ;;  %v1195_v8 = vld [vmem:[%s7810_s17 + $0x1aa8] sm:$0xff]  ;;  %v1813_v60 = vcombine.high %v8866_v41, %v8866_v41 }
 0x1d2   : > { %3790 = vmatprep.mubr.f32.mxu1 %v1797_v24  ;;  %v1141_v24 = vld [vmem:[%s7810_s17 + $0x18f8] sm:$0xff]  ;;  %v1194_v6 = vld [vmem:[%s7810_s17 + $0x1aa0] sm:$0xff]  ;;  %v1200_v28 = vld [vmem:[%s7810_s17 + $0x1ad0] sm:$0xff] }
 0x1d3   : > { %7011 = vmatpush3.bf16.msra.mxu0 %v7010_v25  ;;  %v7032_v18 = vpack.c.bf16 %v1141_v24, %v1140_v17  ;;  %v1226_v9 = vld [vmem:[%s7810_s17 + $0x1ba0] sm:$0xff]  ;;  %v1196_v17 = vld [vmem:[%s7810_s17 + $0x1ab0] sm:$0xff]  ;;  %v1197_v24 = vld [vmem:[%s7810_s17 + $0x1ab8] sm:$0xff] }
 0x1d4   : > { %7043 = vmatpush3.bf16.msra.mxu1 %v7042_v20  ;;  %7013 = vmatprep.subr.bf16.mxu0 %v7012_v34  ;;  %v1172_v34 = vld [vmem:[%s7810_s17 + $0x19f0] sm:$0xff] }
 0x1d5   : > { %7045 = vmatprep.subr.bf16.mxu1 %v7044_v30  ;;  %v7030_v30 = vpack.c.bf16 %v1123_v27, %v1122_v13  ;;  %v7064_v26 = vpack.c.bf16 %v1173_v23, %v1172_v34  ;;  %v7106_v13 = vpack.c.bf16 %v1209_v15, %v1208_v4  ;;  %v7076_v27 = vpack.c.bf16 %v1195_v8, %v1194_v6  ;;  %v1187_v15 = vld [vmem:[%s7810_s17 + $0x1a68] sm:$0xff]  ;;  %v1218_v6 = vld [vmem:[%s7810_s17 + $0x1b60] sm:$0xff] }
 0x1d6   : > { %v7080_v23 = vpack.c.bf16 %v1197_v24, %v1196_v17 }
 0x1d7   : > { %7015 = vmatpush3.bf16.msra.mxu0 %v7014_v37  ;;  %v1125_v37 = vld [vmem:[%s7810_s17 + $0x1878] sm:$0xff] }
 0x1d8   : > { %7047 = vmatpush3.bf16.msra.mxu1 %v7046_v39  ;;  %7017 = vmatprep.subr.bf16.mxu0 %v7016_v40  ;;  %v1156_v39 = vld [vmem:[%s7810_s17 + $0x1970] sm:$0xff] }
 0x1d9   : > { %7049 = vmatprep.subr.bf16.mxu1 %v7048_v44  ;;  %v1191_v44 = vld [vmem:[%s7810_s17 + $0x1a88] sm:$0xff]  ;;  %v7066_v42 = vpack.c.bf16 %v1157_v45, %v1156_v39  ;;  %v1182_v45 = vld [vmem:[%s7810_s17 + $0x1a40] sm:$0xff] }
 0x1db   : > { %7019 = vmatpush3.bf16.msra.mxu0 %v7018_v50  ;;  %v7068_v50 = vpack.c.bf16 %v1191_v44, %v1190_v43  ;;  %v1183_v43 = vld [vmem:[%s7810_s17 + $0x1a48] sm:$0xff]  ;;  %v1214_v44 = vld [vmem:[%s7810_s17 + $0x1b40] sm:$0xff] }
 0x1dc   : > { %7051 = vmatpush3.bf16.msra.mxu1 %v7050_v51  ;;  %7021 = vmatprep.subr.bf16.mxu0 %v7020_v38  ;;  %v1174_v51 = vld [vmem:[%s7810_s17 + $0x1a00] sm:$0xff]  ;;  %v1175_v38 = vld [vmem:[%s7810_s17 + $0x1a08] sm:$0xff] }
 0x1dd   : > { %7053 = vmatprep.subr.bf16.mxu1 %v7052_v35  ;;  %v1192_v35 = vld [vmem:[%s7810_s17 + $0x1a90] sm:$0xff] }
 0x1df   : > { %7023 = vmatpush3.bf16.msra.mxu0 %v7022_v62  ;;  %v7070_v62 = vpack.c.bf16 %v1175_v38, %v1174_v51  ;;  %v7086_v51 = vpack.c.bf16 %v1183_v43, %v1182_v45  ;;  %v7118_v38 = vpack.c.bf16 %v1215_v46, %v1214_v44  ;;  %v1270_v45 = vld [vmem:[%s7810_s17 + $0x1d00] sm:$0xff]  ;;  %v1271_v44 = vld [vmem:[%s7810_s17 + $0x1d08] sm:$0xff]  ;;  %v1257_v46 = vld [vmem:[%s7810_s17 + $0x1c98] sm:$0xff] }
 0x1e0   : > { %7055 = vmatpush3.bf16.msra.mxu1 %v7054_v49  ;;  %7025 = vmatprep.subr.bf16.mxu0 %v7024_v47  ;;  %v7102_v49 = vpack.c.bf16 %v1207_v56, %v1206_v53  ;;  %v7072_v47 = vpack.c.bf16 %v1193_v57, %v1192_v35  ;;  %v1185_v56 = vld [vmem:[%s7810_s17 + $0x1a58] sm:$0xff]  ;;  %v1216_v35 = vld [vmem:[%s7810_s17 + $0x1b50] sm:$0xff] }
 0x1e1   : > { %v5260_v19 = vpop.f32.mrb[10].mxu0  ;;  %7057 = vmatprep.subr.bf16.mxu1 %v7056_v63  ;;  %v7104_v63 = vpack.c.bf16 %v1225_v59, %v1224_v5  ;;  %v1217_v5 = vld [vmem:[%s7810_s17 + $0x1b58] sm:$0xff]  ;;  %v1202_v59 = vld [vmem:[%s7810_s17 + $0x1ae0] sm:$0xff] }
 0x1e2   : > { %v5261_v25 = vpop.f32.mrb[11].mxu0  ;;  %v5295_v20 = vpop.f32.mrb[10].mxu1 }
 0x1e3   : > { %v5262_v2 = vadd.f32 %v5261_v25, %v5260_v19  ;;  %7027 = vmatpush3.bf16.msra.mxu0 %v7026_v10  ;;  %v5296_v29 = vpop.f32.mrb[11].mxu1  ;;  %v1227_v10 = vld [vmem:[%s7810_s17 + $0x1ba8] sm:$0xff]  ;;  %v1210_v19 = vld [vmem:[%s7810_s17 + $0x1b20] sm:$0xff]  ;;  %v1229_v25 = vld [vmem:[%s7810_s17 + $0x1bb8] sm:$0xff] }
 0x1e4   : > { %v5297_v32 = vadd.f32 %v5296_v29, %v5295_v20  ;;  %7059 = vmatpush3.bf16.msra.mxu1 %v7058_v11  ;;  %7029 = vmatprep.subr.bf16.mxu0 %v7028_v12  ;;  %v1814_v11 = vcombine.high %v8871_v61, %v8871_v61  ;;  %v7074_v12 = vpack.c.bf16 %v1177_v3, %v1176_v0  ;;  %v1181_v29 = vld [vmem:[%s7810_s17 + $0x1a38] sm:$0xff] }
 0x1e5   : > { %v2743_v40 = vadd.f32 %v5262_v2, %v8777_v58  ;;  %7061 = vmatprep.subr.bf16.mxu1 %v7060_v21  ;;  %v7034_v58 = vpack.c.bf16 %v1125_v37, %v1124_v36  ;;  %v7108_v21 = vpack.c.bf16 %v1227_v10, %v1226_v9  ;;  %v7110_v34 = vpack.c.bf16 %v1211_v22, %v1210_v19  ;;  %v1180_v2 = vld [vmem:[%s7810_s17 + $0x1a30] sm:$0xff]  ;;  %v1230_v36 = vld [vmem:[%s7810_s17 + $0x1bc0] sm:$0xff]  ;;  %v1231_v37 = vld [vmem:[%s7810_s17 + $0x1bc8] sm:$0xff] }
 0x1e6   : > { %v7082_v39 = vpack.c.bf16 %v1181_v29, %v1180_v2  ;;  %v7116_v55 = vpack.c.bf16 %v1231_v37, %v1230_v36  ;;  %v7122_v3 = vpack.c.bf16 %v1217_v5, %v1216_v35  ;;  %v1219_v9 = vld [vmem:[%s7810_s17 + $0x1b68] sm:$0xff]  ;;  %v1204_v10 = vld [vmem:[%s7810_s17 + $0x1af0] sm:$0xff]  ;;  %v1221_v29 = vld [vmem:[%s7810_s17 + $0x1b78] sm:$0xff] }
 0x1e7   : > { %v8857_v48 = vadd.f32 %v5297_v32, %v2743_v40  ;;  %7031 = vmatpush3.bf16.msra.mxu0 %v7030_v30  ;;  %v1212_v30 = vld [vmem:[%s7810_s17 + $0x1b30] sm:$0xff]  ;;  %v1213_v32 = vld [vmem:[%s7810_s17 + $0x1b38] sm:$0xff]  ;;  %v7126_v24 = vpack.c.bf16 %v1219_v9, %v1218_v6  ;;  %v1242_v6 = vld [vmem:[%s7810_s17 + $0x1c20] sm:$0xff] }
 0x1e8   : > { %7063 = vmatpush3.bf16.msra.mxu1 %v7062_v33  ;;  %7033 = vmatprep.subr.bf16.mxu0 %v7032_v18  ;;  %v1198_v33 = vld [vmem:[%s7810_s17 + $0x1ac0] sm:$0xff]  ;;  %v1199_v18 = vld [vmem:[%s7810_s17 + $0x1ac8] sm:$0xff]  ;;  %v7114_v40 = vpack.c.bf16 %v1213_v32, %v1212_v30  ;;  %v1272_v35 = vld [vmem:[%s7810_s17 + $0x1d10] sm:$0xff] }
 0x1e9   : > { %7065 = vmatprep.subr.bf16.mxu1 %v7064_v26  ;;  %v7084_v26 = vpack.c.bf16 %v1199_v18, %v1198_v33  ;;  %v337_v22 = vld [vmem:[%s7834_s14 + $0x70] sm:$0xff]  ;;  %v1254_v30 = vld [vmem:[%s7810_s17 + $0x1c80] sm:$0xff]  ;;  %v1273_v5 = vld [vmem:[%s7810_s17 + $0x1d18] sm:$0xff] }
 0x1ea   : > { %v1286_v32 = vld [vmem:[%s7810_s17 + $0x1d80] sm:$0xff]  ;;  %v1287_v33 = vld [vmem:[%s7810_s17 + $0x1d88] sm:$0xff]  ;;  %v1815_v18 = vcombine.high %v337_v22, %v337_v22 }
 0x1eb   : > { %7035 = vmatpush3.bf16.msra.mxu0 %v7034_v58  ;;  %v1201_v58 = vld [vmem:[%s7810_s17 + $0x1ad8] sm:$0xff]  ;;  %v7164_v43 = vpack.c.bf16 %v1287_v33, %v1286_v32  ;;  %v1275_v9 = vld [vmem:[%s7810_s17 + $0x1d28] sm:$0xff] }
 0x1ec   : > { %7067 = vmatpush3.bf16.msra.mxu1 %v7066_v42  ;;  %7069 = vmatprep.subr.bf16.mxu0 %v7068_v50  ;;  %v1232_v42 = vld [vmem:[%s7810_s17 + $0x1bd0] sm:$0xff]  ;;  %v1233_v50 = vld [vmem:[%s7810_s17 + $0x1bd8] sm:$0xff]  ;;  %v7088_v53 = vpack.c.bf16 %v1201_v58, %v1200_v28  ;;  %v8946_v28 = vrot.slane %v337_v22, %v7896_v14  ;;  %v1279_v33 = vld [vmem:[%s7810_s17 + $0x1d48] sm:$0xff] }
 0x1ed   : > { %7101 = vmatprep.subr.bf16.mxu1 %v7100_v54  ;;  %v1184_v54 = vld [vmem:[%s7810_s17 + $0x1a50] sm:$0xff]  ;;  %v7120_v57 = vpack.c.bf16 %v1233_v50, %v1232_v42  ;;  %v1289_v42 = vld [vmem:[%s7810_s17 + $0x1d98] sm:$0xff]  ;;  %v8951_v50 = vrot.slane %v1815_v18, %v7896_v14 }
 0x1ee   : > { %3721 = vmatmul.mubr.f32.vlgmr.msra.gmra.mrb[24].mxu0 %v8786_v52  ;;  %v1179_v52 = vld [vmem:[%s7810_s17 + $0x1a28] sm:$0xff]  ;;  %v7090_v0 = vpack.c.bf16 %v1185_v56, %v1184_v54  ;;  %v1288_v58 = vld [vmem:[%s7810_s17 + $0x1d90] sm:$0xff]  ;;  %v1241_v56 = vld [vmem:[%s7810_s17 + $0x1c18] sm:$0xff] }
 0x1ef   : > { %7071 = vmatpush3.bf16.msra.mxu0 %v7070_v62  ;;  %3791 = vmatmul.mubr.f32.vlgmr.msra.gmra.mrb[24].mxu1 %v8791_v7  ;;  %v1228_v7 = vld [vmem:[%s7810_s17 + $0x1bb0] sm:$0xff]  ;;  %v7078_v20 = vpack.c.bf16 %v1179_v52, %v1178_v16  ;;  %v1203_v62 = vld [vmem:[%s7810_s17 + $0x1ae8] sm:$0xff]  ;;  %v1237_v16 = vld [vmem:[%s7810_s17 + $0x1bf8] sm:$0xff] }
 0x1f0   : > { %7103 = vmatpush3.bf16.msra.mxu1 %v7102_v49  ;;  %7073 = vmatprep.subr.bf16.mxu0 %v7072_v47  ;;  %v7112_v31 = vpack.c.bf16 %v1229_v25, %v1228_v7  ;;  %v1234_v49 = vld [vmem:[%s7810_s17 + $0x1be0] sm:$0xff]  ;;  %v1235_v47 = vld [vmem:[%s7810_s17 + $0x1be8] sm:$0xff]  ;;  %v7092_v4 = vpack.c.bf16 %v1203_v62, %v1202_v59  ;;  %v1188_v25 = vld [vmem:[%s7810_s17 + $0x1a70] sm:$0xff] }
 0x1f1   : > { %7105 = vmatprep.subr.bf16.mxu1 %v7104_v63  ;;  %3860 = vmatprep.mubr.f32.mxu0 %v1813_v60  ;;  %v1186_v63 = vld [vmem:[%s7810_s17 + $0x1a60] sm:$0xff]  ;;  %v7124_v60 = vpack.c.bf16 %v1235_v47, %v1234_v49  ;;  %v1240_v54 = vld [vmem:[%s7810_s17 + $0x1c10] sm:$0xff]  ;;  %v1259_v62 = vld [vmem:[%s7810_s17 + $0x1ca8] sm:$0xff]  ;;  %v1830_v49 = vcombine.high %v8946_v28, %v8946_v28 }
 0x1f2   : > { %3930 = vmatprep.mubr.f32.mxu1 %v1814_v11  ;;  %v1205_v11 = vld [vmem:[%s7810_s17 + $0x1af8] sm:$0xff]  ;;  %v1258_v59 = vld [vmem:[%s7810_s17 + $0x1ca0] sm:$0xff]  ;;  %v1264_v18 = vld [vmem:[%s7810_s17 + $0x1cd0] sm:$0xff] }
 0x1f3   : > { %7075 = vmatpush3.bf16.msra.mxu0 %v7074_v12  ;;  %v7096_v7 = vpack.c.bf16 %v1205_v11, %v1204_v10  ;;  %v1290_v47 = vld [vmem:[%s7810_s17 + $0x1da0] sm:$0xff]  ;;  %v1260_v10 = vld [vmem:[%s7810_s17 + $0x1cb0] sm:$0xff]  ;;  %v1261_v11 = vld [vmem:[%s7810_s17 + $0x1cb8] sm:$0xff] }
 0x1f4   : > { %7107 = vmatpush3.bf16.msra.mxu1 %v7106_v13  ;;  %7077 = vmatprep.subr.bf16.mxu0 %v7076_v27  ;;  %v1236_v27 = vld [vmem:[%s7810_s17 + $0x1bf0] sm:$0xff] }
 0x1f5   : > { %7109 = vmatprep.subr.bf16.mxu1 %v7108_v21  ;;  %v7094_v21 = vpack.c.bf16 %v1187_v15, %v1186_v63  ;;  %v7128_v2 = vpack.c.bf16 %v1237_v16, %v1236_v27  ;;  %v7170_v63 = vpack.c.bf16 %v1273_v5, %v1272_v35  ;;  %v7140_v15 = vpack.c.bf16 %v1259_v62, %v1258_v59  ;;  %v1251_v5 = vld [vmem:[%s7810_s17 + $0x1c68] sm:$0xff]  ;;  %v1282_v59 = vld [vmem:[%s7810_s17 + $0x1d60] sm:$0xff] }
 0x1f6   : > { %v7144_v16 = vpack.c.bf16 %v1261_v11, %v1260_v10 }
 0x1f7   : > { %7079 = vmatpush3.bf16.msra.mxu0 %v7078_v20  ;;  %v1189_v20 = vld [vmem:[%s7810_s17 + $0x1a78] sm:$0xff] }
 0x1f8   : > { %7111 = vmatpush3.bf16.msra.mxu1 %v7110_v34  ;;  %7081 = vmatprep.subr.bf16.mxu0 %v7080_v23  ;;  %v1220_v34 = vld [vmem:[%s7810_s17 + $0x1b70] sm:$0xff] }
 0x1f9   : > { %7113 = vmatprep.subr.bf16.mxu1 %v7112_v31  ;;  %v1255_v31 = vld [vmem:[%s7810_s17 + $0x1c88] sm:$0xff]  ;;  %v7130_v37 = vpack.c.bf16 %v1221_v29, %v1220_v34  ;;  %v1246_v29 = vld [vmem:[%s7810_s17 + $0x1c40] sm:$0xff] }
 0x1fb   : > { %7083 = vmatpush3.bf16.msra.mxu0 %v7082_v39  ;;  %v7132_v39 = vpack.c.bf16 %v1255_v31, %v1254_v30  ;;  %v1247_v30 = vld [vmem:[%s7810_s17 + $0x1c48] sm:$0xff]  ;;  %v1278_v31 = vld [vmem:[%s7810_s17 + $0x1d40] sm:$0xff] }
 0x1fc   : > { %7115 = vmatpush3.bf16.msra.mxu1 %v7114_v40  ;;  %7085 = vmatprep.subr.bf16.mxu0 %v7084_v26  ;;  %v1238_v40 = vld [vmem:[%s7810_s17 + $0x1c00] sm:$0xff]  ;;  %v1239_v26 = vld [vmem:[%s7810_s17 + $0x1c08] sm:$0xff] }
 0x1fd   : > { %7117 = vmatprep.subr.bf16.mxu1 %v7116_v55  ;;  %v1256_v55 = vld [vmem:[%s7810_s17 + $0x1c90] sm:$0xff] }
 0x1ff   : > { %7087 = vmatpush3.bf16.msra.mxu0 %v7086_v51  ;;  %v7134_v51 = vpack.c.bf16 %v1239_v26, %v1238_v40  ;;  %v7150_v40 = vpack.c.bf16 %v1247_v30, %v1246_v29  ;;  %v7182_v26 = vpack.c.bf16 %v1279_v33, %v1278_v31  ;;  %v1334_v29 = vld [vmem:[%s7810_s17 + $0x1f00] sm:$0xff]  ;;  %v1335_v31 = vld [vmem:[%s7810_s17 + $0x1f08] sm:$0xff]  ;;  %v1321_v33 = vld [vmem:[%s7810_s17 + $0x1e98] sm:$0xff] }
 0x200   : > { %7119 = vmatpush3.bf16.msra.mxu1 %v7118_v38  ;;  %7089 = vmatprep.subr.bf16.mxu0 %v7088_v53  ;;  %v7166_v38 = vpack.c.bf16 %v1271_v44, %v1270_v45  ;;  %v7136_v53 = vpack.c.bf16 %v1257_v46, %v1256_v55  ;;  %v1249_v44 = vld [vmem:[%s7810_s17 + $0x1c58] sm:$0xff]  ;;  %v1280_v55 = vld [vmem:[%s7810_s17 + $0x1d50] sm:$0xff] }
 0x201   : > { %v5330_v8 = vpop.f32.mrb[12].mxu0  ;;  %7121 = vmatprep.subr.bf16.mxu1 %v7120_v57  ;;  %v7168_v57 = vpack.c.bf16 %v1289_v42, %v1288_v58  ;;  %v1281_v58 = vld [vmem:[%s7810_s17 + $0x1d58] sm:$0xff]  ;;  %v1266_v42 = vld [vmem:[%s7810_s17 + $0x1ce0] sm:$0xff] }
 0x202   : > { %v5331_v12 = vpop.f32.mrb[13].mxu0  ;;  %v5365_v13 = vpop.f32.mrb[12].mxu1 }
 0x203   : > { %v5332_v52 = vadd.f32 %v5331_v12, %v5330_v8  ;;  %7091 = vmatpush3.bf16.msra.mxu0 %v7090_v0  ;;  %v5366_v19 = vpop.f32.mrb[13].mxu1  ;;  %v1291_v0 = vld [vmem:[%s7810_s17 + $0x1da8] sm:$0xff]  ;;  %v1274_v8 = vld [vmem:[%s7810_s17 + $0x1d20] sm:$0xff]  ;;  %v1293_v12 = vld [vmem:[%s7810_s17 + $0x1db8] sm:$0xff] }
 0x204   : > { %v5367_v17 = vadd.f32 %v5366_v19, %v5365_v13  ;;  %7123 = vmatpush3.bf16.msra.mxu1 %v7122_v3  ;;  %7093 = vmatprep.subr.bf16.mxu0 %v7092_v4  ;;  %v1831_v3 = vcombine.high %v8951_v50, %v8951_v50  ;;  %v7138_v4 = vpack.c.bf16 %v1241_v56, %v1240_v54  ;;  %v1245_v19 = vld [vmem:[%s7810_s17 + $0x1c38] sm:$0xff] }
 0x205   : > { %v2883_v23 = vadd.f32 %v5332_v52, %v8857_v48  ;;  %7125 = vmatprep.subr.bf16.mxu1 %v7124_v60  ;;  %v7098_v48 = vpack.c.bf16 %v1189_v20, %v1188_v25  ;;  %v7172_v60 = vpack.c.bf16 %v1291_v0, %v1290_v47  ;;  %v7174_v27 = vpack.c.bf16 %v1275_v9, %v1274_v8  ;;  %v1244_v52 = vld [vmem:[%s7810_s17 + $0x1c30] sm:$0xff]  ;;  %v1294_v25 = vld [vmem:[%s7810_s17 + $0x1dc0] sm:$0xff]  ;;  %v1295_v20 = vld [vmem:[%s7810_s17 + $0x1dc8] sm:$0xff] }
 0x206   : > { %v7146_v34 = vpack.c.bf16 %v1245_v19, %v1244_v52  ;;  %v7180_v32 = vpack.c.bf16 %v1295_v20, %v1294_v25  ;;  %v7186_v56 = vpack.c.bf16 %v1281_v58, %v1280_v55  ;;  %v1283_v47 = vld [vmem:[%s7810_s17 + $0x1d68] sm:$0xff]  ;;  %v1268_v0 = vld [vmem:[%s7810_s17 + $0x1cf0] sm:$0xff]  ;;  %v1285_v19 = vld [vmem:[%s7810_s17 + $0x1d78] sm:$0xff] }
 0x207   : > { %v8937_v36 = vadd.f32 %v5367_v17, %v2883_v23  ;;  %7095 = vmatpush3.bf16.msra.mxu0 %v7094_v21  ;;  %v1276_v21 = vld [vmem:[%s7810_s17 + $0x1d30] sm:$0xff]  ;;  %v1277_v17 = vld [vmem:[%s7810_s17 + $0x1d38] sm:$0xff]  ;;  %v7190_v11 = vpack.c.bf16 %v1283_v47, %v1282_v59  ;;  %v1306_v59 = vld [vmem:[%s7810_s17 + $0x1e20] sm:$0xff] }
 0x208   : > { %7127 = vmatpush3.bf16.msra.mxu1 %v7126_v24  ;;  %7097 = vmatprep.subr.bf16.mxu0 %v7096_v7  ;;  %v1262_v24 = vld [vmem:[%s7810_s17 + $0x1cc0] sm:$0xff]  ;;  %v1263_v7 = vld [vmem:[%s7810_s17 + $0x1cc8] sm:$0xff]  ;;  %v7178_v23 = vpack.c.bf16 %v1277_v17, %v1276_v21  ;;  %v338_v9 = vld [vmem:[%s7834_s14 + $0x78] sm:$0xff] }
 0x209   : > { %7129 = vmatprep.subr.bf16.mxu1 %v7128_v2  ;;  %v7148_v2 = vpack.c.bf16 %v1263_v7, %v1262_v24  ;;  %v1318_v21 = vld [vmem:[%s7810_s17 + $0x1e80] sm:$0xff]  ;;  %v1351_v24 = vld [vmem:[%s7810_s17 + $0x1f88] sm:$0xff]  ;;  %v1832_v7 = vcombine.high %v338_v9, %v338_v9  ;;  %v1336_v55 = vld [vmem:[%s7810_s17 + $0x1f10] sm:$0xff] }
 0x20a   : > { %v1350_v17 = vld [vmem:[%s7810_s17 + $0x1f80] sm:$0xff]  ;;  %v1337_v58 = vld [vmem:[%s7810_s17 + $0x1f18] sm:$0xff]  ;;  %v1339_v47 = vld [vmem:[%s7810_s17 + $0x1f28] sm:$0xff] }
 0x20b   : > { %7099 = vmatpush3.bf16.msra.mxu0 %v7098_v48  ;;  %v1265_v48 = vld [vmem:[%s7810_s17 + $0x1cd8] sm:$0xff]  ;;  %v7228_v30 = vpack.c.bf16 %v1351_v24, %v1350_v17  ;;  %v1343_v24 = vld [vmem:[%s7810_s17 + $0x1f48] sm:$0xff] }
 0x20c   : > { %7131 = vmatpush3.bf16.msra.mxu1 %v7130_v37  ;;  %7133 = vmatprep.subr.bf16.mxu0 %v7132_v39  ;;  %v1296_v37 = vld [vmem:[%s7810_s17 + $0x1dd0] sm:$0xff]  ;;  %v1297_v39 = vld [vmem:[%s7810_s17 + $0x1dd8] sm:$0xff]  ;;  %v7152_v45 = vpack.c.bf16 %v1265_v48, %v1264_v18  ;;  %v9026_v18 = vrot.slane %v338_v9, %v7896_v14 }
 0x20d   : > { %7165 = vmatprep.subr.bf16.mxu1 %v7164_v43  ;;  %v1248_v43 = vld [vmem:[%s7810_s17 + $0x1c50] sm:$0xff]  ;;  %v7184_v46 = vpack.c.bf16 %v1297_v39, %v1296_v37  ;;  %v1353_v37 = vld [vmem:[%s7810_s17 + $0x1f98] sm:$0xff]  ;;  %v9031_v39 = vrot.slane %v1832_v7, %v7896_v14 }
 0x20e   : > { %3861 = vmatmul.mubr.f32.vlgmr.msra.gmra.mrb[26].mxu0 %v8866_v41  ;;  %v1243_v41 = vld [vmem:[%s7810_s17 + $0x1c28] sm:$0xff]  ;;  %v7154_v54 = vpack.c.bf16 %v1249_v44, %v1248_v43  ;;  %v1352_v48 = vld [vmem:[%s7810_s17 + $0x1f90] sm:$0xff]  ;;  %v1305_v44 = vld [vmem:[%s7810_s17 + $0x1e18] sm:$0xff] }
 0x20f   : > { %7135 = vmatpush3.bf16.msra.mxu0 %v7134_v51  ;;  %3931 = vmatmul.mubr.f32.vlgmr.msra.gmra.mrb[26].mxu1 %v8871_v61  ;;  %v1292_v61 = vld [vmem:[%s7810_s17 + $0x1db0] sm:$0xff]  ;;  %v7142_v13 = vpack.c.bf16 %v1243_v41, %v1242_v6  ;;  %v1267_v51 = vld [vmem:[%s7810_s17 + $0x1ce8] sm:$0xff]  ;;  %v1301_v6 = vld [vmem:[%s7810_s17 + $0x1df8] sm:$0xff] }
 0x210   : > { %7167 = vmatpush3.bf16.msra.mxu1 %v7166_v38  ;;  %7137 = vmatprep.subr.bf16.mxu0 %v7136_v53  ;;  %v7176_v22 = vpack.c.bf16 %v1293_v12, %v1292_v61  ;;  %v1298_v38 = vld [vmem:[%s7810_s17 + $0x1de0] sm:$0xff]  ;;  %v1299_v53 = vld [vmem:[%s7810_s17 + $0x1de8] sm:$0xff]  ;;  %v7156_v35 = vpack.c.bf16 %v1267_v51, %v1266_v42  ;;  %v1252_v12 = vld [vmem:[%s7810_s17 + $0x1c70] sm:$0xff] }
 0x211   : > { %7169 = vmatprep.subr.bf16.mxu1 %v7168_v57  ;;  %4000 = vmatprep.mubr.f32.mxu0 %v1830_v49  ;;  %v1250_v57 = vld [vmem:[%s7810_s17 + $0x1c60] sm:$0xff]  ;;  %v7188_v49 = vpack.c.bf16 %v1299_v53, %v1298_v38  ;;  %v1304_v43 = vld [vmem:[%s7810_s17 + $0x1e10] sm:$0xff]  ;;  %v1323_v51 = vld [vmem:[%s7810_s17 + $0x1ea8] sm:$0xff]  ;;  %v1847_v38 = vcombine.high %v9026_v18, %v9026_v18 }
 0x212   : > { %4070 = vmatprep.mubr.f32.mxu1 %v1831_v3  ;;  %v1269_v3 = vld [vmem:[%s7810_s17 + $0x1cf8] sm:$0xff]  ;;  %v1322_v42 = vld [vmem:[%s7810_s17 + $0x1ea0] sm:$0xff]  ;;  %v1328_v7 = vld [vmem:[%s7810_s17 + $0x1ed0] sm:$0xff] }
 0x213   : > { %7139 = vmatpush3.bf16.msra.mxu0 %v7138_v4  ;;  %v7160_v61 = vpack.c.bf16 %v1269_v3, %v1268_v0  ;;  %v1354_v53 = vld [vmem:[%s7810_s17 + $0x1fa0] sm:$0xff]  ;;  %v1324_v0 = vld [vmem:[%s7810_s17 + $0x1eb0] sm:$0xff]  ;;  %v1325_v3 = vld [vmem:[%s7810_s17 + $0x1eb8] sm:$0xff] }
 0x214   : > { %7171 = vmatpush3.bf16.msra.mxu1 %v7170_v63  ;;  %7141 = vmatprep.subr.bf16.mxu0 %v7140_v15  ;;  %v1300_v15 = vld [vmem:[%s7810_s17 + $0x1df0] sm:$0xff] }
 0x215   : > { %7173 = vmatprep.subr.bf16.mxu1 %v7172_v60  ;;  %v7158_v60 = vpack.c.bf16 %v1251_v5, %v1250_v57  ;;  %v7192_v52 = vpack.c.bf16 %v1301_v6, %v1300_v15  ;;  %v7234_v57 = vpack.c.bf16 %v1337_v58, %v1336_v55  ;;  %v7204_v5 = vpack.c.bf16 %v1323_v51, %v1322_v42  ;;  %v1315_v58 = vld [vmem:[%s7810_s17 + $0x1e68] sm:$0xff]  ;;  %v1346_v42 = vld [vmem:[%s7810_s17 + $0x1f60] sm:$0xff] }
 0x216   : > { %v7208_v6 = vpack.c.bf16 %v1325_v3, %v1324_v0 }
 0x217   : > { %7143 = vmatpush3.bf16.msra.mxu0 %v7142_v13  ;;  %v1253_v13 = vld [vmem:[%s7810_s17 + $0x1c78] sm:$0xff] }
 0x218   : > { %7175 = vmatpush3.bf16.msra.mxu1 %v7174_v27  ;;  %7145 = vmatprep.subr.bf16.mxu0 %v7144_v16  ;;  %v1284_v27 = vld [vmem:[%s7810_s17 + $0x1d70] sm:$0xff] }
 0x219   : > { %7177 = vmatprep.subr.bf16.mxu1 %v7176_v22  ;;  %v1319_v22 = vld [vmem:[%s7810_s17 + $0x1e88] sm:$0xff]  ;;  %v7194_v20 = vpack.c.bf16 %v1285_v19, %v1284_v27  ;;  %v1310_v19 = vld [vmem:[%s7810_s17 + $0x1e40] sm:$0xff] }
 0x21b   : > { %7147 = vmatpush3.bf16.msra.mxu0 %v7146_v34  ;;  %v7196_v34 = vpack.c.bf16 %v1319_v22, %v1318_v21  ;;  %v1311_v21 = vld [vmem:[%s7810_s17 + $0x1e48] sm:$0xff]  ;;  %v1342_v22 = vld [vmem:[%s7810_s17 + $0x1f40] sm:$0xff] }
 0x21c   : > { %7179 = vmatpush3.bf16.msra.mxu1 %v7178_v23  ;;  %7149 = vmatprep.subr.bf16.mxu0 %v7148_v2  ;;  %v1302_v23 = vld [vmem:[%s7810_s17 + $0x1e00] sm:$0xff]  ;;  %v1303_v2 = vld [vmem:[%s7810_s17 + $0x1e08] sm:$0xff] }
 0x21d   : > { %7181 = vmatprep.subr.bf16.mxu1 %v7180_v32  ;;  %v1320_v32 = vld [vmem:[%s7810_s17 + $0x1e90] sm:$0xff] }
 0x21f   : > { %7151 = vmatpush3.bf16.msra.mxu0 %v7150_v40  ;;  %v7198_v40 = vpack.c.bf16 %v1303_v2, %v1302_v23  ;;  %v7214_v23 = vpack.c.bf16 %v1311_v21, %v1310_v19  ;;  %v7246_v2 = vpack.c.bf16 %v1343_v24, %v1342_v22  ;;  %v1398_v19 = vld [vmem:[%s7810_s17 + $0x2100] sm:$0xff]  ;;  %v1399_v22 = vld [vmem:[%s7810_s17 + $0x2108] sm:$0xff]  ;;  %v1385_v24 = vld [vmem:[%s7810_s17 + $0x2098] sm:$0xff] }
 0x220   : > { %7183 = vmatpush3.bf16.msra.mxu1 %v7182_v26  ;;  %7153 = vmatprep.subr.bf16.mxu0 %v7152_v45  ;;  %v7230_v26 = vpack.c.bf16 %v1335_v31, %v1334_v29  ;;  %v7200_v45 = vpack.c.bf16 %v1321_v33, %v1320_v32  ;;  %v1313_v31 = vld [vmem:[%s7810_s17 + $0x1e58] sm:$0xff]  ;;  %v1344_v32 = vld [vmem:[%s7810_s17 + $0x1f50] sm:$0xff] }
 0x221   : > { %v5400_v62 = vpop.f32.mrb[14].mxu0  ;;  %7185 = vmatprep.subr.bf16.mxu1 %v7184_v46  ;;  %v7232_v46 = vpack.c.bf16 %v1353_v37, %v1352_v48  ;;  %v1345_v48 = vld [vmem:[%s7810_s17 + $0x1f58] sm:$0xff]  ;;  %v1330_v37 = vld [vmem:[%s7810_s17 + $0x1ee0] sm:$0xff] }
 0x222   : > { %v5401_v4 = vpop.f32.mrb[15].mxu0  ;;  %v5435_v63 = vpop.f32.mrb[14].mxu1 }
 0x223   : > { %v5402_v41 = vadd.f32 %v5401_v4, %v5400_v62  ;;  %7155 = vmatpush3.bf16.msra.mxu0 %v7154_v54  ;;  %v5436_v8 = vpop.f32.mrb[15].mxu1  ;;  %v1355_v54 = vld [vmem:[%s7810_s17 + $0x1fa8] sm:$0xff]  ;;  %v1338_v62 = vld [vmem:[%s7810_s17 + $0x1f20] sm:$0xff]  ;;  %v1357_v4 = vld [vmem:[%s7810_s17 + $0x1fb8] sm:$0xff] }
 0x224   : > { %v5437_v10 = vadd.f32 %v5436_v8, %v5435_v63  ;;  %7187 = vmatpush3.bf16.msra.mxu1 %v7186_v56  ;;  %7157 = vmatprep.subr.bf16.mxu0 %v7156_v35  ;;  %v1848_v56 = vcombine.high %v9031_v39, %v9031_v39  ;;  %v7202_v35 = vpack.c.bf16 %v1305_v44, %v1304_v43  ;;  %v1309_v8 = vld [vmem:[%s7810_s17 + $0x1e38] sm:$0xff] }
 0x225   : > { %v3023_v16 = vadd.f32 %v5402_v41, %v8937_v36  ;;  %7189 = vmatprep.subr.bf16.mxu1 %v7188_v49  ;;  %v7162_v36 = vpack.c.bf16 %v1253_v13, %v1252_v12  ;;  %v7236_v49 = vpack.c.bf16 %v1355_v54, %v1354_v53  ;;  %v7238_v15 = vpack.c.bf16 %v1339_v47, %v1338_v62  ;;  %v1308_v41 = vld [vmem:[%s7810_s17 + $0x1e30] sm:$0xff]  ;;  %v1358_v12 = vld [vmem:[%s7810_s17 + $0x1fc0] sm:$0xff]  ;;  %v1359_v13 = vld [vmem:[%s7810_s17 + $0x1fc8] sm:$0xff] }
 0x226   : > { %v7210_v27 = vpack.c.bf16 %v1309_v8, %v1308_v41  ;;  %v7244_v17 = vpack.c.bf16 %v1359_v13, %v1358_v12  ;;  %v7250_v44 = vpack.c.bf16 %v1345_v48, %v1344_v32  ;;  %v1347_v53 = vld [vmem:[%s7810_s17 + $0x1f68] sm:$0xff]  ;;  %v1332_v54 = vld [vmem:[%s7810_s17 + $0x1ef0] sm:$0xff]  ;;  %v339_v47 = vld [vmem:[%s7834_s14 + $0x80] sm:$0xff] }
 0x227   : > { %v9017_v25 = vadd.f32 %v5437_v10, %v3023_v16  ;;  %7159 = vmatpush3.bf16.msra.mxu0 %v7158_v60  ;;  %v1340_v60 = vld [vmem:[%s7810_s17 + $0x1f30] sm:$0xff]  ;;  %v1341_v10 = vld [vmem:[%s7810_s17 + $0x1f38] sm:$0xff]  ;;  %v7254_v3 = vpack.c.bf16 %v1347_v53, %v1346_v42  ;;  %v1370_v42 = vld [vmem:[%s7810_s17 + $0x2020] sm:$0xff] }
 0x228   : > { %7191 = vmatpush3.bf16.msra.mxu1 %v7190_v11  ;;  %7161 = vmatprep.subr.bf16.mxu0 %v7160_v61  ;;  %v1326_v11 = vld [vmem:[%s7810_s17 + $0x1ec0] sm:$0xff]  ;;  %v1327_v61 = vld [vmem:[%s7810_s17 + $0x1ec8] sm:$0xff]  ;;  %v7242_v16 = vpack.c.bf16 %v1341_v10, %v1340_v60  ;;  %v1349_v8 = vld [vmem:[%s7810_s17 + $0x1f78] sm:$0xff] }
 0x229   : > { %7193 = vmatprep.subr.bf16.mxu1 %v7192_v52  ;;  %v7212_v52 = vpack.c.bf16 %v1327_v61, %v1326_v11  ;;  %v1382_v60 = vld [vmem:[%s7810_s17 + $0x2080] sm:$0xff]  ;;  %v1415_v11 = vld [vmem:[%s7810_s17 + $0x2188] sm:$0xff]  ;;  %v1849_v61 = vcombine.high %v339_v47, %v339_v47  ;;  %v1400_v32 = vld [vmem:[%s7810_s17 + $0x2110] sm:$0xff] }
 0x22a   : > { %v1414_v10 = vld [vmem:[%s7810_s17 + $0x2180] sm:$0xff]  ;;  %v1401_v48 = vld [vmem:[%s7810_s17 + $0x2118] sm:$0xff]  ;;  %v1403_v53 = vld [vmem:[%s7810_s17 + $0x2128] sm:$0xff] }
 0x22b   : > { %7163 = vmatpush3.bf16.msra.mxu0 %v7162_v36  ;;  %v1329_v36 = vld [vmem:[%s7810_s17 + $0x1ed8] sm:$0xff]  ;;  %v7292_v21 = vpack.c.bf16 %v1415_v11, %v1414_v10  ;;  %v1407_v11 = vld [vmem:[%s7810_s17 + $0x2148] sm:$0xff] }
 0x22c   : > { %7195 = vmatpush3.bf16.msra.mxu1 %v7194_v20  ;;  %7197 = vmatprep.subr.bf16.mxu0 %v7196_v34  ;;  %v1360_v20 = vld [vmem:[%s7810_s17 + $0x1fd0] sm:$0xff]  ;;  %v1361_v34 = vld [vmem:[%s7810_s17 + $0x1fd8] sm:$0xff]  ;;  %v7216_v29 = vpack.c.bf16 %v1329_v36, %v1328_v7  ;;  %v9106_v7 = vrot.slane %v339_v47, %v7896_v14 }
 0x22d   : > { %7229 = vmatprep.subr.bf16.mxu1 %v7228_v30  ;;  %v1312_v30 = vld [vmem:[%s7810_s17 + $0x1e50] sm:$0xff]  ;;  %v7248_v33 = vpack.c.bf16 %v1361_v34, %v1360_v20  ;;  %v1417_v20 = vld [vmem:[%s7810_s17 + $0x2198] sm:$0xff]  ;;  %v9111_v34 = vrot.slane %v1849_v61, %v7896_v14 }
 0x22e   : > { %4001 = vmatmul.mubr.f32.vlgmr.msra.gmra.mrb[28].mxu0 %v8946_v28  ;;  %v1307_v28 = vld [vmem:[%s7810_s17 + $0x1e28] sm:$0xff]  ;;  %v7218_v43 = vpack.c.bf16 %v1313_v31, %v1312_v30  ;;  %v1416_v36 = vld [vmem:[%s7810_s17 + $0x2190] sm:$0xff]  ;;  %v1369_v31 = vld [vmem:[%s7810_s17 + $0x2018] sm:$0xff] }
 0x22f   : > { %7199 = vmatpush3.bf16.msra.mxu0 %v7198_v40  ;;  %4071 = vmatmul.mubr.f32.vlgmr.msra.gmra.mrb[28].mxu1 %v8951_v50  ;;  %v1356_v50 = vld [vmem:[%s7810_s17 + $0x1fb0] sm:$0xff]  ;;  %v7206_v63 = vpack.c.bf16 %v1307_v28, %v1306_v59  ;;  %v1331_v40 = vld [vmem:[%s7810_s17 + $0x1ee8] sm:$0xff]  ;;  %v1365_v59 = vld [vmem:[%s7810_s17 + $0x1ff8] sm:$0xff] }
 0x230   : > { %7231 = vmatpush3.bf16.msra.mxu1 %v7230_v26  ;;  %7201 = vmatprep.subr.bf16.mxu0 %v7200_v45  ;;  %v7240_v9 = vpack.c.bf16 %v1357_v4, %v1356_v50  ;;  %v1362_v26 = vld [vmem:[%s7810_s17 + $0x1fe0] sm:$0xff]  ;;  %v1363_v45 = vld [vmem:[%s7810_s17 + $0x1fe8] sm:$0xff]  ;;  %v7220_v55 = vpack.c.bf16 %v1331_v40, %v1330_v37  ;;  %v1316_v4 = vld [vmem:[%s7810_s17 + $0x1e70] sm:$0xff] }
 0x231   : > { %7233 = vmatprep.subr.bf16.mxu1 %v7232_v46  ;;  %4140 = vmatprep.mubr.f32.mxu0 %v1847_v38  ;;  %v1314_v46 = vld [vmem:[%s7810_s17 + $0x1e60] sm:$0xff]  ;;  %v7252_v38 = vpack.c.bf16 %v1363_v45, %v1362_v26  ;;  %v1368_v30 = vld [vmem:[%s7810_s17 + $0x2010] sm:$0xff]  ;;  %v1387_v40 = vld [vmem:[%s7810_s17 + $0x20a8] sm:$0xff]  ;;  %v1864_v26 = vcombine.high %v9106_v7, %v9106_v7 }
 0x232   : > { %4210 = vmatprep.mubr.f32.mxu1 %v1848_v56  ;;  %v1333_v56 = vld [vmem:[%s7810_s17 + $0x1ef8] sm:$0xff]  ;;  %v1386_v37 = vld [vmem:[%s7810_s17 + $0x20a0] sm:$0xff]  ;;  %v1392_v61 = vld [vmem:[%s7810_s17 + $0x20d0] sm:$0xff] }
 0x233   : > { %7203 = vmatpush3.bf16.msra.mxu0 %v7202_v35  ;;  %v7224_v50 = vpack.c.bf16 %v1333_v56, %v1332_v54  ;;  %v1418_v45 = vld [vmem:[%s7810_s17 + $0x21a0] sm:$0xff]  ;;  %v1388_v54 = vld [vmem:[%s7810_s17 + $0x20b0] sm:$0xff]  ;;  %v1389_v56 = vld [vmem:[%s7810_s17 + $0x20b8] sm:$0xff] }
 0x234   : > { %7235 = vmatpush3.bf16.msra.mxu1 %v7234_v57  ;;  %7205 = vmatprep.subr.bf16.mxu0 %v7204_v5  ;;  %v1364_v5 = vld [vmem:[%s7810_s17 + $0x1ff0] sm:$0xff] }
 0x235   : > { %7237 = vmatprep.subr.bf16.mxu1 %v7236_v49  ;;  %v7222_v49 = vpack.c.bf16 %v1315_v58, %v1314_v46  ;;  %v7256_v41 = vpack.c.bf16 %v1365_v59, %v1364_v5  ;;  %v7298_v46 = vpack.c.bf16 %v1401_v48, %v1400_v32  ;;  %v7268_v58 = vpack.c.bf16 %v1387_v40, %v1386_v37  ;;  %v1379_v48 = vld [vmem:[%s7810_s17 + $0x2068] sm:$0xff]  ;;  %v1410_v37 = vld [vmem:[%s7810_s17 + $0x2160] sm:$0xff] }
 0x236   : > { %v7272_v59 = vpack.c.bf16 %v1389_v56, %v1388_v54 }
 0x237   : > { %7207 = vmatpush3.bf16.msra.mxu0 %v7206_v63  ;;  %v1317_v63 = vld [vmem:[%s7810_s17 + $0x1e78] sm:$0xff] }
 0x238   : > { %7239 = vmatpush3.bf16.msra.mxu1 %v7238_v15  ;;  %7209 = vmatprep.subr.bf16.mxu0 %v7208_v6  ;;  %v1348_v15 = vld [vmem:[%s7810_s17 + $0x1f70] sm:$0xff] }
 0x239   : > { %7241 = vmatprep.subr.bf16.mxu1 %v7240_v9  ;;  %v1383_v9 = vld [vmem:[%s7810_s17 + $0x2088] sm:$0xff]  ;;  %v7258_v13 = vpack.c.bf16 %v1349_v8, %v1348_v15  ;;  %v1374_v8 = vld [vmem:[%s7810_s17 + $0x2040] sm:$0xff] }
 0x23b   : > { %7211 = vmatpush3.bf16.msra.mxu0 %v7210_v27  ;;  %v7260_v27 = vpack.c.bf16 %v1383_v9, %v1382_v60  ;;  %v1375_v60 = vld [vmem:[%s7810_s17 + $0x2048] sm:$0xff]  ;;  %v1406_v9 = vld [vmem:[%s7810_s17 + $0x2140] sm:$0xff] }
 0x23c   : > { %7243 = vmatpush3.bf16.msra.mxu1 %v7242_v16  ;;  %7213 = vmatprep.subr.bf16.mxu0 %v7212_v52  ;;  %v1366_v16 = vld [vmem:[%s7810_s17 + $0x2000] sm:$0xff]  ;;  %v1367_v52 = vld [vmem:[%s7810_s17 + $0x2008] sm:$0xff] }
 0x23d   : > { %7245 = vmatprep.subr.bf16.mxu1 %v7244_v17  ;;  %v1384_v17 = vld [vmem:[%s7810_s17 + $0x2090] sm:$0xff] }
 0x23f   : > { %7215 = vmatpush3.bf16.msra.mxu0 %v7214_v23  ;;  %v7262_v23 = vpack.c.bf16 %v1367_v52, %v1366_v16  ;;  %v7278_v16 = vpack.c.bf16 %v1375_v60, %v1374_v8  ;;  %v7310_v52 = vpack.c.bf16 %v1407_v11, %v1406_v9  ;;  %v1462_v8 = vld [vmem:[%s7810_s17 + $0x2300] sm:$0xff]  ;;  %v1463_v9 = vld [vmem:[%s7810_s17 + $0x2308] sm:$0xff]  ;;  %v1449_v11 = vld [vmem:[%s7810_s17 + $0x2298] sm:$0xff] }
 0x240   : > { %7247 = vmatpush3.bf16.msra.mxu1 %v7246_v2  ;;  %7217 = vmatprep.subr.bf16.mxu0 %v7216_v29  ;;  %v7294_v2 = vpack.c.bf16 %v1399_v22, %v1398_v19  ;;  %v7264_v29 = vpack.c.bf16 %v1385_v24, %v1384_v17  ;;  %v1377_v22 = vld [vmem:[%s7810_s17 + $0x2058] sm:$0xff]  ;;  %v1408_v17 = vld [vmem:[%s7810_s17 + $0x2150] sm:$0xff] }
 0x241   : > { %v5470_v51 = vpop.f32.mrb[16].mxu0  ;;  %7249 = vmatprep.subr.bf16.mxu1 %v7248_v33  ;;  %v7296_v33 = vpack.c.bf16 %v1417_v20, %v1416_v36  ;;  %v1409_v36 = vld [vmem:[%s7810_s17 + $0x2158] sm:$0xff]  ;;  %v1394_v20 = vld [vmem:[%s7810_s17 + $0x20e0] sm:$0xff] }
 0x242   : > { %v5471_v35 = vpop.f32.mrb[17].mxu0  ;;  %v5505_v57 = vpop.f32.mrb[16].mxu1 }
 0x243   : > { %v5472_v28 = vadd.f32 %v5471_v35, %v5470_v51  ;;  %7219 = vmatpush3.bf16.msra.mxu0 %v7218_v43  ;;  %v5506_v62 = vpop.f32.mrb[17].mxu1  ;;  %v1419_v43 = vld [vmem:[%s7810_s17 + $0x21a8] sm:$0xff]  ;;  %v1402_v51 = vld [vmem:[%s7810_s17 + $0x2120] sm:$0xff]  ;;  %v1421_v35 = vld [vmem:[%s7810_s17 + $0x21b8] sm:$0xff] }
 0x244   : > { %v5507_v0 = vadd.f32 %v5506_v62, %v5505_v57  ;;  %7251 = vmatpush3.bf16.msra.mxu1 %v7250_v44  ;;  %7221 = vmatprep.subr.bf16.mxu0 %v7220_v55  ;;  %v1865_v44 = vcombine.high %v9111_v34, %v9111_v34  ;;  %v7266_v55 = vpack.c.bf16 %v1369_v31, %v1368_v30  ;;  %v1373_v62 = vld [vmem:[%s7810_s17 + $0x2038] sm:$0xff] }
 0x245   : > { %v3163_v6 = vadd.f32 %v5472_v28, %v9017_v25  ;;  %7253 = vmatprep.subr.bf16.mxu1 %v7252_v38  ;;  %v7226_v25 = vpack.c.bf16 %v1317_v63, %v1316_v4  ;;  %v7300_v38 = vpack.c.bf16 %v1419_v43, %v1418_v45  ;;  %v7302_v5 = vpack.c.bf16 %v1403_v53, %v1402_v51  ;;  %v1372_v28 = vld [vmem:[%s7810_s17 + $0x2030] sm:$0xff]  ;;  %v1422_v4 = vld [vmem:[%s7810_s17 + $0x21c0] sm:$0xff]  ;;  %v1423_v63 = vld [vmem:[%s7810_s17 + $0x21c8] sm:$0xff] }
 0x246   : > { %v7274_v15 = vpack.c.bf16 %v1373_v62, %v1372_v28  ;;  %v7308_v10 = vpack.c.bf16 %v1423_v63, %v1422_v4  ;;  %v7314_v31 = vpack.c.bf16 %v1409_v36, %v1408_v17  ;;  %v1411_v45 = vld [vmem:[%s7810_s17 + $0x2168] sm:$0xff]  ;;  %v1396_v43 = vld [vmem:[%s7810_s17 + $0x20f0] sm:$0xff]  ;;  %v1413_v62 = vld [vmem:[%s7810_s17 + $0x2178] sm:$0xff] }
 0x247   : > { %v9097_v12 = vadd.f32 %v5507_v0, %v3163_v6  ;;  %7223 = vmatpush3.bf16.msra.mxu0 %v7222_v49  ;;  %v1404_v49 = vld [vmem:[%s7810_s17 + $0x2130] sm:$0xff]  ;;  %v1405_v0 = vld [vmem:[%s7810_s17 + $0x2138] sm:$0xff]  ;;  %v340_v53 = vld [vmem:[%s7834_s14 + $0x88] sm:$0xff]  ;;  %v7318_v56 = vpack.c.bf16 %v1411_v45, %v1410_v37 }
 0x248   : > { %7255 = vmatpush3.bf16.msra.mxu1 %v7254_v3  ;;  %7225 = vmatprep.subr.bf16.mxu0 %v7224_v50  ;;  %v1390_v3 = vld [vmem:[%s7810_s17 + $0x20c0] sm:$0xff]  ;;  %v1391_v50 = vld [vmem:[%s7810_s17 + $0x20c8] sm:$0xff]  ;;  %v7306_v6 = vpack.c.bf16 %v1405_v0, %v1404_v49  ;;  %v1464_v17 = vld [vmem:[%s7810_s17 + $0x2310] sm:$0xff] }
 0x249   : > { %7257 = vmatprep.subr.bf16.mxu1 %v7256_v41  ;;  %v7276_v41 = vpack.c.bf16 %v1391_v50, %v1390_v3  ;;  %v1446_v49 = vld [vmem:[%s7810_s17 + $0x2280] sm:$0xff]  ;;  %v1479_v3 = vld [vmem:[%s7810_s17 + $0x2388] sm:$0xff]  ;;  %v1866_v50 = vcombine.high %v340_v53, %v340_v53  ;;  %v1465_v36 = vld [vmem:[%s7810_s17 + $0x2318] sm:$0xff] }
 0x24a   : > { %v1478_v0 = vld [vmem:[%s7810_s17 + $0x2380] sm:$0xff]  ;;  %v1467_v45 = vld [vmem:[%s7810_s17 + $0x2328] sm:$0xff] }
 0x24b   : > { %7227 = vmatpush3.bf16.msra.mxu0 %v7226_v25  ;;  %v1393_v25 = vld [vmem:[%s7810_s17 + $0x20d8] sm:$0xff]  ;;  %v7356_v60 = vpack.c.bf16 %v1479_v3, %v1478_v0  ;;  %v1434_v37 = vld [vmem:[%s7810_s17 + $0x2220] sm:$0xff]  ;;  %v1471_v3 = vld [vmem:[%s7810_s17 + $0x2348] sm:$0xff] }
 0x24c   : > { %7259 = vmatpush3.bf16.msra.mxu1 %v7258_v13  ;;  %7261 = vmatprep.subr.bf16.mxu0 %v7260_v27  ;;  %v1424_v13 = vld [vmem:[%s7810_s17 + $0x21d0] sm:$0xff]  ;;  %v1425_v27 = vld [vmem:[%s7810_s17 + $0x21d8] sm:$0xff]  ;;  %v7280_v19 = vpack.c.bf16 %v1393_v25, %v1392_v61  ;;  %v9186_v61 = vrot.slane %v340_v53, %v7896_v14 }
 0x24d   : > { %7293 = vmatprep.subr.bf16.mxu1 %v7292_v21  ;;  %v1376_v21 = vld [vmem:[%s7810_s17 + $0x2050] sm:$0xff]  ;;  %v7312_v24 = vpack.c.bf16 %v1425_v27, %v1424_v13  ;;  %v1481_v13 = vld [vmem:[%s7810_s17 + $0x2398] sm:$0xff]  ;;  %v9191_v27 = vrot.slane %v1866_v50, %v7896_v14 }
 0x24e   : > { %4141 = vmatmul.mubr.f32.vlgmr.msra.gmra.mrb[30].mxu0 %v9026_v18  ;;  %v1371_v18 = vld [vmem:[%s7810_s17 + $0x2028] sm:$0xff]  ;;  %v7282_v30 = vpack.c.bf16 %v1377_v22, %v1376_v21  ;;  %v1480_v25 = vld [vmem:[%s7810_s17 + $0x2390] sm:$0xff]  ;;  %v1433_v22 = vld [vmem:[%s7810_s17 + $0x2218] sm:$0xff] }
 0x24f   : > { %7263 = vmatpush3.bf16.msra.mxu0 %v7262_v23  ;;  %4211 = vmatmul.mubr.f32.vlgmr.msra.gmra.mrb[30].mxu1 %v9031_v39  ;;  %v1420_v39 = vld [vmem:[%s7810_s17 + $0x21b0] sm:$0xff]  ;;  %v7270_v57 = vpack.c.bf16 %v1371_v18, %v1370_v42  ;;  %v1395_v23 = vld [vmem:[%s7810_s17 + $0x20e8] sm:$0xff]  ;;  %v1429_v42 = vld [vmem:[%s7810_s17 + $0x21f8] sm:$0xff] }
 0x250   : > { %7295 = vmatpush3.bf16.msra.mxu1 %v7294_v2  ;;  %7265 = vmatprep.subr.bf16.mxu0 %v7264_v29  ;;  %v7304_v47 = vpack.c.bf16 %v1421_v35, %v1420_v39  ;;  %v1426_v2 = vld [vmem:[%s7810_s17 + $0x21e0] sm:$0xff]  ;;  %v1427_v29 = vld [vmem:[%s7810_s17 + $0x21e8] sm:$0xff]  ;;  %v7284_v32 = vpack.c.bf16 %v1395_v23, %v1394_v20  ;;  %v1380_v35 = vld [vmem:[%s7810_s17 + $0x2070] sm:$0xff] }
 0x251   : > { %7297 = vmatprep.subr.bf16.mxu1 %v7296_v33  ;;  %4280 = vmatprep.mubr.f32.mxu0 %v1864_v26  ;;  %v1378_v33 = vld [vmem:[%s7810_s17 + $0x2060] sm:$0xff]  ;;  %v7316_v26 = vpack.c.bf16 %v1427_v29, %v1426_v2  ;;  %v1432_v21 = vld [vmem:[%s7810_s17 + $0x2210] sm:$0xff]  ;;  %v1451_v23 = vld [vmem:[%s7810_s17 + $0x22a8] sm:$0xff]  ;;  %v1881_v2 = vcombine.high %v9186_v61, %v9186_v61 }
 0x252   : > { %4350 = vmatprep.mubr.f32.mxu1 %v1865_v44  ;;  %v1397_v44 = vld [vmem:[%s7810_s17 + $0x20f8] sm:$0xff]  ;;  %v1450_v20 = vld [vmem:[%s7810_s17 + $0x22a0] sm:$0xff]  ;;  %v1456_v50 = vld [vmem:[%s7810_s17 + $0x22d0] sm:$0xff] }
 0x253   : > { %7267 = vmatpush3.bf16.msra.mxu0 %v7266_v55  ;;  %v7288_v39 = vpack.c.bf16 %v1397_v44, %v1396_v43  ;;  %v1482_v29 = vld [vmem:[%s7810_s17 + $0x23a0] sm:$0xff]  ;;  %v1452_v43 = vld [vmem:[%s7810_s17 + $0x22b0] sm:$0xff]  ;;  %v1453_v44 = vld [vmem:[%s7810_s17 + $0x22b8] sm:$0xff] }
 0x254   : > { %7299 = vmatpush3.bf16.msra.mxu1 %v7298_v46  ;;  %7269 = vmatprep.subr.bf16.mxu0 %v7268_v58  ;;  %v1428_v58 = vld [vmem:[%s7810_s17 + $0x21f0] sm:$0xff] }
 0x255   : > { %7301 = vmatprep.subr.bf16.mxu1 %v7300_v38  ;;  %v7286_v38 = vpack.c.bf16 %v1379_v48, %v1378_v33  ;;  %v7320_v28 = vpack.c.bf16 %v1429_v42, %v1428_v58  ;;  %v7362_v33 = vpack.c.bf16 %v1465_v36, %v1464_v17  ;;  %v7332_v48 = vpack.c.bf16 %v1451_v23, %v1450_v20  ;;  %v1443_v36 = vld [vmem:[%s7810_s17 + $0x2268] sm:$0xff]  ;;  %v1474_v20 = vld [vmem:[%s7810_s17 + $0x2360] sm:$0xff] }
 0x256   : > { %v7336_v42 = vpack.c.bf16 %v1453_v44, %v1452_v43 }
 0x257   : > { %7271 = vmatpush3.bf16.msra.mxu0 %v7270_v57  ;;  %v1381_v57 = vld [vmem:[%s7810_s17 + $0x2078] sm:$0xff] }
 0x258   : > { %7303 = vmatpush3.bf16.msra.mxu1 %v7302_v5  ;;  %7273 = vmatprep.subr.bf16.mxu0 %v7272_v59  ;;  %v1412_v5 = vld [vmem:[%s7810_s17 + $0x2170] sm:$0xff] }
 0x259   : > { %7305 = vmatprep.subr.bf16.mxu1 %v7304_v47  ;;  %v1447_v47 = vld [vmem:[%s7810_s17 + $0x2288] sm:$0xff]  ;;  %v7322_v63 = vpack.c.bf16 %v1413_v62, %v1412_v5  ;;  %v1438_v62 = vld [vmem:[%s7810_s17 + $0x2240] sm:$0xff] }
 0x25b   : > { %7275 = vmatpush3.bf16.msra.mxu0 %v7274_v15  ;;  %v7324_v15 = vpack.c.bf16 %v1447_v47, %v1446_v49  ;;  %v1439_v49 = vld [vmem:[%s7810_s17 + $0x2248] sm:$0xff]  ;;  %v1470_v47 = vld [vmem:[%s7810_s17 + $0x2340] sm:$0xff] }
 0x25c   : > { %7307 = vmatpush3.bf16.msra.mxu1 %v7306_v6  ;;  %7277 = vmatprep.subr.bf16.mxu0 %v7276_v41  ;;  %v1430_v6 = vld [vmem:[%s7810_s17 + $0x2200] sm:$0xff]  ;;  %v1431_v41 = vld [vmem:[%s7810_s17 + $0x2208] sm:$0xff] }
 0x25d   : > { %7309 = vmatprep.subr.bf16.mxu1 %v7308_v10  ;;  %v1448_v10 = vld [vmem:[%s7810_s17 + $0x2290] sm:$0xff] }
 0x25f   : > { %7279 = vmatpush3.bf16.msra.mxu0 %v7278_v16  ;;  %v7326_v16 = vpack.c.bf16 %v1431_v41, %v1430_v6  ;;  %v7342_v6 = vpack.c.bf16 %v1439_v49, %v1438_v62  ;;  %v7374_v41 = vpack.c.bf16 %v1471_v3, %v1470_v47  ;;  %v1526_v62 = vld [vmem:[%s7810_s17 + $0x2500] sm:$0xff]  ;;  %v1527_v47 = vld [vmem:[%s7810_s17 + $0x2508] sm:$0xff]  ;;  %v1513_v3 = vld [vmem:[%s7810_s17 + $0x2498] sm:$0xff] }
 0x260   : > { %7311 = vmatpush3.bf16.msra.mxu1 %v7310_v52  ;;  %7281 = vmatprep.subr.bf16.mxu0 %v7280_v19  ;;  %v7358_v52 = vpack.c.bf16 %v1463_v9, %v1462_v8  ;;  %v7328_v19 = vpack.c.bf16 %v1449_v11, %v1448_v10  ;;  %v1441_v9 = vld [vmem:[%s7810_s17 + $0x2258] sm:$0xff]  ;;  %v1472_v10 = vld [vmem:[%s7810_s17 + $0x2350] sm:$0xff] }
 0x261   : > { %v5540_v40 = vpop.f32.mrb[18].mxu0  ;;  %7313 = vmatprep.subr.bf16.mxu1 %v7312_v24  ;;  %v7360_v24 = vpack.c.bf16 %v1481_v13, %v1480_v25  ;;  %v1473_v25 = vld [vmem:[%s7810_s17 + $0x2358] sm:$0xff]  ;;  %v1458_v13 = vld [vmem:[%s7810_s17 + $0x22e0] sm:$0xff] }
 0x262   : > { %v5541_v55 = vpop.f32.mrb[19].mxu0  ;;  %v5575_v46 = vpop.f32.mrb[18].mxu1 }
 0x263   : > { %v5542_v18 = vadd.f32 %v5541_v55, %v5540_v40  ;;  %7283 = vmatpush3.bf16.msra.mxu0 %v7282_v30  ;;  %v5576_v51 = vpop.f32.mrb[19].mxu1  ;;  %v1483_v30 = vld [vmem:[%s7810_s17 + $0x23a8] sm:$0xff]  ;;  %v1466_v40 = vld [vmem:[%s7810_s17 + $0x2320] sm:$0xff]  ;;  %v1485_v55 = vld [vmem:[%s7810_s17 + $0x23b8] sm:$0xff] }
 0x264   : > { %v5577_v54 = vadd.f32 %v5576_v51, %v5575_v46  ;;  %7315 = vmatpush3.bf16.msra.mxu1 %v7314_v31  ;;  %7285 = vmatprep.subr.bf16.mxu0 %v7284_v32  ;;  %v1882_v31 = vcombine.high %v9191_v27, %v9191_v27  ;;  %v7330_v32 = vpack.c.bf16 %v1433_v22, %v1432_v21  ;;  %v1437_v51 = vld [vmem:[%s7810_s17 + $0x2238] sm:$0xff] }
 0x265   : > { %v3303_v59 = vadd.f32 %v5542_v18, %v9097_v12  ;;  %7317 = vmatprep.subr.bf16.mxu1 %v7316_v26  ;;  %v7290_v12 = vpack.c.bf16 %v1381_v57, %v1380_v35  ;;  %v7364_v26 = vpack.c.bf16 %v1483_v30, %v1482_v29  ;;  %v7366_v58 = vpack.c.bf16 %v1467_v45, %v1466_v40  ;;  %v1436_v18 = vld [vmem:[%s7810_s17 + $0x2230] sm:$0xff]  ;;  %v1486_v35 = vld [vmem:[%s7810_s17 + $0x23c0] sm:$0xff]  ;;  %v1487_v57 = vld [vmem:[%s7810_s17 + $0x23c8] sm:$0xff] }
 0x266   : > { %v7338_v5 = vpack.c.bf16 %v1437_v51, %v1436_v18  ;;  %v7372_v0 = vpack.c.bf16 %v1487_v57, %v1486_v35  ;;  %v7378_v22 = vpack.c.bf16 %v1473_v25, %v1472_v10  ;;  %v1475_v29 = vld [vmem:[%s7810_s17 + $0x2368] sm:$0xff]  ;;  %v1460_v30 = vld [vmem:[%s7810_s17 + $0x22f0] sm:$0xff]  ;;  %v1477_v51 = vld [vmem:[%s7810_s17 + $0x2378] sm:$0xff] }
 0x267   : > { %v9177_v4 = vadd.f32 %v5577_v54, %v3303_v59  ;;  %7287 = vmatpush3.bf16.msra.mxu0 %v7286_v38  ;;  %v1468_v38 = vld [vmem:[%s7810_s17 + $0x2330] sm:$0xff]  ;;  %v1469_v54 = vld [vmem:[%s7810_s17 + $0x2338] sm:$0xff]  ;;  %v7382_v44 = vpack.c.bf16 %v1475_v29, %v1474_v20  ;;  %v1530_v20 = vld [vmem:[%s7810_s17 + $0x2520] sm:$0xff] }
 0x268   : > { %7319 = vmatpush3.bf16.msra.mxu1 %v7318_v56  ;;  %7289 = vmatprep.subr.bf16.mxu0 %v7288_v39  ;;  %v1454_v56 = vld [vmem:[%s7810_s17 + $0x22c0] sm:$0xff]  ;;  %v1455_v39 = vld [vmem:[%s7810_s17 + $0x22c8] sm:$0xff]  ;;  %v7370_v59 = vpack.c.bf16 %v1469_v54, %v1468_v38  ;;  %v1528_v10 = vld [vmem:[%s7810_s17 + $0x2510] sm:$0xff] }
 0x269   : > { %7321 = vmatprep.subr.bf16.mxu1 %v7320_v28  ;;  %v7340_v28 = vpack.c.bf16 %v1455_v39, %v1454_v56  ;;  %v341_v45 = vld [vmem:[%s7834_s14 + $0x90] sm:$0xff]  ;;  %v1510_v38 = vld [vmem:[%s7810_s17 + $0x2480] sm:$0xff]  ;;  %v1529_v25 = vld [vmem:[%s7810_s17 + $0x2518] sm:$0xff] }
 0x26a   : > { %v1542_v54 = vld [vmem:[%s7810_s17 + $0x2580] sm:$0xff]  ;;  %v1543_v56 = vld [vmem:[%s7810_s17 + $0x2588] sm:$0xff]  ;;  %v1883_v39 = vcombine.high %v341_v45, %v341_v45  ;;  %v1516_v29 = vld [vmem:[%s7810_s17 + $0x24b0] sm:$0xff] }
 0x26b   : > { %7291 = vmatpush3.bf16.msra.mxu0 %v7290_v12  ;;  %v1457_v12 = vld [vmem:[%s7810_s17 + $0x22d8] sm:$0xff]  ;;  %v7420_v49 = vpack.c.bf16 %v1543_v56, %v1542_v54  ;;  %v1535_v54 = vld [vmem:[%s7810_s17 + $0x2548] sm:$0xff]  ;;  %v1520_v56 = vld [vmem:[%s7810_s17 + $0x24d0] sm:$0xff] }
 0x26c   : > { %7323 = vmatpush3.bf16.msra.mxu1 %v7322_v63  ;;  %7325 = vmatprep.subr.bf16.mxu0 %v7324_v15  ;;  %v1488_v63 = vld [vmem:[%s7810_s17 + $0x23d0] sm:$0xff]  ;;  %v1489_v15 = vld [vmem:[%s7810_s17 + $0x23d8] sm:$0xff]  ;;  %v7344_v8 = vpack.c.bf16 %v1457_v12, %v1456_v50  ;;  %v9266_v50 = vrot.slane %v341_v45, %v7896_v14 }
 0x26d   : > { %7357 = vmatprep.subr.bf16.mxu1 %v7356_v60  ;;  %v1440_v60 = vld [vmem:[%s7810_s17 + $0x2250] sm:$0xff]  ;;  %v7376_v11 = vpack.c.bf16 %v1489_v15, %v1488_v63  ;;  %v1545_v63 = vld [vmem:[%s7810_s17 + $0x2598] sm:$0xff]  ;;  %v9271_v15 = vrot.slane %v1883_v39, %v7896_v14  ;;  %v1515_v14 = vld [vmem:[%s7810_s17 + $0x24a8] sm:$0xff] }
 0x26e   : > { %4281 = vmatmul.mubr.f32.vlgmr.msra.gmra.mrb[32].mxu0 %v9106_v7  ;;  %v1435_v7 = vld [vmem:[%s7810_s17 + $0x2228] sm:$0xff]  ;;  %v7346_v21 = vpack.c.bf16 %v1441_v9, %v1440_v60  ;;  %v1544_v12 = vld [vmem:[%s7810_s17 + $0x2590] sm:$0xff]  ;;  %v1497_v9 = vld [vmem:[%s7810_s17 + $0x2418] sm:$0xff] }
 0x26f   : > { %7327 = vmatpush3.bf16.msra.mxu0 %v7326_v16  ;;  %4351 = vmatmul.mubr.f32.vlgmr.msra.gmra.mrb[32].mxu1 %v9111_v34  ;;  %v1484_v34 = vld [vmem:[%s7810_s17 + $0x23b0] sm:$0xff]  ;;  %v7334_v46 = vpack.c.bf16 %v1435_v7, %v1434_v37  ;;  %v1459_v16 = vld [vmem:[%s7810_s17 + $0x22e8] sm:$0xff]  ;;  %v1493_v37 = vld [vmem:[%s7810_s17 + $0x23f8] sm:$0xff] }
 0x270   : > { %7359 = vmatpush3.bf16.msra.mxu1 %v7358_v52  ;;  %7329 = vmatprep.subr.bf16.mxu0 %v7328_v19  ;;  %v7368_v53 = vpack.c.bf16 %v1485_v55, %v1484_v34  ;;  %v1490_v52 = vld [vmem:[%s7810_s17 + $0x23e0] sm:$0xff]  ;;  %v1491_v19 = vld [vmem:[%s7810_s17 + $0x23e8] sm:$0xff]  ;;  %v7348_v17 = vpack.c.bf16 %v1459_v16, %v1458_v13  ;;  %v1444_v55 = vld [vmem:[%s7810_s17 + $0x2270] sm:$0xff]  ;;  %v1898_v16 = vcombine.high %v9266_v50, %v9266_v50 }
 0x271   : > { %7361 = vmatprep.subr.bf16.mxu1 %v7360_v24  ;;  %4420 = vmatprep.mubr.f32.mxu0 %v1881_v2  ;;  %v1442_v24 = vld [vmem:[%s7810_s17 + $0x2260] sm:$0xff]  ;;  %v7380_v2 = vpack.c.bf16 %v1491_v19, %v1490_v52  ;;  %v1496_v60 = vld [vmem:[%s7810_s17 + $0x2410] sm:$0xff]  ;;  %v1547_v19 = vld [vmem:[%s7810_s17 + $0x25a8] sm:$0xff] }
 0x272   : > { %4490 = vmatprep.mubr.f32.mxu1 %v1882_v31  ;;  %v1461_v31 = vld [vmem:[%s7810_s17 + $0x22f8] sm:$0xff]  ;;  %v1514_v13 = vld [vmem:[%s7810_s17 + $0x24a0] sm:$0xff] }
 0x273   : > { %7331 = vmatpush3.bf16.msra.mxu0 %v7330_v32  ;;  %v7352_v34 = vpack.c.bf16 %v1461_v31, %v1460_v30  ;;  %v1546_v52 = vld [vmem:[%s7810_s17 + $0x25a0] sm:$0xff]  ;;  %v1517_v30 = vld [vmem:[%s7810_s17 + $0x24b8] sm:$0xff] }
 0x274   : > { %7363 = vmatpush3.bf16.msra.mxu1 %v7362_v33  ;;  %7333 = vmatprep.subr.bf16.mxu0 %v7332_v48  ;;  %v1492_v48 = vld [vmem:[%s7810_s17 + $0x23f0] sm:$0xff]  ;;  %v1549_v31 = vld [vmem:[%s7810_s17 + $0x25b8] sm:$0xff] }
 0x275   : > { %7365 = vmatprep.subr.bf16.mxu1 %v7364_v26  ;;  %v7350_v26 = vpack.c.bf16 %v1443_v36, %v1442_v24  ;;  %v7384_v18 = vpack.c.bf16 %v1493_v37, %v1492_v48  ;;  %v7396_v24 = vpack.c.bf16 %v1515_v14, %v1514_v13  ;;  %v1498_v36 = vld [vmem:[%s7810_s17 + $0x2420] sm:$0xff]  ;;  %v7400_v48 = vpack.c.bf16 %v1517_v30, %v1516_v29  ;;  %v1500_v37 = vld [vmem:[%s7810_s17 + $0x2430] sm:$0xff]  ;;  %v1533_v45 = vld [vmem:[%s7810_s17 + $0x2538] sm:$0xff] }
 0x276   : > { %v1521_v39 = vld [vmem:[%s7810_s17 + $0x24d8] sm:$0xff]  ;;  %v1508_v30 = vld [vmem:[%s7810_s17 + $0x2470] sm:$0xff] }
 0x277   : > { %7335 = vmatpush3.bf16.msra.mxu0 %v7334_v46  ;;  %v1445_v46 = vld [vmem:[%s7810_s17 + $0x2278] sm:$0xff] }
 0x278   : > { %7367 = vmatpush3.bf16.msra.mxu1 %v7366_v58  ;;  %7337 = vmatprep.subr.bf16.mxu0 %v7336_v42  ;;  %v1476_v58 = vld [vmem:[%s7810_s17 + $0x2370] sm:$0xff] }
 0x279   : > { %7369 = vmatprep.subr.bf16.mxu1 %v7368_v53  ;;  %v1511_v53 = vld [vmem:[%s7810_s17 + $0x2488] sm:$0xff]  ;;  %v7386_v57 = vpack.c.bf16 %v1477_v51, %v1476_v58 }
 0x27a   : > { %v1503_v51 = vld [vmem:[%s7810_s17 + $0x2448] sm:$0xff] }
 0x27b   : > { %7339 = vmatpush3.bf16.msra.mxu0 %v7338_v5  ;;  %v7388_v5 = vpack.c.bf16 %v1511_v53, %v1510_v38  ;;  %v1534_v38 = vld [vmem:[%s7810_s17 + $0x2540] sm:$0xff] }
 0x27c   : > { %7371 = vmatpush3.bf16.msra.mxu1 %v7370_v59  ;;  %7341 = vmatprep.subr.bf16.mxu0 %v7340_v28  ;;  %v1494_v59 = vld [vmem:[%s7810_s17 + $0x2400] sm:$0xff]  ;;  %v1495_v28 = vld [vmem:[%s7810_s17 + $0x2408] sm:$0xff] }
 0x27d   : > { %7373 = vmatprep.subr.bf16.mxu1 %v7372_v0  ;;  %v1512_v0 = vld [vmem:[%s7810_s17 + $0x2490] sm:$0xff] }
 0x27f   : > { %7343 = vmatpush3.bf16.msra.mxu0 %v7342_v6  ;;  %v7390_v6 = vpack.c.bf16 %v1495_v28, %v1494_v59  ;;  %v7438_v59 = vpack.c.bf16 %v1535_v54, %v1534_v38  ;;  %v7408_v28 = vpack.c.bf16 %v1521_v39, %v1520_v56 }
 0x280   : > { %7375 = vmatpush3.bf16.msra.mxu1 %v7374_v41  ;;  %7345 = vmatprep.subr.bf16.mxu0 %v7344_v8  ;;  %v7422_v41 = vpack.c.bf16 %v1527_v47, %v1526_v62  ;;  %v7392_v8 = vpack.c.bf16 %v1513_v3, %v1512_v0  ;;  %v1504_v62 = vld [vmem:[%s7810_s17 + $0x2450] sm:$0xff]  ;;  %v1537_v3 = vld [vmem:[%s7810_s17 + $0x2558] sm:$0xff] }
 0x281   : > { %v5610_v23 = vpop.f32.mrb[20].mxu0  ;;  %7377 = vmatprep.subr.bf16.mxu1 %v7376_v11  ;;  %v7424_v11 = vpack.c.bf16 %v1545_v63, %v1544_v12  ;;  %v1536_v47 = vld [vmem:[%s7810_s17 + $0x2550] sm:$0xff]  ;;  %v1522_v12 = vld [vmem:[%s7810_s17 + $0x24e0] sm:$0xff]  ;;  %v1523_v63 = vld [vmem:[%s7810_s17 + $0x24e8] sm:$0xff] }
 0x282   : > { %v5611_v32 = vpop.f32.mrb[21].mxu0  ;;  %v5645_v33 = vpop.f32.mrb[20].mxu1 }
 0x283   : > { %v5612_v7 = vadd.f32 %v5611_v32, %v5610_v23  ;;  %7347 = vmatpush3.bf16.msra.mxu0 %v7346_v21  ;;  %v5646_v40 = vpop.f32.mrb[21].mxu1  ;;  %v1899_v21 = vcombine.high %v9271_v15, %v9271_v15  ;;  %v7428_v23 = vpack.c.bf16 %v1547_v19, %v1546_v52  ;;  %v1524_v52 = vld [vmem:[%s7810_s17 + $0x24f0] sm:$0xff]  ;;  %v1525_v19 = vld [vmem:[%s7810_s17 + $0x24f8] sm:$0xff] }
 0x284   : > { %v5647_v43 = vadd.f32 %v5646_v40, %v5645_v33  ;;  %7379 = vmatpush3.bf16.msra.mxu1 %v7378_v22  ;;  %7349 = vmatprep.subr.bf16.mxu0 %v7348_v17  ;;  %v7394_v22 = vpack.c.bf16 %v1497_v9, %v1496_v60  ;;  %v7426_v17 = vpack.c.bf16 %v1529_v25, %v1528_v10  ;;  %v1532_v40 = vld [vmem:[%s7810_s17 + $0x2530] sm:$0xff]  ;;  %v1506_v10 = vld [vmem:[%s7810_s17 + $0x2460] sm:$0xff] }
 0x285   : > { %v3443_v42 = vadd.f32 %v5612_v7, %v9177_v4  ;;  %7381 = vmatprep.subr.bf16.mxu1 %v7380_v2  ;;  %v7354_v4 = vpack.c.bf16 %v1445_v46, %v1444_v55  ;;  %v1531_v2 = vld [vmem:[%s7810_s17 + $0x2528] sm:$0xff]  ;;  %v1501_v7 = vld [vmem:[%s7810_s17 + $0x2438] sm:$0xff]  ;;  %v7434_v58 = vpack.c.bf16 %v1533_v45, %v1532_v40  ;;  %v7442_v60 = vpack.c.bf16 %v1537_v3, %v1536_v47  ;;  %v1538_v25 = vld [vmem:[%s7810_s17 + $0x2560] sm:$0xff] }
 0x286   : > { %v7430_v33 = vpack.c.bf16 %v1531_v2, %v1530_v20  ;;  %v1551_v55 = vld [vmem:[%s7810_s17 + $0x25c8] sm:$0xff]  ;;  %v7402_v46 = vpack.c.bf16 %v1501_v7, %v1500_v37  ;;  %v7412_v9 = vpack.c.bf16 %v1523_v63, %v1522_v12  ;;  %v7416_v29 = vpack.c.bf16 %v1525_v19, %v1524_v52 }
 0x287   : > { %v9257_v35 = vadd.f32 %v5647_v43, %v3443_v42  ;;  %7351 = vmatpush3.bf16.msra.mxu0 %v7350_v26  ;;  %v1518_v43 = vld [vmem:[%s7810_s17 + $0x24c0] sm:$0xff] }
 0x288   : > { %7383 = vmatpush3.bf16.msra.mxu1 %v7382_v44  ;;  %7353 = vmatprep.subr.bf16.mxu0 %v7352_v34  ;;  %v1519_v44 = vld [vmem:[%s7810_s17 + $0x24c8] sm:$0xff]  ;;  %v1550_v34 = vld [vmem:[%s7810_s17 + $0x25c0] sm:$0xff] }
 0x289   : > { %7385 = vmatprep.subr.bf16.mxu1 %v7384_v18  ;;  %v7404_v42 = vpack.c.bf16 %v1519_v44, %v1518_v43  ;;  %v1502_v18 = vld [vmem:[%s7810_s17 + $0x2440] sm:$0xff]  ;;  %v7436_v53 = vpack.c.bf16 %v1551_v55, %v1550_v34 }
 0x28b   : > { %7355 = vmatpush3.bf16.msra.mxu0 %v7354_v4  ;;  %v1552_v4 = vld [vmem:[%s7810_s17 + $0x25d0] sm:$0xff] }
 0x28c   : > { %7387 = vmatpush3.bf16.msra.mxu1 %v7386_v57  ;;  %7389 = vmatprep.subr.bf16.mxu0 %v7388_v5  ;;  %v1553_v57 = vld [vmem:[%s7810_s17 + $0x25d8] sm:$0xff]  ;;  %v7406_v5 = vpack.c.bf16 %v1503_v51, %v1502_v18 }
 0x28d   : > { %7421 = vmatprep.subr.bf16.mxu1 %v7420_v49  ;;  %v1505_v49 = vld [vmem:[%s7810_s17 + $0x2458] sm:$0xff]  ;;  %v7440_v0 = vpack.c.bf16 %v1553_v57, %v1552_v4 }
 0x28e   : > { %4421 = vmatmul.mubr.f32.vlgmr.msra.gmra.mrb[34].mxu0 %v9186_v61  ;;  %v1499_v61 = vld [vmem:[%s7810_s17 + $0x2428] sm:$0xff] }
 0x28f   : > { %7391 = vmatpush3.bf16.msra.mxu0 %v7390_v6  ;;  %4491 = vmatmul.mubr.f32.vlgmr.msra.gmra.mrb[34].mxu1 %v9191_v27  ;;  %v1548_v27 = vld [vmem:[%s7810_s17 + $0x25b0] sm:$0xff]  ;;  %v7398_v32 = vpack.c.bf16 %v1499_v61, %v1498_v36  ;;  %v1554_v6 = vld [vmem:[%s7810_s17 + $0x25e0] sm:$0xff] }
 0x290   : > { %7423 = vmatpush3.bf16.msra.mxu1 %v7422_v41  ;;  %7393 = vmatprep.subr.bf16.mxu0 %v7392_v8  ;;  %v7432_v26 = vpack.c.bf16 %v1549_v31, %v1548_v27  ;;  %v1555_v41 = vld [vmem:[%s7810_s17 + $0x25e8] sm:$0xff]  ;;  %v7410_v8 = vpack.c.bf16 %v1505_v49, %v1504_v62  ;;  %v1509_v27 = vld [vmem:[%s7810_s17 + $0x2478] sm:$0xff] }
 0x291   : > { %7425 = vmatprep.subr.bf16.mxu1 %v7424_v11  ;;  %4560 = vmatprep.mubr.f32.mxu0 %v1898_v16  ;;  %v1507_v11 = vld [vmem:[%s7810_s17 + $0x2468] sm:$0xff]  ;;  %v7444_v14 = vpack.c.bf16 %v1555_v41, %v1554_v6  ;;  %v7418_v7 = vpack.c.bf16 %v1509_v27, %v1508_v30  ;;  %v322_v27 = vld [vmem:[#allocation2] sm:$0x3] }
 0x292   : > { %4630 = vmatprep.mubr.f32.mxu1 %v1899_v21  ;;  %v1539_v16 = vld [vmem:[%s7810_s17 + $0x2568] sm:$0xff]  ;;  %v7414_v20 = vpack.c.bf16 %v1507_v11, %v1506_v10 }
 0x293   : > { %7395 = vmatpush3.bf16.msra.mxu0 %v7394_v22  ;;  %v7446_v2 = vpack.c.bf16 %v1539_v16, %v1538_v25 }
 0x294   : > { %7427 = vmatpush3.bf16.msra.mxu1 %v7426_v17  ;;  %7397 = vmatprep.subr.bf16.mxu0 %v7396_v24  ;;  %v1556_v17 = vld [vmem:[%s7810_s17 + $0x25f0] sm:$0xff]  ;;  %v1557_v24 = vld [vmem:[%s7810_s17 + $0x25f8] sm:$0xff] }
 0x295   : > { %7429 = vmatprep.subr.bf16.mxu1 %v7428_v23 }
 0x297   : > { %7399 = vmatpush3.bf16.msra.mxu0 %v7398_v32  ;;  %v7448_v32 = vpack.c.bf16 %v1557_v24, %v1556_v17 }
 0x298   : > { %7431 = vmatpush3.bf16.msra.mxu1 %v7430_v33  ;;  %7401 = vmatprep.subr.bf16.mxu0 %v7400_v48  ;;  %v1540_v33 = vld [vmem:[%s7810_s17 + $0x2570] sm:$0xff]  ;;  %v1541_v48 = vld [vmem:[%s7810_s17 + $0x2578] sm:$0xff] }
 0x299   : > { %7433 = vmatprep.subr.bf16.mxu1 %v7432_v26  ;;  %v7450_v40 = vpack.c.bf16 %v1541_v48, %v1540_v33  ;;  %v4653_v33 = vld [vmem:[%s7829_s8] sm:$0xff] (!%p4872_p6)  ;;  %v4654_v48 = vld [vmem:[%s7829_s8 + $0x8] sm:$0xff] (!%p4872_p6) }
 0x29b   : > { %7403 = vmatpush3.bf16.msra.mxu0 %v7402_v46 }
 0x29c   : > { %7435 = vmatpush3.bf16.msra.mxu1 %v7434_v58  ;;  %7405 = vmatprep.subr.bf16.mxu0 %v7404_v42 }
 0x29d   : > { %7437 = vmatprep.subr.bf16.mxu1 %v7436_v53 }
 0x29f   : > { %7407 = vmatpush3.bf16.msra.mxu0 %v7406_v5 }
 0x2a0   : > { %7439 = vmatpush3.bf16.msra.mxu1 %v7438_v59  ;;  %7409 = vmatprep.subr.bf16.mxu0 %v7408_v28 }
 0x2a1   : > { %v5680_v13 = vpop.f32.mrb[22].mxu0  ;;  %7441 = vmatprep.subr.bf16.mxu1 %v7440_v0 }
 0x2a2   : > { %v5681_v21 = vpop.f32.mrb[23].mxu0  ;;  %v5715_v22 = vpop.f32.mrb[22].mxu1 }
 0x2a3   : > { %v5682_v36 = vadd.f32 %v5681_v21, %v5680_v13  ;;  %7411 = vmatpush3.bf16.msra.mxu0 %v7410_v8  ;;  %v5716_v61 = vpop.f32.mrb[23].mxu1 }
 0x2a4   : > { %v5717_v23 = vadd.f32 %v5716_v61, %v5715_v22  ;;  %7443 = vmatpush3.bf16.msra.mxu1 %v7442_v60  ;;  %7413 = vmatprep.subr.bf16.mxu0 %v7412_v9 }
 0x2a5   : > { %v3583_v31 = vadd.f32 %v5682_v36, %v9257_v35  ;;  %7445 = vmatprep.subr.bf16.mxu1 %v7444_v14 }
 0x2a7   : > { %v3653_v37 = vadd.f32 %v5717_v23, %v3583_v31  ;;  %7415 = vmatpush3.bf16.msra.mxu0 %v7414_v20 }
 0x2a8   : > { %7447 = vmatpush3.bf16.msra.mxu1 %v7446_v2  ;;  %7417 = vmatprep.subr.bf16.mxu0 %v7416_v29 }
 0x2a9   : > { %7449 = vmatprep.subr.bf16.mxu1 %v7448_v32 }
 0x2ab   : > { %7419 = vmatpush3.bf16.msra.mxu0 %v7418_v7  ;;  %v7667_v7 = vmov (!%p4872_p6), 0.0|0.0  }
 0x2ac   : > { %7451 = vmatpush3.bf16.msra.mxu1 %v7450_v40  ;;  %7452 = vmatprep.subr.bf16.mxu0 (!%p4872_p6), %v7667_v7  ;;  %v7453_v40 = vpack.c.bf16 (!%p4872_p6), %v4654_v48, %v4653_v33 }
 0x2ae   : > { %4561 = vmatmul.mubr.f32.vlgmr.msra.gmra.mrb[36].mxu0 %v9266_v50 }
 0x2af   : > { %4631 = vmatmul.mubr.f32.vlgmr.msra.gmra.mrb[36].mxu1 %v9271_v15  ;;  %7454 = vmatpush3.bf16.msra.mxu0 (!%p4872_p6), %v7453_v40 }
 0x2b0   : > { %7455 = vmatprep.subr.bf16.mxu0 (!%p4872_p6), %v7667_v7 }
 0x2c1   : > { %v5750_v26 = vpop.f32.mrb[24].mxu0 }
 0x2c2   : > { %v5751_v45 = vpop.f32.mrb[25].mxu0  ;;  %v5785_v35 = vpop.f32.mrb[24].mxu1 }
 0x2c3   : > { %v5752_v43 = vadd.f32 %v5751_v45, %v5750_v26  ;;  %v5786_v44 = vpop.f32.mrb[25].mxu1  ;;  %v4656_v26 = vld [vmem:[%s7829_s8 + $0x18] sm:$0xff] (!%p4872_p6)  ;;  %v7669_v45 = vmov (!%p4872_p6), 0.0  }
 0x2c4   : > { %v5787_v34 = vadd.f32 %v5786_v44, %v5785_v35  ;;  %6233 = vmatprep.mubr.msk.f32.mxu0 (!%p4872_p6), %vm7668_vm2, %v7669_v45  ;;  %v4658_v44 = vld [vmem:[%s7829_s8 + $0x28] sm:$0xff] (!%p4872_p6) }
 0x2c5   : > { %v3723_v55 = vadd.f32 %v5752_v43, %v3653_v37  ;;  %v4655_v37 = vld [vmem:[%s7829_s8 + $0x10] sm:$0xff] (!%p4872_p6)  ;;  %v4657_v43 = vld [vmem:[%s7829_s8 + $0x20] sm:$0xff] (!%p4872_p6) }
 0x2c6   : > { %v7456_v35 = vpack.c.bf16 (!%p4872_p6), %v4656_v26, %v4655_v37 }
 0x2c7   : > { %v3793_v46 = vadd.f32 %v5787_v34, %v3723_v55  ;;  %v7459_v34 = vpack.c.bf16 (!%p4872_p6), %v4658_v44, %v4657_v43 }
 0x2c8   : > { %7457 = vmatpush3.bf16.msra.mxu0 (!%p4872_p6), %v7456_v35 }
 0x2c9   : > { %7458 = vmatprep.subr.bf16.mxu0 (!%p4872_p6), %v7667_v7 }
 0x2cc   : > { %7460 = vmatpush3.bf16.msra.mxu0 (!%p4872_p6), %v7459_v34 }
 0x2cd   : > { %7461 = vmatprep.subr.bf16.mxu0 (!%p4872_p6), %v7667_v7 }
 0x2e1   : > { %v5820_v58 = vpop.f32.mrb[26].mxu0 }
 0x2e2   : > { %v5821_v42 = vpop.f32.mrb[27].mxu0  ;;  %v5855_v18 = vpop.f32.mrb[26].mxu1 }
 0x2e3   : > { %v5822_v51 = vadd.f32 %v5821_v42, %v5820_v58  ;;  %v5856_v38 = vpop.f32.mrb[27].mxu1  ;;  %v4659_v58 = vld [vmem:[%s7829_s8 + $0x30] sm:$0xff] (!%p4872_p6)  ;;  %v4660_v42 = vld [vmem:[%s7829_s8 + $0x38] sm:$0xff] (!%p4872_p6) }
 0x2e4   : > { %v5857_v53 = vadd.f32 %v5856_v38, %v5855_v18 }
 0x2e5   : > { %v3863_v54 = vadd.f32 %v5822_v51, %v3793_v46  ;;  %v4873_v46 = vld [vmem:[%s306_s9] ss:$0 sm:$0xff] (!%p4872_p6)  ;;  %v7462_v51 = vpack.c.bf16 (!%p4872_p6), %v4660_v42, %v4659_v58 }
 0x2e7   : > { %v3933_v56 = vadd.f32 %v5857_v53, %v3863_v54  ;;  %7463 = vmatpush3.bf16.msra.mxu0 (!%p4872_p6), %v7462_v51  ;;  %v4664_v53 = vld [vmem:[%s9382_s4] sm:$0x1] (!%p4872_p6) }
 0x301   : > { %v5890_v39 = vpop.f32.mrb[28].mxu0 }
 0x302   : > { %v5891_v50 = vpop.f32.mrb[29].mxu0  ;;  %v5925_v4 = vpop.f32.mrb[28].mxu1 }
 0x303   : > { %v5892_v15 = vadd.f32 %v5891_v50, %v5890_v39  ;;  %v5926_v57 = vpop.f32.mrb[29].mxu1  ;;  %v4670_v39 = vsub.s32 (!%p4872_p6), 0, %v7885_v1 }
 0x304   : > { %v5927_v5 = vadd.f32 %v5926_v57, %v5925_v4 }
 0x305   : > { %v4003_v59 = vadd.f32 %v5892_v15, %v3933_v56 }
 0x307   : > { %v4073_v28 = vadd.f32 %v5927_v5, %v4003_v59 }
 0x321   : > { %v5960_v62 = vpop.f32.mrb[30].mxu0 }
 0x322   : > { %v5961_v49 = vpop.f32.mrb[31].mxu0  ;;  %v5995_v47 = vpop.f32.mrb[30].mxu1 }
 0x323   : > { %v5962_v0 = vadd.f32 %v5961_v49, %v5960_v62  ;;  %v5996_v3 = vpop.f32.mrb[31].mxu1 }
 0x324   : > { %v5997_v12 = vadd.f32 %v5996_v3, %v5995_v47 }
 0x325   : > { %v4143_v63 = vadd.f32 %v5962_v0, %v4073_v28 }
 0x327   : > { %v4213_v6 = vadd.f32 %v5997_v12, %v4143_v63 }
 0x341   : > { %v6030_v41 = vpop.f32.mrb[32].mxu0 }
 0x342   : > { %v6031_v8 = vpop.f32.mrb[33].mxu0  ;;  %v6065_v60 = vpop.f32.mrb[32].mxu1 }
 0x343   : > { %v6032_v9 = vadd.f32 %v6031_v8, %v6030_v41  ;;  %v6066_v10 = vpop.f32.mrb[33].mxu1 }
 0x344   : > { %v6067_v11 = vadd.f32 %v6066_v10, %v6065_v60 }
 0x345   : > { %v4283_v25 = vadd.f32 %v6032_v9, %v4213_v6 }
 0x347   : > { %v4353_v13 = vadd.f32 %v6067_v11, %v4283_v25 }
 0x361   : > { %v6100_v14 = vpop.f32.mrb[34].mxu0 }
 0x362   : > { %v6101_v16 = vpop.f32.mrb[35].mxu0  ;;  %v6135_v52 = vpop.f32.mrb[34].mxu1 }
 0x363   : > { %v6102_v19 = vadd.f32 %v6101_v16, %v6100_v14  ;;  %v6136_v21 = vpop.f32.mrb[35].mxu1 }
 0x364   : > { %v6137_v22 = vadd.f32 %v6136_v21, %v6135_v52 }
 0x365   : > { %v4423_v17 = vadd.f32 %v6102_v19, %v4353_v13 }
 0x367   : > { %v4493_v24 = vadd.f32 %v6137_v22, %v4423_v17 }
 0x381   : > { %v6170_v36 = vpop.f32.mrb[36].mxu0 }
 0x382   : > { %v6171_v61 = vpop.f32.mrb[37].mxu0  ;;  %v6205_v20 = vpop.f32.mrb[36].mxu1 }
 0x383   : > { %v6172_v23 = vadd.f32 %v6171_v61, %v6170_v36  ;;  %v6206_v2 = vpop.f32.mrb[37].mxu1 }
 0x384   : > { %v6207_v29 = vadd.f32 %v6206_v2, %v6205_v20 }
 0x385   : > { %v4563_v30 = vadd.f32 %v6172_v23, %v4493_v24  ;;  %4642 = sbr.rel (%p4872_p6) target bundleno = 1134 (0x46e), region = 52 }
 0x387   : > { %v4633_v31 = vadd.f32 %v6207_v29, %v4563_v30 }
 0x389   : > { %v4636_v32 = vadd.f32 %v4633_v31, %v322_v27 }
 0x38b   : > { %4638 = vst.msk [vmem:[#allocation2] sm:$0x3] %vm4637_vm1, %v4636_v32 }
 0x38c   : > { %s4662_s28 = scalar_select %p4661_p8, 1, 0 }
 0x38e   : > { %s4663_s17 = scvt.s32.f32 %s4662_s28 }
 0x390   : > { %v4665_v54 = vstv %s4663_s17 }
 0x391   : > { %v4666_v56 = vmul.f32 %v4665_v54, %v4664_v53 }
 0x392   : > { %v4643_v55 = vld [vmem:[#allocation2] sm:$0x3] }
 0x393   : > { %v4651_v18 = vadd.f32 %v4873_v46, %v4643_v55  ;;  %v4671_v50 = vrot.slane %v4666_v56, %v4670_v39 }
 0x395   : > { %v4652_v38 = vmax.f32 %v4651_v18, 0.0 }
 0x397   : > { %6234 = vmatmul.mubr.msk.f32.vlgmr.msra.gmra.mrb[0].mxu0 %vm4673_vm3, %v4652_v38 }
 0x46a   : > { %v4743_v4 = vpop.f32.mrb[0].mxu0 }
 0x46b   : > { %v4744_v15 = vadd.f32 %v4743_v4, %v4671_v50  ;;  %v6235_v57 = vpop.f32.mrb[1].mxu0 }
 0x46d   : > { %4748 = vst.msk [vmem:[%s7840_s27] sm:$0x3] %vm4747_vm4, %v4744_v15 }
 0x46e PF: > { %s18_s25 = sadd.s32 1, %s7660_s25   ;;  %s9393_s16 = sld [smem:[#allocation6_spill]] }
 0x46f   : > { %p15_p9 = scmp.ge.s32.totalorder %s18_s25, 18   ;;  %s9394_s29 = sld [smem:[#allocation7_spill]] }
 0x470   : > { %s9395_s18 = smov %s7636_s19  ;;  %s9396_s19 = smov %s7640_s20 }
 0x471   : > { %s9397_s20 = smov %s7766_s12  ;;  %s9398_s21 = smov %s7652_s23 }
 0x472   : > { %s9399_s22 = smov %s7656_s24  ;;  %17 = sbr.rel (!%p15_p9) target bundleno = 7 (0x7), region = 97 }
 0x474   : > { %s9400_s23 = smov %s9393_s16 }
 0x475   : > { %s9401_s24 = smov %s9394_s29 }
 0x479   :  { %4768 = vsyncpa [#allocation4], 1 }
 0x47a   :  { %4770 = vsyncpa [#allocation4 + $0x1], 1 }

</bundles_post_ra>
